<compile_context>
chip_gen: v5e
topology: v5e:2x2
jax: 0.10.0
libtpu: 0.0.40
codegen_flags: <defaults>
</compile_context>

<pallas_src>
import functools
import math

import jax
import jax.numpy as jnp
from jax import lax
from jax.experimental import pallas as pl
from jax.experimental.pallas import tpu as pltpu


# ---------------------------- fused Pallas kernels ----------------------------

def _self_attn_core_kernel(y_ref, w_qkv_ref, b_qkv_ref, o_ref, *,
                           num_heads, head_dim):
    """One batch element: qkv = y @ Wqkv + b; per-head causal attention.

    y_ref: (S, D); w_qkv_ref: (D, 3D); b_qkv_ref: (1, 3D); o_ref: (H, S, hd).
    """
    y = y_ref[...]
    qkv = jnp.dot(y, w_qkv_ref[...], preferred_element_type=jnp.float32)
    qkv = qkv + b_qkv_ref[...]
    s = y.shape[0]
    scale = 1.0 / math.sqrt(head_dim)

    # causal mask built in-kernel (equivalent to torch.triu(full(-inf), diagonal=1), additive)
    row = lax.broadcasted_iota(jnp.int32, (s, s), 0)
    col = lax.broadcasted_iota(jnp.int32, (s, s), 1)
    mask = jnp.where(col > row, jnp.float32(-1e9), jnp.float32(0.0))

    for h in range(num_heads):           # statically unrolled; H is small
        base = h * 3 * head_dim
        q = qkv[:, base:base + head_dim]
        k = qkv[:, base + head_dim:base + 2 * head_dim]
        v = qkv[:, base + 2 * head_dim:base + 3 * head_dim]
        scores = lax.dot_general(q, k, (((1,), (1,)), ((), ())),
                                 preferred_element_type=jnp.float32) * scale
        scores = scores + mask
        m = jnp.max(scores, axis=-1, keepdims=True)
        p = jnp.exp(scores - m)
        denom = jnp.sum(p, axis=-1, keepdims=True)
        attn = p * pl.reciprocal(denom, approx=True)
        o_ref[h] = jnp.dot(attn, v,
                           preferred_element_type=jnp.float32).astype(o_ref.dtype)


def _cross_attn_core_kernel(x_ref, y_ref, w_kv_ref, b_kv_ref, w_q_ref, b_q_ref,
                            o_ref, *, num_heads, head_dim):
    """One batch element: kv = x @ Wkv + b; q = y @ Wq + b; per-head attention (no mask)."""
    kv = jnp.dot(x_ref[...], w_kv_ref[...], preferred_element_type=jnp.float32)
    kv = kv + b_kv_ref[...]
    q_all = jnp.dot(y_ref[...], w_q_ref[...], preferred_element_type=jnp.float32)
    q_all = q_all + b_q_ref[...]
    scale = 1.0 / math.sqrt(head_dim)

    for h in range(num_heads):
        q = q_all[:, h * head_dim:(h + 1) * head_dim]
        base = h * 2 * head_dim
        k = kv[:, base:base + head_dim]
        v = kv[:, base + head_dim:base + 2 * head_dim]
        scores = lax.dot_general(q, k, (((1,), (1,)), ((), ())),
                                 preferred_element_type=jnp.float32) * scale
        m = jnp.max(scores, axis=-1, keepdims=True)
        p = jnp.exp(scores - m)
        denom = jnp.sum(p, axis=-1, keepdims=True)
        attn = p * pl.reciprocal(denom, approx=True)
        o_ref[h] = jnp.dot(attn, v,
                           preferred_element_type=jnp.float32).astype(o_ref.dtype)


def _proj_add_ln_kernel(v_ref, resid_ref, w_ref, b_ref, gamma_ref, beta_ref,
                        o_ref, *, eps):
    """out = LayerNorm(v @ W + b + resid)."""
    proj = jnp.dot(v_ref[...], w_ref[...], preferred_element_type=jnp.float32)
    x = proj + b_ref[...] + resid_ref[...].astype(jnp.float32)
    mean = jnp.mean(x, axis=-1, keepdims=True)
    var = jnp.mean((x - mean) ** 2, axis=-1, keepdims=True)
    y = (x - mean) * lax.rsqrt(var + eps)
    o_ref[...] = (gamma_ref[...] * y + beta_ref[...]).astype(o_ref.dtype)


def _ffn_add_ln_kernel(y_ref, w1_ref, b1_ref, w2_ref, b2_ref, gamma_ref, beta_ref,
                       o_ref, *, eps):
    """out = LayerNorm(relu(y @ W1 + b1) @ W2 + b2 + y)."""
    y = y_ref[...].astype(jnp.float32)
    h = jnp.dot(y, w1_ref[...], preferred_element_type=jnp.float32) + b1_ref[...]
    h = jnp.maximum(h, 0.0)
    proj = jnp.dot(h, w2_ref[...], preferred_element_type=jnp.float32) + b2_ref[...]
    x = proj + y
    mean = jnp.mean(x, axis=-1, keepdims=True)
    var = jnp.mean((x - mean) ** 2, axis=-1, keepdims=True)
    out = (x - mean) * lax.rsqrt(var + eps)
    o_ref[...] = (gamma_ref[...] * out + beta_ref[...]).astype(o_ref.dtype)


# ---------------------------- wrappers ----------------------------

_PARALLEL_1D = pltpu.CompilerParams(dimension_semantics=("parallel",))


def _pick_row_block(n):
    for cand in (512, 256, 128, 64, 32, 16, 8):
        if n % cand == 0:
            return cand
    return n


def self_attention_core(y, w_qkv, b_qkv, num_heads):
    b, s, d = y.shape
    hd = d // num_heads
    return pl.pallas_call(
        functools.partial(_self_attn_core_kernel, num_heads=num_heads, head_dim=hd),
        out_shape=jax.ShapeDtypeStruct((b, num_heads, s, hd), y.dtype),
        grid=(b,),
        in_specs=[
            pl.BlockSpec((pl.Squeezed(), s, d), lambda i: (i, 0, 0)),
            pl.BlockSpec((d, 3 * d), lambda i: (0, 0)),
            pl.BlockSpec((1, 3 * d), lambda i: (0, 0)),
        ],
        out_specs=pl.BlockSpec((pl.Squeezed(), num_heads, s, hd),
                               lambda i: (i, 0, 0, 0)),
        compiler_params=_PARALLEL_1D,
    )(y, w_qkv, b_qkv.reshape(1, 3 * d))


def cross_attention_core(x, y, w_kv, b_kv, w_q, b_q, num_heads):
    # NOTE: assumes x and y share the same sequence length (as in the reference usage).
    b, s, d = y.shape
    hd = d // num_heads
    return pl.pallas_call(
        functools.partial(_cross_attn_core_kernel, num_heads=num_heads, head_dim=hd),
        out_shape=jax.ShapeDtypeStruct((b, num_heads, s, hd), y.dtype),
        grid=(b,),
        in_specs=[
            pl.BlockSpec((pl.Squeezed(), s, d), lambda i: (i, 0, 0)),
            pl.BlockSpec((pl.Squeezed(), s, d), lambda i: (i, 0, 0)),
            pl.BlockSpec((d, 2 * d), lambda i: (0, 0)),
            pl.BlockSpec((1, 2 * d), lambda i: (0, 0)),
            pl.BlockSpec((d, d), lambda i: (0, 0)),
            pl.BlockSpec((1, d), lambda i: (0, 0)),
        ],
        out_specs=pl.BlockSpec((pl.Squeezed(), num_heads, s, hd),
                               lambda i: (i, 0, 0, 0)),
        compiler_params=_PARALLEL_1D,
    )(x, y, w_kv, b_kv.reshape(1, 2 * d), w_q, b_q.reshape(1, d))


def proj_add_layernorm(values2d, resid2d, w, b, gamma, beta, eps=1e-5):
    n, d = values2d.shape
    dout = w.shape[1]
    rb = _pick_row_block(n)
    return pl.pallas_call(
        functools.partial(_proj_add_ln_kernel, eps=eps),
        out_shape=jax.ShapeDtypeStruct((n, dout), values2d.dtype),
        grid=(n // rb,),
        in_specs=[
            pl.BlockSpec((rb, d), lambda i: (i, 0)),
            pl.BlockSpec((rb, dout), lambda i: (i, 0)),
            pl.BlockSpec((d, dout), lambda i: (0, 0)),
            pl.BlockSpec((1, dout), lambda i: (0, 0)),
            pl.BlockSpec((1, dout), lambda i: (0, 0)),
            pl.BlockSpec((1, dout), lambda i: (0, 0)),
        ],
        out_specs=pl.BlockSpec((rb, dout), lambda i: (i, 0)),
        compiler_params=_PARALLEL_1D,
    )(values2d, resid2d, w, b.reshape(1, dout),
      gamma.reshape(1, dout), beta.reshape(1, dout))


def ffn_add_layernorm(y2d, w1, b1, w2, b2, gamma, beta, eps=1e-5):
    n, d = y2d.shape
    f = w1.shape[1]
    rb = _pick_row_block(n)
    return pl.pallas_call(
        functools.partial(_ffn_add_ln_kernel, eps=eps),
        out_shape=jax.ShapeDtypeStruct((n, d), y2d.dtype),
        grid=(n // rb,),
        in_specs=[
            pl.BlockSpec((rb, d), lambda i: (i, 0)),
            pl.BlockSpec((d, f), lambda i: (0, 0)),
            pl.BlockSpec((1, f), lambda i: (0, 0)),
            pl.BlockSpec((f, d), lambda i: (0, 0)),
            pl.BlockSpec((1, d), lambda i: (0, 0)),
            pl.BlockSpec((1, d), lambda i: (0, 0)),
            pl.BlockSpec((1, d), lambda i: (0, 0)),
        ],
        out_specs=pl.BlockSpec((rb, d), lambda i: (i, 0)),
        compiler_params=_PARALLEL_1D,
    )(y2d, w1, b1.reshape(1, f), w2, b2.reshape(1, d),
      gamma.reshape(1, d), beta.reshape(1, d))


# ---------------------------- DecoderLayer forward ----------------------------

def decoder_layer(x, y, params, num_heads):
    b, s, d = y.shape

    # --- self-attention block (causal mask generated in-kernel) ---
    resid = y.reshape(b * s, d)
    vals = self_attention_core(y, params["self_attn"]["w_qkv"],
                               params["self_attn"]["b_qkv"], num_heads)
    # reproduces torch's values.reshape(B, S, D) with NO transpose back (head/seq interleave)
    vals = vals.reshape(b * s, d)
    y = proj_add_layernorm(vals, resid,
                           params["self_attn"]["w_o"], params["self_attn"]["b_o"],
                           params["norm1"]["gamma"], params["norm1"]["beta"])
    y = y.reshape(b, s, d)

    # --- encoder-decoder (cross) attention block (mask=None in the reference) ---
    resid = y.reshape(b * s, d)
    p = params["cross_attn"]
    vals = cross_attention_core(x, y, p["w_kv"], p["b_kv"], p["w_q"], p["b_q"], num_heads)
    vals = vals.reshape(b * s, d)          # same no-transpose reshape
    y = proj_add_layernorm(vals, resid, p["w_o"], p["b_o"],
                           params["norm2"]["gamma"], params["norm2"]["beta"])

    # --- position-wise FFN block ---
    p = params["ffn"]
    y = ffn_add_layernorm(y, p["w1"], p["b1"], p["w2"], p["b2"],
                          params["norm3"]["gamma"], params["norm3"]["beta"])
    return y.reshape(b, s, d)


# ---------------------------- pure-JAX reference (for validation) ----------------------------

def reference_decoder_layer(x, y, params, num_heads):
    def layer_norm(v, gamma, beta, eps=1e-5):
        mean = v.mean(-1, keepdims=True)
        var = ((v - mean) ** 2).mean(-1, keepdims=True)
        return gamma * (v - mean) / jnp.sqrt(var + eps) + beta

    def sdpa(q, k, v, mask, hd):
        scaled = jnp.einsum("bhqd,bhkd->bhqk", q, k) / math.sqrt(hd)
        if mask is not None:
            scaled = scaled + mask
        attn = jax.nn.softmax(scaled, axis=-1)
        return jnp.einsum("bhqk,bhkd->bhqd", attn, v)

    b, s, d = y.shape
    hd = d // num_heads
    # self-attention
    p = params["self_attn"]
    qkv = (y @ p["w_qkv"] + p["b_qkv"]).reshape(b, s, num_heads, 3 * hd).transpose(0, 2, 1, 3)
    q, k, v = jnp.split(qkv, 3, axis=-1)
    mask = jnp.triu(jnp.full((s, s), -1e9, jnp.float32), k=1)
    vals = sdpa(q, k, v, mask, hd).reshape(b, s, d)
    y = layer_norm(vals @ p["w_o"] + p["b_o"] + y,
                   params["norm1"]["gamma"], params["norm1"]["beta"])
    # cross-attention
    p = params["cross_attn"]
    kv = (x @ p["w_kv"] + p["b_kv"]).reshape(b, s, num_heads, 2 * hd).transpose(0, 2, 1, 3)
    q = (y @ p["w_q"] + p["b_q"]).reshape(b, s, num_heads, hd).transpose(0, 2, 1, 3)
    k, v = jnp.split(kv, 2, axis=-1)
    vals = sdpa(q, k, v, None, hd).reshape(b, s, d)
    y = layer_norm(vals @ p["w_o"] + p["b_o"] + y,
                   params["norm2"]["gamma"], params["norm2"]["beta"])
    # FFN
    p = params["ffn"]
    h = jnp.maximum(y @ p["w1"] + p["b1"], 0.0)
    y = layer_norm(h @ p["w2"] + p["b2"] + y,
                   params["norm3"]["gamma"], params["norm3"]["beta"])
    return y


# ---------------------------- parameter init ----------------------------

def init_params(key, d_model, ffn_hidden, num_heads):
    ks = jax.random.split(key, 8)

    def lin(k, fan_in, fan_out):
        kw, kb = jax.random.split(k)
        bound = 1.0 / math.sqrt(fan_in)
        w = jax.random.uniform(kw, (fan_in, fan_out), jnp.float32, -bound, bound)
        b = jax.random.uniform(kb, (fan_out,), jnp.float32, -bound, bound)
        return w, b

    w_qkv, b_qkv = lin(ks[0], d_model, 3 * d_model)
    w_o1, b_o1 = lin(ks[1], d_model, d_model)
    w_kv, b_kv = lin(ks[2], d_model, 2 * d_model)
    w_q, b_q = lin(ks[3], d_model, d_model)
    w_o2, b_o2 = lin(ks[4], d_model, d_model)
    w1, b1 = lin(ks[5], d_model, ffn_hidden)
    w2, b2 = lin(ks[6], ffn_hidden, d_model)
    ones = jnp.ones((d_model,), jnp.float32)
    zeros = jnp.zeros((d_model,), jnp.float32)
    return {
        "self_attn": {"w_qkv": w_qkv, "b_qkv": b_qkv, "w_o": w_o1, "b_o": b_o1},
        "cross_attn": {"w_kv": w_kv, "b_kv": b_kv, "w_q": w_q, "b_q": b_q,
                       "w_o": w_o2, "b_o": b_o2},
        "ffn": {"w1": w1, "b1": b1, "w2": w2, "b2": b2},
        "norm1": {"gamma": ones, "beta": zeros},
        "norm2": {"gamma": ones, "beta": zeros},
        "norm3": {"gamma": ones, "beta": zeros},
    }


# ---------------------------- main ----------------------------

if __name__ == "__main__":
    # Small shapes consistent with the module (d_model multiple of 128 -> lane-dense outputs).
    batch, seq, d_model, num_heads, ffn_hidden = 2, 16, 128, 8, 256

    key = jax.random.PRNGKey(0)
    kx, ky, kp = jax.random.split(key, 3)
    x = jax.random.normal(kx, (batch, seq, d_model), jnp.float32)   # encoder output
    y = jax.random.normal(ky, (batch, seq, d_model), jnp.float32)   # decoder input
    params = init_params(kp, d_model, ffn_hidden, num_heads)

    fwd = jax.jit(functools.partial(decoder_layer, num_heads=num_heads))
    out = fwd(x, y, params)
    jax.block_until_ready(out)
    assert out.shape == (batch, seq, d_model)

    ref = reference_decoder_layer(x, y, params, num_heads)
    max_err = float(jnp.max(jnp.abs(out - ref)))
    # loose tolerance: softmax uses the EUP approximate reciprocal
    assert max_err < 5e-2, f"mismatch vs reference: max abs err {max_err}"
    print("KERNEL_OK")
</pallas_src>

<mosaic_0001>
module attributes {stable_mosaic.version = 11 : i64} {
  func.func @_proj_add_ln_kernel(%arg0: i32, %arg1: memref<32x128xf32, #tpu.memory_space<vmem>>, %arg2: memref<32x128xf32, #tpu.memory_space<vmem>>, %arg3: memref<128x128xf32, #tpu.memory_space<vmem>>, %arg4: memref<1x128xf32, #tpu.memory_space<vmem>>, %arg5: memref<1x128xf32, #tpu.memory_space<vmem>>, %arg6: memref<1x128xf32, #tpu.memory_space<vmem>>, %arg7: memref<32x128xf32, #tpu.memory_space<vmem>>) attributes {dimension_semantics = [#tpu.dimension_semantics<parallel>], iteration_bounds = array<i64: 1>, scalar_prefetch = 0 : i64, scratch_operands = 0 : i64, tpu.core_type = #tpu.core_type<tc>, window_params = [{transform_indices = @transform_0, window_bounds = array<i64: 32, 128>}, {transform_indices = @transform_1, window_bounds = array<i64: 32, 128>}, {pipeline_mode = #tpu.pipeline_mode<synchronous>, transform_indices = @transform_2, window_bounds = array<i64: 128, 128>}, {pipeline_mode = #tpu.pipeline_mode<synchronous>, transform_indices = @transform_3, window_bounds = array<i64: 1, 128>}, {pipeline_mode = #tpu.pipeline_mode<synchronous>, transform_indices = @transform_4, window_bounds = array<i64: 1, 128>}, {pipeline_mode = #tpu.pipeline_mode<synchronous>, transform_indices = @transform_5, window_bounds = array<i64: 1, 128>}, {transform_indices = @transform_6, window_bounds = array<i64: 32, 128>}]} {
    %c0 = arith.constant 0 : index
    %c0_0 = arith.constant 0 : index
    %0 = vector.load %arg1[%c0, %c0_0] : memref<32x128xf32, #tpu.memory_space<vmem>>, vector<32x128xf32>
    %c0_1 = arith.constant 0 : index
    %c0_2 = arith.constant 0 : index
    %1 = vector.load %arg3[%c0_1, %c0_2] : memref<128x128xf32, #tpu.memory_space<vmem>>, vector<128x128xf32>
    %cst = arith.constant dense<0.000000e+00> : vector<32x128xf32>
    %2 = tpu.matmul %0, %1, %cst {dimension_numbers = #tpu.dot_dimension_numbers<[1], [0], [0], [1], [0, 0, 1, 1], [], []>} : vector<32x128xf32>, vector<128x128xf32>, vector<32x128xf32> -> vector<32x128xf32>
    %c0_3 = arith.constant 0 : index
    %c0_4 = arith.constant 0 : index
    %3 = vector.load %arg4[%c0_3, %c0_4] : memref<1x128xf32, #tpu.memory_space<vmem>>, vector<1x128xf32>
    %4 = vector.broadcast %3 : vector<1x128xf32> to vector<32x128xf32>
    %5 = arith.addf %2, %4 : vector<32x128xf32>
    %c0_5 = arith.constant 0 : index
    %c0_6 = arith.constant 0 : index
    %6 = vector.load %arg2[%c0_5, %c0_6] : memref<32x128xf32, #tpu.memory_space<vmem>>, vector<32x128xf32>
    %7 = arith.addf %5, %6 : vector<32x128xf32>
    %cst_7 = arith.constant dense<0.000000e+00> : vector<32xf32>
    %8 = vector.multi_reduction <add>, %7, %cst_7 [1] : vector<32x128xf32> to vector<32xf32>
    %9 = vector.shape_cast %8 : vector<32xf32> to vector<32x1xf32>
    %cst_8 = arith.constant 1.280000e+02 : f32
    %10 = vector.broadcast %cst_8 : f32 to vector<32x1xf32>
    %11 = arith.divf %9, %10 : vector<32x1xf32>
    %12 = vector.broadcast %11 : vector<32x1xf32> to vector<32x128xf32>
    %13 = arith.subf %7, %12 : vector<32x128xf32>
    %14 = arith.mulf %13, %13 : vector<32x128xf32>
    %cst_9 = arith.constant dense<0.000000e+00> : vector<32xf32>
    %15 = vector.multi_reduction <add>, %14, %cst_9 [1] : vector<32x128xf32> to vector<32xf32>
    %16 = vector.shape_cast %15 : vector<32xf32> to vector<32x1xf32>
    %cst_10 = arith.constant 1.280000e+02 : f32
    %17 = vector.broadcast %cst_10 : f32 to vector<32x1xf32>
    %18 = arith.divf %16, %17 : vector<32x1xf32>
    %19 = vector.broadcast %11 : vector<32x1xf32> to vector<32x128xf32>
    %20 = arith.subf %7, %19 : vector<32x128xf32>
    %cst_11 = arith.constant 9.99999974E-6 : f32
    %21 = vector.broadcast %cst_11 : f32 to vector<32x1xf32>
    %22 = arith.addf %18, %21 : vector<32x1xf32>
    %23 = math.rsqrt %22 : vector<32x1xf32>
    %24 = vector.broadcast %23 : vector<32x1xf32> to vector<32x128xf32>
    %25 = arith.mulf %20, %24 : vector<32x128xf32>
    %c0_12 = arith.constant 0 : index
    %c0_13 = arith.constant 0 : index
    %26 = vector.load %arg5[%c0_12, %c0_13] : memref<1x128xf32, #tpu.memory_space<vmem>>, vector<1x128xf32>
    %27 = vector.broadcast %26 : vector<1x128xf32> to vector<32x128xf32>
    %28 = arith.mulf %27, %25 : vector<32x128xf32>
    %c0_14 = arith.constant 0 : index
    %c0_15 = arith.constant 0 : index
    %29 = vector.load %arg6[%c0_14, %c0_15] : memref<1x128xf32, #tpu.memory_space<vmem>>, vector<1x128xf32>
    %30 = vector.broadcast %29 : vector<1x128xf32> to vector<32x128xf32>
    %31 = arith.addf %28, %30 : vector<32x128xf32>
    %c0_16 = arith.constant 0 : index
    %c0_17 = arith.constant 0 : index
    %32 = vector.load %arg7[%c0_16, %c0_17] : memref<32x128xf32, #tpu.memory_space<vmem>>, vector<32x128xf32>
    tpu.vector_store %arg7[%c0_16, %c0_17], %31 {strides = array<i32>} : memref<32x128xf32, #tpu.memory_space<vmem>>, vector<32x128xf32>,
    return
  }
  func.func @transform_0(%arg0: i32) -> (i32, i32) {
    %c0_i32 = arith.constant 0 : i32
    %c0_i32_0 = arith.constant 0 : i32
    return %arg0, %c0_i32 : i32, i32
  }
  func.func @transform_1(%arg0: i32) -> (i32, i32) {
    %c0_i32 = arith.constant 0 : i32
    %c0_i32_0 = arith.constant 0 : i32
    return %arg0, %c0_i32 : i32, i32
  }
  func.func @transform_2(%arg0: i32) -> (i32, i32) {
    %c0_i32 = arith.constant 0 : i32
    %c0_i32_0 = arith.constant 0 : i32
    %c0_i32_1 = arith.constant 0 : i32
    return %c0_i32, %c0_i32_0 : i32, i32
  }
  func.func @transform_3(%arg0: i32) -> (i32, i32) {
    %c0_i32 = arith.constant 0 : i32
    %c0_i32_0 = arith.constant 0 : i32
    %c0_i32_1 = arith.constant 0 : i32
    return %c0_i32, %c0_i32_0 : i32, i32
  }
  func.func @transform_4(%arg0: i32) -> (i32, i32) {
    %c0_i32 = arith.constant 0 : i32
    %c0_i32_0 = arith.constant 0 : i32
    %c0_i32_1 = arith.constant 0 : i32
    return %c0_i32, %c0_i32_0 : i32, i32
  }
  func.func @transform_5(%arg0: i32) -> (i32, i32) {
    %c0_i32 = arith.constant 0 : i32
    %c0_i32_0 = arith.constant 0 : i32
    %c0_i32_1 = arith.constant 0 : i32
    return %c0_i32, %c0_i32_0 : i32, i32
  }
  func.func @transform_6(%arg0: i32) -> (i32, i32) {
    %c0_i32 = arith.constant 0 : i32
    %c0_i32_0 = arith.constant 0 : i32
    return %arg0, %c0_i32 : i32, i32
  }
}

module attributes {stable_mosaic.version = 11 : i64} {
  func.func @_self_attn_core_kernel(%arg0: i32, %arg1: memref<1x16x128xf32, #tpu.memory_space<vmem>>, %arg2: memref<128x384xf32, #tpu.memory_space<vmem>>, %arg3: memref<1x384xf32, #tpu.memory_space<vmem>>, %arg4: memref<1x8x16x16xf32, #tpu.memory_space<vmem>>) attributes {dimension_semantics = [#tpu.dimension_semantics<parallel>], iteration_bounds = array<i64: 2>, scalar_prefetch = 0 : i64, scratch_operands = 0 : i64, tpu.core_type = #tpu.core_type<tc>, window_params = [{transform_indices = @transform_0, window_bounds = array<i64: 1, 16, 128>}, {pipeline_mode = #tpu.pipeline_mode<synchronous>, transform_indices = @transform_1, window_bounds = array<i64: 128, 384>}, {pipeline_mode = #tpu.pipeline_mode<synchronous>, transform_indices = @transform_2, window_bounds = array<i64: 1, 384>}, {transform_indices = @transform_3, window_bounds = array<i64: 1, 8, 16, 16>}]} {
    %c0 = arith.constant 0 : index
    %c0_0 = arith.constant 0 : index
    %c0_1 = arith.constant 0 : index
    %0 = vector.load %arg1[%c0, %c0_0, %c0_1] : memref<1x16x128xf32, #tpu.memory_space<vmem>>, vector<1x16x128xf32>
    %1 = vector.shape_cast %0 : vector<1x16x128xf32> to vector<16x128xf32>
    %c0_2 = arith.constant 0 : index
    %c0_3 = arith.constant 0 : index
    %2 = vector.load %arg2[%c0_2, %c0_3] : memref<128x384xf32, #tpu.memory_space<vmem>>, vector<128x384xf32>
    %cst = arith.constant dense<0.000000e+00> : vector<16x384xf32>
    %3 = tpu.matmul %1, %2, %cst {dimension_numbers = #tpu.dot_dimension_numbers<[1], [0], [0], [1], [0, 0, 1, 1], [], []>} : vector<16x128xf32>, vector<128x384xf32>, vector<16x384xf32> -> vector<16x384xf32>
    %c0_4 = arith.constant 0 : index
    %c0_5 = arith.constant 0 : index
    %4 = vector.load %arg3[%c0_4, %c0_5] : memref<1x384xf32, #tpu.memory_space<vmem>>, vector<1x384xf32>
    %5 = vector.broadcast %4 : vector<1x384xf32> to vector<16x384xf32>
    %6 = arith.addf %3, %5 : vector<16x384xf32>
    %7 = tpu.iota {dimensions = array<i32: 0>} : vector<16x16xi32>
    %8 = tpu.iota {dimensions = array<i32: 1>} : vector<16x16xi32>
    %9 = arith.cmpi sgt, %8, %7 : vector<16x16xi32>
    %cst_6 = arith.constant -1.000000e+09 : f32
    %cst_7 = arith.constant 0.000000e+00 : f32
    %10 = vector.broadcast %cst_6 : f32 to vector<16x16xf32>
    %11 = vector.broadcast %cst_7 : f32 to vector<16x16xf32>
    %12 = arith.select %9, %10, %11 : vector<16x16xi1>, vector<16x16xf32>
    %13 = vector.extract_strided_slice %6 {offsets = [0, 0], sizes = [16, 16], strides = [1, 1]} : vector<16x384xf32> to vector<16x16xf32>
    %14 = vector.extract_strided_slice %6 {offsets = [0, 16], sizes = [16, 16], strides = [1, 1]} : vector<16x384xf32> to vector<16x16xf32>
    %15 = vector.extract_strided_slice %6 {offsets = [0, 32], sizes = [16, 16], strides = [1, 1]} : vector<16x384xf32> to vector<16x16xf32>
    %cst_8 = arith.constant dense<0.000000e+00> : vector<16x16xf32>
    %16 = tpu.matmul %13, %14, %cst_8 {dimension_numbers = #tpu.dot_dimension_numbers<[1], [1], [0], [0], [0, 0, 1, 0], [], []>} : vector<16x16xf32>, vector<16x16xf32>, vector<16x16xf32> -> vector<16x16xf32>
    %cst_9 = arith.constant 2.500000e-01 : f32
    %17 = vector.broadcast %cst_9 : f32 to vector<16x16xf32>
    %18 = arith.mulf %16, %17 : vector<16x16xf32>
    %19 = arith.addf %18, %12 : vector<16x16xf32>
    %cst_10 = arith.constant dense<0xFF800000> : vector<16xf32>
    %20 = vector.multi_reduction <maximumf>, %19, %cst_10 [1] : vector<16x16xf32> to vector<16xf32>
    %21 = vector.shape_cast %20 : vector<16xf32> to vector<16x1xf32>
    %22 = vector.broadcast %21 : vector<16x1xf32> to vector<16x16xf32>
    %23 = arith.subf %19, %22 : vector<16x16xf32>
    %24 = math.exp %23 : vector<16x16xf32>
    %cst_11 = arith.constant dense<0.000000e+00> : vector<16xf32>
    %25 = vector.multi_reduction <add>, %24, %cst_11 [1] : vector<16x16xf32> to vector<16xf32>
    %26 = vector.shape_cast %25 : vector<16xf32> to vector<16x1xf32>
    %27 = tpu.reciprocal %26 {approx = true} : vector<16x1xf32> -> vector<16x1xf32>
    %28 = vector.broadcast %27 : vector<16x1xf32> to vector<16x16xf32>
    %29 = arith.mulf %24, %28 : vector<16x16xf32>
    %cst_12 = arith.constant dense<0.000000e+00> : vector<16x16xf32>
    %30 = tpu.matmul %29, %15, %cst_12 {dimension_numbers = #tpu.dot_dimension_numbers<[1], [0], [0], [1], [0, 0, 1, 1], [], []>} : vector<16x16xf32>, vector<16x16xf32>, vector<16x16xf32> -> vector<16x16xf32>
    %c0_13 = arith.constant 0 : index
    %c0_14 = arith.constant 0 : index
    %c0_15 = arith.constant 0 : index
    %c0_16 = arith.constant 0 : index
    %31 = vector.load %arg4[%c0_13, %c0_14, %c0_15, %c0_16] : memref<1x8x16x16xf32, #tpu.memory_space<vmem>>, vector<1x1x16x16xf32>
    %32 = vector.shape_cast %31 : vector<1x1x16x16xf32> to vector<16x16xf32>
    %33 = vector.shape_cast %30 : vector<16x16xf32> to vector<1x1x16x16xf32>
    tpu.vector_store %arg4[%c0_13, %c0_14, %c0_15, %c0_16], %33 {strides = array<i32>} : memref<1x8x16x16xf32, #tpu.memory_space<vmem>>, vector<1x1x16x16xf32>,
    %34 = vector.extract_strided_slice %6 {offsets = [0, 48], sizes = [16, 16], strides = [1, 1]} : vector<16x384xf32> to vector<16x16xf32>
    %35 = vector.extract_strided_slice %6 {offsets = [0, 64], sizes = [16, 16], strides = [1, 1]} : vector<16x384xf32> to vector<16x16xf32>
    %36 = vector.extract_strided_slice %6 {offsets = [0, 80], sizes = [16, 16], strides = [1, 1]} : vector<16x384xf32> to vector<16x16xf32>
    %cst_17 = arith.constant dense<0.000000e+00> : vector<16x16xf32>
    %37 = tpu.matmul %34, %35, %cst_17 {dimension_numbers = #tpu.dot_dimension_numbers<[1], [1], [0], [0], [0, 0, 1, 0], [], []>} : vector<16x16xf32>, vector<16x16xf32>, vector<16x16xf32> -> vector<16x16xf32>
    %cst_18 = arith.constant 2.500000e-01 : f32
    %38 = vector.broadcast %cst_18 : f32 to vector<16x16xf32>
    %39 = arith.mulf %37, %38 : vector<16x16xf32>
    %40 = arith.addf %39, %12 : vector<16x16xf32>
    %cst_19 = arith.constant dense<0xFF800000> : vector<16xf32>
    %41 = vector.multi_reduction <maximumf>, %40, %cst_19 [1] : vector<16x16xf32> to vector<16xf32>
    %42 = vector.shape_cast %41 : vector<16xf32> to vector<16x1xf32>
    %43 = vector.broadcast %42 : vector<16x1xf32> to vector<16x16xf32>
    %44 = arith.subf %40, %43 : vector<16x16xf32>
    %45 = math.exp %44 : vector<16x16xf32>
    %cst_20 = arith.constant dense<0.000000e+00> : vector<16xf32>
    %46 = vector.multi_reduction <add>, %45, %cst_20 [1] : vector<16x16xf32> to vector<16xf32>
    %47 = vector.shape_cast %46 : vector<16xf32> to vector<16x1xf32>
    %48 = tpu.reciprocal %47 {approx = true} : vector<16x1xf32> -> vector<16x1xf32>
    %49 = vector.broadcast %48 : vector<16x1xf32> to vector<16x16xf32>
    %50 = arith.mulf %45, %49 : vector<16x16xf32>
    %cst_21 = arith.constant dense<0.000000e+00> : vector<16x16xf32>
    %51 = tpu.matmul %50, %36, %cst_21 {dimension_numbers = #tpu.dot_dimension_numbers<[1], [0], [0], [1], [0, 0, 1, 1], [], []>} : vector<16x16xf32>, vector<16x16xf32>, vector<16x16xf32> -> vector<16x16xf32>
    %c0_22 = arith.constant 0 : index
    %c1 = arith.constant 1 : index
    %c0_23 = arith.constant 0 : index
    %c0_24 = arith.constant 0 : index
    %52 = vector.load %arg4[%c0_22, %c1, %c0_23, %c0_24] : memref<1x8x16x16xf32, #tpu.memory_space<vmem>>, vector<1x1x16x16xf32>
    %53 = vector.shape_cast %52 : vector<1x1x16x16xf32> to vector<16x16xf32>
    %54 = vector.shape_cast %51 : vector<16x16xf32> to vector<1x1x16x16xf32>
    tpu.vector_store %arg4[%c0_22, %c1, %c0_23, %c0_24], %54 {strides = array<i32>} : memref<1x8x16x16xf32, #tpu.memory_space<vmem>>, vector<1x1x16x16xf32>,
    %55 = vector.extract_strided_slice %6 {offsets = [0, 96], sizes = [16, 16], strides = [1, 1]} : vector<16x384xf32> to vector<16x16xf32>
    %56 = vector.extract_strided_slice %6 {offsets = [0, 112], sizes = [16, 16], strides = [1, 1]} : vector<16x384xf32> to vector<16x16xf32>
    %57 = vector.extract_strided_slice %6 {offsets = [0, 128], sizes = [16, 16], strides = [1, 1]} : vector<16x384xf32> to vector<16x16xf32>
    %cst_25 = arith.constant dense<0.000000e+00> : vector<16x16xf32>
    %58 = tpu.matmul %55, %56, %cst_25 {dimension_numbers = #tpu.dot_dimension_numbers<[1], [1], [0], [0], [0, 0, 1, 0], [], []>} : vector<16x16xf32>, vector<16x16xf32>, vector<16x16xf32> -> vector<16x16xf32>
    %cst_26 = arith.constant 2.500000e-01 : f32
    %59 = vector.broadcast %cst_26 : f32 to vector<16x16xf32>
    %60 = arith.mulf %58, %59 : vector<16x16xf32>
    %61 = arith.addf %60, %12 : vector<16x16xf32>
    %cst_27 = arith.constant dense<0xFF800000> : vector<16xf32>
    %62 = vector.multi_reduction <maximumf>, %61, %cst_27 [1] : vector<16x16xf32> to vector<16xf32>
    %63 = vector.shape_cast %62 : vector<16xf32> to vector<16x1xf32>
    %64 = vector.broadcast %63 : vector<16x1xf32> to vector<16x16xf32>
    %65 = arith.subf %61, %64 : vector<16x16xf32>
    %66 = math.exp %65 : vector<16x16xf32>
    %cst_28 = arith.constant dense<0.000000e+00> : vector<16xf32>
    %67 = vector.multi_reduction <add>, %66, %cst_28 [1] : vector<16x16xf32> to vector<16xf32>
    %68 = vector.shape_cast %67 : vector<16xf32> to vector<16x1xf32>
    %69 = tpu.reciprocal %68 {approx = true} : vector<16x1xf32> -> vector<16x1xf32>
    %70 = vector.broadcast %69 : vector<16x1xf32> to vector<16x16xf32>
    %71 = arith.mulf %66, %70 : vector<16x16xf32>
    %cst_29 = arith.constant dense<0.000000e+00> : vector<16x16xf32>
    %72 = tpu.matmul %71, %57, %cst_29 {dimension_numbers = #tpu.dot_dimension_numbers<[1], [0], [0], [1], [0, 0, 1, 1], [], []>} : vector<16x16xf32>, vector<16x16xf32>, vector<16x16xf32> -> vector<16x16xf32>
    %c0_30 = arith.constant 0 : index
    %c2 = arith.constant 2 : index
    %c0_31 = arith.constant 0 : index
    %c0_32 = arith.constant 0 : index
    %73 = vector.load %arg4[%c0_30, %c2, %c0_31, %c0_32] : memref<1x8x16x16xf32, #tpu.memory_space<vmem>>, vector<1x1x16x16xf32>
    %74 = vector.shape_cast %73 : vector<1x1x16x16xf32> to vector<16x16xf32>
    %75 = vector.shape_cast %72 : vector<16x16xf32> to vector<1x1x16x16xf32>
    tpu.vector_store %arg4[%c0_30, %c2, %c0_31, %c0_32], %75 {strides = array<i32>} : memref<1x8x16x16xf32, #tpu.memory_space<vmem>>, vector<1x1x16x16xf32>,
    %76 = vector.extract_strided_slice %6 {offsets = [0, 144], sizes = [16, 16], strides = [1, 1]} : vector<16x384xf32> to vector<16x16xf32>
    %77 = vector.extract_strided_slice %6 {offsets = [0, 160], sizes = [16, 16], strides = [1, 1]} : vector<16x384xf32> to vector<16x16xf32>
    %78 = vector.extract_strided_slice %6 {offsets = [0, 176], sizes = [16, 16], strides = [1, 1]} : vector<16x384xf32> to vector<16x16xf32>
    %cst_33 = arith.constant dense<0.000000e+00> : vector<16x16xf32>
    %79 = tpu.matmul %76, %77, %cst_33 {dimension_numbers = #tpu.dot_dimension_numbers<[1], [1], [0], [0], [0, 0, 1, 0], [], []>} : vector<16x16xf32>, vector<16x16xf32>, vector<16x16xf32> -> vector<16x16xf32>
    %cst_34 = arith.constant 2.500000e-01 : f32
    %80 = vector.broadcast %cst_34 : f32 to vector<16x16xf32>
    %81 = arith.mulf %79, %80 : vector<16x16xf32>
    %82 = arith.addf %81, %12 : vector<16x16xf32>
    %cst_35 = arith.constant dense<0xFF800000> : vector<16xf32>
    %83 = vector.multi_reduction <maximumf>, %82, %cst_35 [1] : vector<16x16xf32> to vector<16xf32>
    %84 = vector.shape_cast %83 : vector<16xf32> to vector<16x1xf32>
    %85 = vector.broadcast %84 : vector<16x1xf32> to vector<16x16xf32>
    %86 = arith.subf %82, %85 : vector<16x16xf32>
    %87 = math.exp %86 : vector<16x16xf32>
    %cst_36 = arith.constant dense<0.000000e+00> : vector<16xf32>
    %88 = vector.multi_reduction <add>, %87, %cst_36 [1] : vector<16x16xf32> to vector<16xf32>
    %89 = vector.shape_cast %88 : vector<16xf32> to vector<16x1xf32>
    %90 = tpu.reciprocal %89 {approx = true} : vector<16x1xf32> -> vector<16x1xf32>
    %91 = vector.broadcast %90 : vector<16x1xf32> to vector<16x16xf32>
    %92 = arith.mulf %87, %91 : vector<16x16xf32>
    %cst_37 = arith.constant dense<0.000000e+00> : vector<16x16xf32>
    %93 = tpu.matmul %92, %78, %cst_37 {dimension_numbers = #tpu.dot_dimension_numbers<[1], [0], [0], [1], [0, 0, 1, 1], [], []>} : vector<16x16xf32>, vector<16x16xf32>, vector<16x16xf32> -> vector<16x16xf32>
    %c0_38 = arith.constant 0 : index
    %c3 = arith.constant 3 : index
    %c0_39 = arith.constant 0 : index
    %c0_40 = arith.constant 0 : index
    %94 = vector.load %arg4[%c0_38, %c3, %c0_39, %c0_40] : memref<1x8x16x16xf32, #tpu.memory_space<vmem>>, vector<1x1x16x16xf32>
    %95 = vector.shape_cast %94 : vector<1x1x16x16xf32> to vector<16x16xf32>
    %96 = vector.shape_cast %93 : vector<16x16xf32> to vector<1x1x16x16xf32>
    tpu.vector_store %arg4[%c0_38, %c3, %c0_39, %c0_40], %96 {strides = array<i32>} : memref<1x8x16x16xf32, #tpu.memory_space<vmem>>, vector<1x1x16x16xf32>,
    %97 = vector.extract_strided_slice %6 {offsets = [0, 192], sizes = [16, 16], strides = [1, 1]} : vector<16x384xf32> to vector<16x16xf32>
    %98 = vector.extract_strided_slice %6 {offsets = [0, 208], sizes = [16, 16], strides = [1, 1]} : vector<16x384xf32> to vector<16x16xf32>
    %99 = vector.extract_strided_slice %6 {offsets = [0, 224], sizes = [16, 16], strides = [1, 1]} : vector<16x384xf32> to vector<16x16xf32>
    %cst_41 = arith.constant dense<0.000000e+00> : vector<16x16xf32>
    %100 = tpu.matmul %97, %98, %cst_41 {dimension_numbers = #tpu.dot_dimension_numbers<[1], [1], [0], [0], [0, 0, 1, 0], [], []>} : vector<16x16xf32>, vector<16x16xf32>, vector<16x16xf32> -> vector<16x16xf32>
    %cst_42 = arith.constant 2.500000e-01 : f32
    %101 = vector.broadcast %cst_42 : f32 to vector<16x16xf32>
    %102 = arith.mulf %100, %101 : vector<16x16xf32>
    %103 = arith.addf %102, %12 : vector<16x16xf32>
    %cst_43 = arith.constant dense<0xFF800000> : vector<16xf32>
    %104 = vector.multi_reduction <maximumf>, %103, %cst_43 [1] : vector<16x16xf32> to vector<16xf32>
    %105 = vector.shape_cast %104 : vector<16xf32> to vector<16x1xf32>
    %106 = vector.broadcast %105 : vector<16x1xf32> to vector<16x16xf32>
    %107 = arith.subf %103, %106 : vector<16x16xf32>
    %108 = math.exp %107 : vector<16x16xf32>
    %cst_44 = arith.constant dense<0.000000e+00> : vector<16xf32>
    %109 = vector.multi_reduction <add>, %108, %cst_44 [1] : vector<16x16xf32> to vector<16xf32>
    %110 = vector.shape_cast %109 : vector<16xf32> to vector<16x1xf32>
    %111 = tpu.reciprocal %110 {approx = true} : vector<16x1xf32> -> vector<16x1xf32>
    %112 = vector.broadcast %111 : vector<16x1xf32> to vector<16x16xf32>
    %113 = arith.mulf %108, %112 : vector<16x16xf32>
    %cst_45 = arith.constant dense<0.000000e+00> : vector<16x16xf32>
    %114 = tpu.matmul %113, %99, %cst_45 {dimension_numbers = #tpu.dot_dimension_numbers<[1], [0], [0], [1], [0, 0, 1, 1], [], []>} : vector<16x16xf32>, vector<16x16xf32>, vector<16x16xf32> -> vector<16x16xf32>
    %c0_46 = arith.constant 0 : index
    %c4 = arith.constant 4 : index
    %c0_47 = arith.constant 0 : index
    %c0_48 = arith.constant 0 : index
    %115 = vector.load %arg4[%c0_46, %c4, %c0_47, %c0_48] : memref<1x8x16x16xf32, #tpu.memory_space<vmem>>, vector<1x1x16x16xf32>
    %116 = vector.shape_cast %115 : vector<1x1x16x16xf32> to vector<16x16xf32>
    %117 = vector.shape_cast %114 : vector<16x16xf32> to vector<1x1x16x16xf32>
    tpu.vector_store %arg4[%c0_46, %c4, %c0_47, %c0_48], %117 {strides = array<i32>} : memref<1x8x16x16xf32, #tpu.memory_space<vmem>>, vector<1x1x16x16xf32>,
    %118 = vector.extract_strided_slice %6 {offsets = [0, 240], sizes = [16, 16], strides = [1, 1]} : vector<16x384xf32> to vector<16x16xf32>
    %119 = vector.extract_strided_slice %6 {offsets = [0, 256], sizes = [16, 16], strides = [1, 1]} : vector<16x384xf32> to vector<16x16xf32>
    %120 = vector.extract_strided_slice %6 {offsets = [0, 272], sizes = [16, 16], strides = [1, 1]} : vector<16x384xf32> to vector<16x16xf32>
    %cst_49 = arith.constant dense<0.000000e+00> : vector<16x16xf32>
    %121 = tpu.matmul %118, %119, %cst_49 {dimension_numbers = #tpu.dot_dimension_numbers<[1], [1], [0], [0], [0, 0, 1, 0], [], []>} : vector<16x16xf32>, vector<16x16xf32>, vector<16x16xf32> -> vector<16x16xf32>
    %cst_50 = arith.constant 2.500000e-01 : f32
    %122 = vector.broadcast %cst_50 : f32 to vector<16x16xf32>
    %123 = arith.mulf %121, %122 : vector<16x16xf32>
    %124 = arith.addf %123, %12 : vector<16x16xf32>
    %cst_51 = arith.constant dense<0xFF800000> : vector<16xf32>
    %125 = vector.multi_reduction <maximumf>, %124, %cst_51 [1] : vector<16x16xf32> to vector<16xf32>
    %126 = vector.shape_cast %125 : vector<16xf32> to vector<16x1xf32>
    %127 = vector.broadcast %126 : vector<16x1xf32> to vector<16x16xf32>
    %128 = arith.subf %124, %127 : vector<16x16xf32>
    %129 = math.exp %128 : vector<16x16xf32>
    %cst_52 = arith.constant dense<0.000000e+00> : vector<16xf32>
    %130 = vector.multi_reduction <add>, %129, %cst_52 [1] : vector<16x16xf32> to vector<16xf32>
    %131 = vector.shape_cast %130 : vector<16xf32> to vector<16x1xf32>
    %132 = tpu.reciprocal %131 {approx = true} : vector<16x1xf32> -> vector<16x1xf32>
    %133 = vector.broadcast %132 : vector<16x1xf32> to vector<16x16xf32>
    %134 = arith.mulf %129, %133 : vector<16x16xf32>
    %cst_53 = arith.constant dense<0.000000e+00> : vector<16x16xf32>
    %135 = tpu.matmul %134, %120, %cst_53 {dimension_numbers = #tpu.dot_dimension_numbers<[1], [0], [0], [1], [0, 0, 1, 1], [], []>} : vector<16x16xf32>, vector<16x16xf32>, vector<16x16xf32> -> vector<16x16xf32>
    %c0_54 = arith.constant 0 : index
    %c5 = arith.constant 5 : index
    %c0_55 = arith.constant 0 : index
    %c0_56 = arith.constant 0 : index
    %136 = vector.load %arg4[%c0_54, %c5, %c0_55, %c0_56] : memref<1x8x16x16xf32, #tpu.memory_space<vmem>>, vector<1x1x16x16xf32>
    %137 = vector.shape_cast %136 : vector<1x1x16x16xf32> to vector<16x16xf32>
    %138 = vector.shape_cast %135 : vector<16x16xf32> to vector<1x1x16x16xf32>
    tpu.vector_store %arg4[%c0_54, %c5, %c0_55, %c0_56], %138 {strides = array<i32>} : memref<1x8x16x16xf32, #tpu.memory_space<vmem>>, vector<1x1x16x16xf32>,
    %139 = vector.extract_strided_slice %6 {offsets = [0, 288], sizes = [16, 16], strides = [1, 1]} : vector<16x384xf32> to vector<16x16xf32>
    %140 = vector.extract_strided_slice %6 {offsets = [0, 304], sizes = [16, 16], strides = [1, 1]} : vector<16x384xf32> to vector<16x16xf32>
    %141 = vector.extract_strided_slice %6 {offsets = [0, 320], sizes = [16, 16], strides = [1, 1]} : vector<16x384xf32> to vector<16x16xf32>
    %cst_57 = arith.constant dense<0.000000e+00> : vector<16x16xf32>
    %142 = tpu.matmul %139, %140, %cst_57 {dimension_numbers = #tpu.dot_dimension_numbers<[1], [1], [0], [0], [0, 0, 1, 0], [], []>} : vector<16x16xf32>, vector<16x16xf32>, vector<16x16xf32> -> vector<16x16xf32>
    %cst_58 = arith.constant 2.500000e-01 : f32
    %143 = vector.broadcast %cst_58 : f32 to vector<16x16xf32>
    %144 = arith.mulf %142, %143 : vector<16x16xf32>
    %145 = arith.addf %144, %12 : vector<16x16xf32>
    %cst_59 = arith.constant dense<0xFF800000> : vector<16xf32>
    %146 = vector.multi_reduction <maximumf>, %145, %cst_59 [1] : vector<16x16xf32> to vector<16xf32>
    %147 = vector.shape_cast %146 : vector<16xf32> to vector<16x1xf32>
    %148 = vector.broadcast %147 : vector<16x1xf32> to vector<16x16xf32>
    %149 = arith.subf %145, %148 : vector<16x16xf32>
    %150 = math.exp %149 : vector<16x16xf32>
    %cst_60 = arith.constant dense<0.000000e+00> : vector<16xf32>
    %151 = vector.multi_reduction <add>, %150, %cst_60 [1] : vector<16x16xf32> to vector<16xf32>
    %152 = vector.shape_cast %151 : vector<16xf32> to vector<16x1xf32>
    %153 = tpu.reciprocal %152 {approx = true} : vector<16x1xf32> -> vector<16x1xf32>
    %154 = vector.broadcast %153 : vector<16x1xf32> to vector<16x16xf32>
    %155 = arith.mulf %150, %154 : vector<16x16xf32>
    %cst_61 = arith.constant dense<0.000000e+00> : vector<16x16xf32>
    %156 = tpu.matmul %155, %141, %cst_61 {dimension_numbers = #tpu.dot_dimension_numbers<[1], [0], [0], [1], [0, 0, 1, 1], [], []>} : vector<16x16xf32>, vector<16x16xf32>, vector<16x16xf32> -> vector<16x16xf32>
    %c0_62 = arith.constant 0 : index
    %c6 = arith.constant 6 : index
    %c0_63 = arith.constant 0 : index
    %c0_64 = arith.constant 0 : index
    %157 = vector.load %arg4[%c0_62, %c6, %c0_63, %c0_64] : memref<1x8x16x16xf32, #tpu.memory_space<vmem>>, vector<1x1x16x16xf32>
    %158 = vector.shape_cast %157 : vector<1x1x16x16xf32> to vector<16x16xf32>
    %159 = vector.shape_cast %156 : vector<16x16xf32> to vector<1x1x16x16xf32>
    tpu.vector_store %arg4[%c0_62, %c6, %c0_63, %c0_64], %159 {strides = array<i32>} : memref<1x8x16x16xf32, #tpu.memory_space<vmem>>, vector<1x1x16x16xf32>,
    %160 = vector.extract_strided_slice %6 {offsets = [0, 336], sizes = [16, 16], strides = [1, 1]} : vector<16x384xf32> to vector<16x16xf32>
    %161 = vector.extract_strided_slice %6 {offsets = [0, 352], sizes = [16, 16], strides = [1, 1]} : vector<16x384xf32> to vector<16x16xf32>
    %162 = vector.extract_strided_slice %6 {offsets = [0, 368], sizes = [16, 16], strides = [1, 1]} : vector<16x384xf32> to vector<16x16xf32>
    %cst_65 = arith.constant dense<0.000000e+00> : vector<16x16xf32>
    %163 = tpu.matmul %160, %161, %cst_65 {dimension_numbers = #tpu.dot_dimension_numbers<[1], [1], [0], [0], [0, 0, 1, 0], [], []>} : vector<16x16xf32>, vector<16x16xf32>, vector<16x16xf32> -> vector<16x16xf32>
    %cst_66 = arith.constant 2.500000e-01 : f32
    %164 = vector.broadcast %cst_66 : f32 to vector<16x16xf32>
    %165 = arith.mulf %163, %164 : vector<16x16xf32>
    %166 = arith.addf %165, %12 : vector<16x16xf32>
    %cst_67 = arith.constant dense<0xFF800000> : vector<16xf32>
    %167 = vector.multi_reduction <maximumf>, %166, %cst_67 [1] : vector<16x16xf32> to vector<16xf32>
    %168 = vector.shape_cast %167 : vector<16xf32> to vector<16x1xf32>
    %169 = vector.broadcast %168 : vector<16x1xf32> to vector<16x16xf32>
    %170 = arith.subf %166, %169 : vector<16x16xf32>
    %171 = math.exp %170 : vector<16x16xf32>
    %cst_68 = arith.constant dense<0.000000e+00> : vector<16xf32>
    %172 = vector.multi_reduction <add>, %171, %cst_68 [1] : vector<16x16xf32> to vector<16xf32>
    %173 = vector.shape_cast %172 : vector<16xf32> to vector<16x1xf32>
    %174 = tpu.reciprocal %173 {approx = true} : vector<16x1xf32> -> vector<16x1xf32>
    %175 = vector.broadcast %174 : vector<16x1xf32> to vector<16x16xf32>
    %176 = arith.mulf %171, %175 : vector<16x16xf32>
    %cst_69 = arith.constant dense<0.000000e+00> : vector<16x16xf32>
    %177 = tpu.matmul %176, %162, %cst_69 {dimension_numbers = #tpu.dot_dimension_numbers<[1], [0], [0], [1], [0, 0, 1, 1], [], []>} : vector<16x16xf32>, vector<16x16xf32>, vector<16x16xf32> -> vector<16x16xf32>
    %c0_70 = arith.constant 0 : index
    %c7 = arith.constant 7 : index
    %c0_71 = arith.constant 0 : index
    %c0_72 = arith.constant 0 : index
    %178 = vector.load %arg4[%c0_70, %c7, %c0_71, %c0_72] : memref<1x8x16x16xf32, #tpu.memory_space<vmem>>, vector<1x1x16x16xf32>
    %179 = vector.shape_cast %178 : vector<1x1x16x16xf32> to vector<16x16xf32>
    %180 = vector.shape_cast %177 : vector<16x16xf32> to vector<1x1x16x16xf32>
    tpu.vector_store %arg4[%c0_70, %c7, %c0_71, %c0_72], %180 {strides = array<i32>} : memref<1x8x16x16xf32, #tpu.memory_space<vmem>>, vector<1x1x16x16xf32>,
    return
  }
  func.func @transform_0(%arg0: i32) -> (i32, i32, i32) {
    %c0_i32 = arith.constant 0 : i32
    %c0_i32_0 = arith.constant 0 : i32
    %c0_i32_1 = arith.constant 0 : i32
    return %arg0, %c0_i32, %c0_i32_0 : i32, i32, i32
  }
  func.func @transform_1(%arg0: i32) -> (i32, i32) {
    %c0_i32 = arith.constant 0 : i32
    %c0_i32_0 = arith.constant 0 : i32
    %c0_i32_1 = arith.constant 0 : i32
    return %c0_i32, %c0_i32_0 : i32, i32
  }
  func.func @transform_2(%arg0: i32) -> (i32, i32) {
    %c0_i32 = arith.constant 0 : i32
    %c0_i32_0 = arith.constant 0 : i32
    %c0_i32_1 = arith.constant 0 : i32
    return %c0_i32, %c0_i32_0 : i32, i32
  }
  func.func @transform_3(%arg0: i32) -> (i32, i32, i32, i32) {
    %c0_i32 = arith.constant 0 : i32
    %c0_i32_0 = arith.constant 0 : i32
    %c0_i32_1 = arith.constant 0 : i32
    %c0_i32_2 = arith.constant 0 : i32
    return %arg0, %c0_i32, %c0_i32_0, %c0_i32_1 : i32, i32, i32, i32
  }
}

module attributes {stable_mosaic.version = 11 : i64} {
  func.func @_ffn_add_ln_kernel(%arg0: i32, %arg1: memref<32x128xf32, #tpu.memory_space<vmem>>, %arg2: memref<128x256xf32, #tpu.memory_space<vmem>>, %arg3: memref<1x256xf32, #tpu.memory_space<vmem>>, %arg4: memref<256x128xf32, #tpu.memory_space<vmem>>, %arg5: memref<1x128xf32, #tpu.memory_space<vmem>>, %arg6: memref<1x128xf32, #tpu.memory_space<vmem>>, %arg7: memref<1x128xf32, #tpu.memory_space<vmem>>, %arg8: memref<32x128xf32, #tpu.memory_space<vmem>>) attributes {dimension_semantics = [#tpu.dimension_semantics<parallel>], iteration_bounds = array<i64: 1>, scalar_prefetch = 0 : i64, scratch_operands = 0 : i64, tpu.core_type = #tpu.core_type<tc>, window_params = [{transform_indices = @transform_0, window_bounds = array<i64: 32, 128>}, {pipeline_mode = #tpu.pipeline_mode<synchronous>, transform_indices = @transform_1, window_bounds = array<i64: 128, 256>}, {pipeline_mode = #tpu.pipeline_mode<synchronous>, transform_indices = @transform_2, window_bounds = array<i64: 1, 256>}, {pipeline_mode = #tpu.pipeline_mode<synchronous>, transform_indices = @transform_3, window_bounds = array<i64: 256, 128>}, {pipeline_mode = #tpu.pipeline_mode<synchronous>, transform_indices = @transform_4, window_bounds = array<i64: 1, 128>}, {pipeline_mode = #tpu.pipeline_mode<synchronous>, transform_indices = @transform_5, window_bounds = array<i64: 1, 128>}, {pipeline_mode = #tpu.pipeline_mode<synchronous>, transform_indices = @transform_6, window_bounds = array<i64: 1, 128>}, {transform_indices = @transform_7, window_bounds = array<i64: 32, 128>}]} {
    %c0 = arith.constant 0 : index
    %c0_0 = arith.constant 0 : index
    %0 = vector.load %arg1[%c0, %c0_0] : memref<32x128xf32, #tpu.memory_space<vmem>>, vector<32x128xf32>
    %c0_1 = arith.constant 0 : index
    %c0_2 = arith.constant 0 : index
    %1 = vector.load %arg2[%c0_1, %c0_2] : memref<128x256xf32, #tpu.memory_space<vmem>>, vector<128x256xf32>
    %cst = arith.constant dense<0.000000e+00> : vector<32x256xf32>
    %2 = tpu.matmul %0, %1, %cst {dimension_numbers = #tpu.dot_dimension_numbers<[1], [0], [0], [1], [0, 0, 1, 1], [], []>} : vector<32x128xf32>, vector<128x256xf32>, vector<32x256xf32> -> vector<32x256xf32>
    %c0_3 = arith.constant 0 : index
    %c0_4 = arith.constant 0 : index
    %3 = vector.load %arg3[%c0_3, %c0_4] : memref<1x256xf32, #tpu.memory_space<vmem>>, vector<1x256xf32>
    %4 = vector.broadcast %3 : vector<1x256xf32> to vector<32x256xf32>
    %5 = arith.addf %2, %4 : vector<32x256xf32>
    %cst_5 = arith.constant 0.000000e+00 : f32
    %6 = vector.broadcast %cst_5 : f32 to vector<32x256xf32>
    %7 = arith.maximumf %5, %6 : vector<32x256xf32>
    %c0_6 = arith.constant 0 : index
    %c0_7 = arith.constant 0 : index
    %8 = vector.load %arg4[%c0_6, %c0_7] : memref<256x128xf32, #tpu.memory_space<vmem>>, vector<256x128xf32>
    %cst_8 = arith.constant dense<0.000000e+00> : vector<32x128xf32>
    %9 = tpu.matmul %7, %8, %cst_8 {dimension_numbers = #tpu.dot_dimension_numbers<[1], [0], [0], [1], [0, 0, 1, 1], [], []>} : vector<32x256xf32>, vector<256x128xf32>, vector<32x128xf32> -> vector<32x128xf32>
    %c0_9 = arith.constant 0 : index
    %c0_10 = arith.constant 0 : index
    %10 = vector.load %arg5[%c0_9, %c0_10] : memref<1x128xf32, #tpu.memory_space<vmem>>, vector<1x128xf32>
    %11 = vector.broadcast %10 : vector<1x128xf32> to vector<32x128xf32>
    %12 = arith.addf %9, %11 : vector<32x128xf32>
    %13 = arith.addf %12, %0 : vector<32x128xf32>
    %cst_11 = arith.constant dense<0.000000e+00> : vector<32xf32>
    %14 = vector.multi_reduction <add>, %13, %cst_11 [1] : vector<32x128xf32> to vector<32xf32>
    %15 = vector.shape_cast %14 : vector<32xf32> to vector<32x1xf32>
    %cst_12 = arith.constant 1.280000e+02 : f32
    %16 = vector.broadcast %cst_12 : f32 to vector<32x1xf32>
    %17 = arith.divf %15, %16 : vector<32x1xf32>
    %18 = vector.broadcast %17 : vector<32x1xf32> to vector<32x128xf32>
    %19 = arith.subf %13, %18 : vector<32x128xf32>
    %20 = arith.mulf %19, %19 : vector<32x128xf32>
    %cst_13 = arith.constant dense<0.000000e+00> : vector<32xf32>
    %21 = vector.multi_reduction <add>, %20, %cst_13 [1] : vector<32x128xf32> to vector<32xf32>
    %22 = vector.shape_cast %21 : vector<32xf32> to vector<32x1xf32>
    %cst_14 = arith.constant 1.280000e+02 : f32
    %23 = vector.broadcast %cst_14 : f32 to vector<32x1xf32>
    %24 = arith.divf %22, %23 : vector<32x1xf32>
    %25 = vector.broadcast %17 : vector<32x1xf32> to vector<32x128xf32>
    %26 = arith.subf %13, %25 : vector<32x128xf32>
    %cst_15 = arith.constant 9.99999974E-6 : f32
    %27 = vector.broadcast %cst_15 : f32 to vector<32x1xf32>
    %28 = arith.addf %24, %27 : vector<32x1xf32>
    %29 = math.rsqrt %28 : vector<32x1xf32>
    %30 = vector.broadcast %29 : vector<32x1xf32> to vector<32x128xf32>
    %31 = arith.mulf %26, %30 : vector<32x128xf32>
    %c0_16 = arith.constant 0 : index
    %c0_17 = arith.constant 0 : index
    %32 = vector.load %arg6[%c0_16, %c0_17] : memref<1x128xf32, #tpu.memory_space<vmem>>, vector<1x128xf32>
    %33 = vector.broadcast %32 : vector<1x128xf32> to vector<32x128xf32>
    %34 = arith.mulf %33, %31 : vector<32x128xf32>
    %c0_18 = arith.constant 0 : index
    %c0_19 = arith.constant 0 : index
    %35 = vector.load %arg7[%c0_18, %c0_19] : memref<1x128xf32, #tpu.memory_space<vmem>>, vector<1x128xf32>
    %36 = vector.broadcast %35 : vector<1x128xf32> to vector<32x128xf32>
    %37 = arith.addf %34, %36 : vector<32x128xf32>
    %c0_20 = arith.constant 0 : index
    %c0_21 = arith.constant 0 : index
    %38 = vector.load %arg8[%c0_20, %c0_21] : memref<32x128xf32, #tpu.memory_space<vmem>>, vector<32x128xf32>
    tpu.vector_store %arg8[%c0_20, %c0_21], %37 {strides = array<i32>} : memref<32x128xf32, #tpu.memory_space<vmem>>, vector<32x128xf32>,
    return
  }
  func.func @transform_0(%arg0: i32) -> (i32, i32) {
    %c0_i32 = arith.constant 0 : i32
    %c0_i32_0 = arith.constant 0 : i32
    return %arg0, %c0_i32 : i32, i32
  }
  func.func @transform_1(%arg0: i32) -> (i32, i32) {
    %c0_i32 = arith.constant 0 : i32
    %c0_i32_0 = arith.constant 0 : i32
    %c0_i32_1 = arith.constant 0 : i32
    return %c0_i32, %c0_i32_0 : i32, i32
  }
  func.func @transform_2(%arg0: i32) -> (i32, i32) {
    %c0_i32 = arith.constant 0 : i32
    %c0_i32_0 = arith.constant 0 : i32
    %c0_i32_1 = arith.constant 0 : i32
    return %c0_i32, %c0_i32_0 : i32, i32
  }
  func.func @transform_3(%arg0: i32) -> (i32, i32) {
    %c0_i32 = arith.constant 0 : i32
    %c0_i32_0 = arith.constant 0 : i32
    %c0_i32_1 = arith.constant 0 : i32
    return %c0_i32, %c0_i32_0 : i32, i32
  }
  func.func @transform_4(%arg0: i32) -> (i32, i32) {
    %c0_i32 = arith.constant 0 : i32
    %c0_i32_0 = arith.constant 0 : i32
    %c0_i32_1 = arith.constant 0 : i32
    return %c0_i32, %c0_i32_0 : i32, i32
  }
  func.func @transform_5(%arg0: i32) -> (i32, i32) {
    %c0_i32 = arith.constant 0 : i32
    %c0_i32_0 = arith.constant 0 : i32
    %c0_i32_1 = arith.constant 0 : i32
    return %c0_i32, %c0_i32_0 : i32, i32
  }
  func.func @transform_6(%arg0: i32) -> (i32, i32) {
    %c0_i32 = arith.constant 0 : i32
    %c0_i32_0 = arith.constant 0 : i32
    %c0_i32_1 = arith.constant 0 : i32
    return %c0_i32, %c0_i32_0 : i32, i32
  }
  func.func @transform_7(%arg0: i32) -> (i32, i32) {
    %c0_i32 = arith.constant 0 : i32
    %c0_i32_0 = arith.constant 0 : i32
    return %arg0, %c0_i32 : i32, i32
  }
}

module attributes {stable_mosaic.version = 11 : i64} {
  func.func @_cross_attn_core_kernel(%arg0: i32, %arg1: memref<1x16x128xf32, #tpu.memory_space<vmem>>, %arg2: memref<1x16x128xf32, #tpu.memory_space<vmem>>, %arg3: memref<128x256xf32, #tpu.memory_space<vmem>>, %arg4: memref<1x256xf32, #tpu.memory_space<vmem>>, %arg5: memref<128x128xf32, #tpu.memory_space<vmem>>, %arg6: memref<1x128xf32, #tpu.memory_space<vmem>>, %arg7: memref<1x8x16x16xf32, #tpu.memory_space<vmem>>) attributes {dimension_semantics = [#tpu.dimension_semantics<parallel>], iteration_bounds = array<i64: 2>, scalar_prefetch = 0 : i64, scratch_operands = 0 : i64, tpu.core_type = #tpu.core_type<tc>, window_params = [{transform_indices = @transform_0, window_bounds = array<i64: 1, 16, 128>}, {transform_indices = @transform_1, window_bounds = array<i64: 1, 16, 128>}, {pipeline_mode = #tpu.pipeline_mode<synchronous>, transform_indices = @transform_2, window_bounds = array<i64: 128, 256>}, {pipeline_mode = #tpu.pipeline_mode<synchronous>, transform_indices = @transform_3, window_bounds = array<i64: 1, 256>}, {pipeline_mode = #tpu.pipeline_mode<synchronous>, transform_indices = @transform_4, window_bounds = array<i64: 128, 128>}, {pipeline_mode = #tpu.pipeline_mode<synchronous>, transform_indices = @transform_5, window_bounds = array<i64: 1, 128>}, {transform_indices = @transform_6, window_bounds = array<i64: 1, 8, 16, 16>}]} {
    %c0 = arith.constant 0 : index
    %c0_0 = arith.constant 0 : index
    %c0_1 = arith.constant 0 : index
    %0 = vector.load %arg1[%c0, %c0_0, %c0_1] : memref<1x16x128xf32, #tpu.memory_space<vmem>>, vector<1x16x128xf32>
    %1 = vector.shape_cast %0 : vector<1x16x128xf32> to vector<16x128xf32>
    %c0_2 = arith.constant 0 : index
    %c0_3 = arith.constant 0 : index
    %2 = vector.load %arg3[%c0_2, %c0_3] : memref<128x256xf32, #tpu.memory_space<vmem>>, vector<128x256xf32>
    %cst = arith.constant dense<0.000000e+00> : vector<16x256xf32>
    %3 = tpu.matmul %1, %2, %cst {dimension_numbers = #tpu.dot_dimension_numbers<[1], [0], [0], [1], [0, 0, 1, 1], [], []>} : vector<16x128xf32>, vector<128x256xf32>, vector<16x256xf32> -> vector<16x256xf32>
    %c0_4 = arith.constant 0 : index
    %c0_5 = arith.constant 0 : index
    %4 = vector.load %arg4[%c0_4, %c0_5] : memref<1x256xf32, #tpu.memory_space<vmem>>, vector<1x256xf32>
    %5 = vector.broadcast %4 : vector<1x256xf32> to vector<16x256xf32>
    %6 = arith.addf %3, %5 : vector<16x256xf32>
    %c0_6 = arith.constant 0 : index
    %c0_7 = arith.constant 0 : index
    %c0_8 = arith.constant 0 : index
    %7 = vector.load %arg2[%c0_6, %c0_7, %c0_8] : memref<1x16x128xf32, #tpu.memory_space<vmem>>, vector<1x16x128xf32>
    %8 = vector.shape_cast %7 : vector<1x16x128xf32> to vector<16x128xf32>
    %c0_9 = arith.constant 0 : index
    %c0_10 = arith.constant 0 : index
    %9 = vector.load %arg5[%c0_9, %c0_10] : memref<128x128xf32, #tpu.memory_space<vmem>>, vector<128x128xf32>
    %cst_11 = arith.constant dense<0.000000e+00> : vector<16x128xf32>
    %10 = tpu.matmul %8, %9, %cst_11 {dimension_numbers = #tpu.dot_dimension_numbers<[1], [0], [0], [1], [0, 0, 1, 1], [], []>} : vector<16x128xf32>, vector<128x128xf32>, vector<16x128xf32> -> vector<16x128xf32>
    %c0_12 = arith.constant 0 : index
    %c0_13 = arith.constant 0 : index
    %11 = vector.load %arg6[%c0_12, %c0_13] : memref<1x128xf32, #tpu.memory_space<vmem>>, vector<1x128xf32>
    %12 = vector.broadcast %11 : vector<1x128xf32> to vector<16x128xf32>
    %13 = arith.addf %10, %12 : vector<16x128xf32>
    %14 = vector.extract_strided_slice %13 {offsets = [0, 0], sizes = [16, 16], strides = [1, 1]} : vector<16x128xf32> to vector<16x16xf32>
    %15 = vector.extract_strided_slice %6 {offsets = [0, 0], sizes = [16, 16], strides = [1, 1]} : vector<16x256xf32> to vector<16x16xf32>
    %16 = vector.extract_strided_slice %6 {offsets = [0, 16], sizes = [16, 16], strides = [1, 1]} : vector<16x256xf32> to vector<16x16xf32>
    %cst_14 = arith.constant dense<0.000000e+00> : vector<16x16xf32>
    %17 = tpu.matmul %14, %15, %cst_14 {dimension_numbers = #tpu.dot_dimension_numbers<[1], [1], [0], [0], [0, 0, 1, 0], [], []>} : vector<16x16xf32>, vector<16x16xf32>, vector<16x16xf32> -> vector<16x16xf32>
    %cst_15 = arith.constant 2.500000e-01 : f32
    %18 = vector.broadcast %cst_15 : f32 to vector<16x16xf32>
    %19 = arith.mulf %17, %18 : vector<16x16xf32>
    %cst_16 = arith.constant dense<0xFF800000> : vector<16xf32>
    %20 = vector.multi_reduction <maximumf>, %19, %cst_16 [1] : vector<16x16xf32> to vector<16xf32>
    %21 = vector.shape_cast %20 : vector<16xf32> to vector<16x1xf32>
    %22 = vector.broadcast %21 : vector<16x1xf32> to vector<16x16xf32>
    %23 = arith.subf %19, %22 : vector<16x16xf32>
    %24 = math.exp %23 : vector<16x16xf32>
    %cst_17 = arith.constant dense<0.000000e+00> : vector<16xf32>
    %25 = vector.multi_reduction <add>, %24, %cst_17 [1] : vector<16x16xf32> to vector<16xf32>
    %26 = vector.shape_cast %25 : vector<16xf32> to vector<16x1xf32>
    %27 = tpu.reciprocal %26 {approx = true} : vector<16x1xf32> -> vector<16x1xf32>
    %28 = vector.broadcast %27 : vector<16x1xf32> to vector<16x16xf32>
    %29 = arith.mulf %24, %28 : vector<16x16xf32>
    %cst_18 = arith.constant dense<0.000000e+00> : vector<16x16xf32>
    %30 = tpu.matmul %29, %16, %cst_18 {dimension_numbers = #tpu.dot_dimension_numbers<[1], [0], [0], [1], [0, 0, 1, 1], [], []>} : vector<16x16xf32>, vector<16x16xf32>, vector<16x16xf32> -> vector<16x16xf32>
    %c0_19 = arith.constant 0 : index
    %c0_20 = arith.constant 0 : index
    %c0_21 = arith.constant 0 : index
    %c0_22 = arith.constant 0 : index
    %31 = vector.load %arg7[%c0_19, %c0_20, %c0_21, %c0_22] : memref<1x8x16x16xf32, #tpu.memory_space<vmem>>, vector<1x1x16x16xf32>
    %32 = vector.shape_cast %31 : vector<1x1x16x16xf32> to vector<16x16xf32>
    %33 = vector.shape_cast %30 : vector<16x16xf32> to vector<1x1x16x16xf32>
    tpu.vector_store %arg7[%c0_19, %c0_20, %c0_21, %c0_22], %33 {strides = array<i32>} : memref<1x8x16x16xf32, #tpu.memory_space<vmem>>, vector<1x1x16x16xf32>,
    %34 = vector.extract_strided_slice %13 {offsets = [0, 16], sizes = [16, 16], strides = [1, 1]} : vector<16x128xf32> to vector<16x16xf32>
    %35 = vector.extract_strided_slice %6 {offsets = [0, 32], sizes = [16, 16], strides = [1, 1]} : vector<16x256xf32> to vector<16x16xf32>
    %36 = vector.extract_strided_slice %6 {offsets = [0, 48], sizes = [16, 16], strides = [1, 1]} : vector<16x256xf32> to vector<16x16xf32>
    %cst_23 = arith.constant dense<0.000000e+00> : vector<16x16xf32>
    %37 = tpu.matmul %34, %35, %cst_23 {dimension_numbers = #tpu.dot_dimension_numbers<[1], [1], [0], [0], [0, 0, 1, 0], [], []>} : vector<16x16xf32>, vector<16x16xf32>, vector<16x16xf32> -> vector<16x16xf32>
    %cst_24 = arith.constant 2.500000e-01 : f32
    %38 = vector.broadcast %cst_24 : f32 to vector<16x16xf32>
    %39 = arith.mulf %37, %38 : vector<16x16xf32>
    %cst_25 = arith.constant dense<0xFF800000> : vector<16xf32>
    %40 = vector.multi_reduction <maximumf>, %39, %cst_25 [1] : vector<16x16xf32> to vector<16xf32>
    %41 = vector.shape_cast %40 : vector<16xf32> to vector<16x1xf32>
    %42 = vector.broadcast %41 : vector<16x1xf32> to vector<16x16xf32>
    %43 = arith.subf %39, %42 : vector<16x16xf32>
    %44 = math.exp %43 : vector<16x16xf32>
    %cst_26 = arith.constant dense<0.000000e+00> : vector<16xf32>
    %45 = vector.multi_reduction <add>, %44, %cst_26 [1] : vector<16x16xf32> to vector<16xf32>
    %46 = vector.shape_cast %45 : vector<16xf32> to vector<16x1xf32>
    %47 = tpu.reciprocal %46 {approx = true} : vector<16x1xf32> -> vector<16x1xf32>
    %48 = vector.broadcast %47 : vector<16x1xf32> to vector<16x16xf32>
    %49 = arith.mulf %44, %48 : vector<16x16xf32>
    %cst_27 = arith.constant dense<0.000000e+00> : vector<16x16xf32>
    %50 = tpu.matmul %49, %36, %cst_27 {dimension_numbers = #tpu.dot_dimension_numbers<[1], [0], [0], [1], [0, 0, 1, 1], [], []>} : vector<16x16xf32>, vector<16x16xf32>, vector<16x16xf32> -> vector<16x16xf32>
    %c0_28 = arith.constant 0 : index
    %c1 = arith.constant 1 : index
    %c0_29 = arith.constant 0 : index
    %c0_30 = arith.constant 0 : index
    %51 = vector.load %arg7[%c0_28, %c1, %c0_29, %c0_30] : memref<1x8x16x16xf32, #tpu.memory_space<vmem>>, vector<1x1x16x16xf32>
    %52 = vector.shape_cast %51 : vector<1x1x16x16xf32> to vector<16x16xf32>
    %53 = vector.shape_cast %50 : vector<16x16xf32> to vector<1x1x16x16xf32>
    tpu.vector_store %arg7[%c0_28, %c1, %c0_29, %c0_30], %53 {strides = array<i32>} : memref<1x8x16x16xf32, #tpu.memory_space<vmem>>, vector<1x1x16x16xf32>,
    %54 = vector.extract_strided_slice %13 {offsets = [0, 32], sizes = [16, 16], strides = [1, 1]} : vector<16x128xf32> to vector<16x16xf32>
    %55 = vector.extract_strided_slice %6 {offsets = [0, 64], sizes = [16, 16], strides = [1, 1]} : vector<16x256xf32> to vector<16x16xf32>
    %56 = vector.extract_strided_slice %6 {offsets = [0, 80], sizes = [16, 16], strides = [1, 1]} : vector<16x256xf32> to vector<16x16xf32>
    %cst_31 = arith.constant dense<0.000000e+00> : vector<16x16xf32>
    %57 = tpu.matmul %54, %55, %cst_31 {dimension_numbers = #tpu.dot_dimension_numbers<[1], [1], [0], [0], [0, 0, 1, 0], [], []>} : vector<16x16xf32>, vector<16x16xf32>, vector<16x16xf32> -> vector<16x16xf32>
    %cst_32 = arith.constant 2.500000e-01 : f32
    %58 = vector.broadcast %cst_32 : f32 to vector<16x16xf32>
    %59 = arith.mulf %57, %58 : vector<16x16xf32>
    %cst_33 = arith.constant dense<0xFF800000> : vector<16xf32>
    %60 = vector.multi_reduction <maximumf>, %59, %cst_33 [1] : vector<16x16xf32> to vector<16xf32>
    %61 = vector.shape_cast %60 : vector<16xf32> to vector<16x1xf32>
    %62 = vector.broadcast %61 : vector<16x1xf32> to vector<16x16xf32>
    %63 = arith.subf %59, %62 : vector<16x16xf32>
    %64 = math.exp %63 : vector<16x16xf32>
    %cst_34 = arith.constant dense<0.000000e+00> : vector<16xf32>
    %65 = vector.multi_reduction <add>, %64, %cst_34 [1] : vector<16x16xf32> to vector<16xf32>
    %66 = vector.shape_cast %65 : vector<16xf32> to vector<16x1xf32>
    %67 = tpu.reciprocal %66 {approx = true} : vector<16x1xf32> -> vector<16x1xf32>
    %68 = vector.broadcast %67 : vector<16x1xf32> to vector<16x16xf32>
    %69 = arith.mulf %64, %68 : vector<16x16xf32>
    %cst_35 = arith.constant dense<0.000000e+00> : vector<16x16xf32>
    %70 = tpu.matmul %69, %56, %cst_35 {dimension_numbers = #tpu.dot_dimension_numbers<[1], [0], [0], [1], [0, 0, 1, 1], [], []>} : vector<16x16xf32>, vector<16x16xf32>, vector<16x16xf32> -> vector<16x16xf32>
    %c0_36 = arith.constant 0 : index
    %c2 = arith.constant 2 : index
    %c0_37 = arith.constant 0 : index
    %c0_38 = arith.constant 0 : index
    %71 = vector.load %arg7[%c0_36, %c2, %c0_37, %c0_38] : memref<1x8x16x16xf32, #tpu.memory_space<vmem>>, vector<1x1x16x16xf32>
    %72 = vector.shape_cast %71 : vector<1x1x16x16xf32> to vector<16x16xf32>
    %73 = vector.shape_cast %70 : vector<16x16xf32> to vector<1x1x16x16xf32>
    tpu.vector_store %arg7[%c0_36, %c2, %c0_37, %c0_38], %73 {strides = array<i32>} : memref<1x8x16x16xf32, #tpu.memory_space<vmem>>, vector<1x1x16x16xf32>,
    %74 = vector.extract_strided_slice %13 {offsets = [0, 48], sizes = [16, 16], strides = [1, 1]} : vector<16x128xf32> to vector<16x16xf32>
    %75 = vector.extract_strided_slice %6 {offsets = [0, 96], sizes = [16, 16], strides = [1, 1]} : vector<16x256xf32> to vector<16x16xf32>
    %76 = vector.extract_strided_slice %6 {offsets = [0, 112], sizes = [16, 16], strides = [1, 1]} : vector<16x256xf32> to vector<16x16xf32>
    %cst_39 = arith.constant dense<0.000000e+00> : vector<16x16xf32>
    %77 = tpu.matmul %74, %75, %cst_39 {dimension_numbers = #tpu.dot_dimension_numbers<[1], [1], [0], [0], [0, 0, 1, 0], [], []>} : vector<16x16xf32>, vector<16x16xf32>, vector<16x16xf32> -> vector<16x16xf32>
    %cst_40 = arith.constant 2.500000e-01 : f32
    %78 = vector.broadcast %cst_40 : f32 to vector<16x16xf32>
    %79 = arith.mulf %77, %78 : vector<16x16xf32>
    %cst_41 = arith.constant dense<0xFF800000> : vector<16xf32>
    %80 = vector.multi_reduction <maximumf>, %79, %cst_41 [1] : vector<16x16xf32> to vector<16xf32>
    %81 = vector.shape_cast %80 : vector<16xf32> to vector<16x1xf32>
    %82 = vector.broadcast %81 : vector<16x1xf32> to vector<16x16xf32>
    %83 = arith.subf %79, %82 : vector<16x16xf32>
    %84 = math.exp %83 : vector<16x16xf32>
    %cst_42 = arith.constant dense<0.000000e+00> : vector<16xf32>
    %85 = vector.multi_reduction <add>, %84, %cst_42 [1] : vector<16x16xf32> to vector<16xf32>
    %86 = vector.shape_cast %85 : vector<16xf32> to vector<16x1xf32>
    %87 = tpu.reciprocal %86 {approx = true} : vector<16x1xf32> -> vector<16x1xf32>
    %88 = vector.broadcast %87 : vector<16x1xf32> to vector<16x16xf32>
    %89 = arith.mulf %84, %88 : vector<16x16xf32>
    %cst_43 = arith.constant dense<0.000000e+00> : vector<16x16xf32>
    %90 = tpu.matmul %89, %76, %cst_43 {dimension_numbers = #tpu.dot_dimension_numbers<[1], [0], [0], [1], [0, 0, 1, 1], [], []>} : vector<16x16xf32>, vector<16x16xf32>, vector<16x16xf32> -> vector<16x16xf32>
    %c0_44 = arith.constant 0 : index
    %c3 = arith.constant 3 : index
    %c0_45 = arith.constant 0 : index
    %c0_46 = arith.constant 0 : index
    %91 = vector.load %arg7[%c0_44, %c3, %c0_45, %c0_46] : memref<1x8x16x16xf32, #tpu.memory_space<vmem>>, vector<1x1x16x16xf32>
    %92 = vector.shape_cast %91 : vector<1x1x16x16xf32> to vector<16x16xf32>
    %93 = vector.shape_cast %90 : vector<16x16xf32> to vector<1x1x16x16xf32>
    tpu.vector_store %arg7[%c0_44, %c3, %c0_45, %c0_46], %93 {strides = array<i32>} : memref<1x8x16x16xf32, #tpu.memory_space<vmem>>, vector<1x1x16x16xf32>,
    %94 = vector.extract_strided_slice %13 {offsets = [0, 64], sizes = [16, 16], strides = [1, 1]} : vector<16x128xf32> to vector<16x16xf32>
    %95 = vector.extract_strided_slice %6 {offsets = [0, 128], sizes = [16, 16], strides = [1, 1]} : vector<16x256xf32> to vector<16x16xf32>
    %96 = vector.extract_strided_slice %6 {offsets = [0, 144], sizes = [16, 16], strides = [1, 1]} : vector<16x256xf32> to vector<16x16xf32>
    %cst_47 = arith.constant dense<0.000000e+00> : vector<16x16xf32>
    %97 = tpu.matmul %94, %95, %cst_47 {dimension_numbers = #tpu.dot_dimension_numbers<[1], [1], [0], [0], [0, 0, 1, 0], [], []>} : vector<16x16xf32>, vector<16x16xf32>, vector<16x16xf32> -> vector<16x16xf32>
    %cst_48 = arith.constant 2.500000e-01 : f32
    %98 = vector.broadcast %cst_48 : f32 to vector<16x16xf32>
    %99 = arith.mulf %97, %98 : vector<16x16xf32>
    %cst_49 = arith.constant dense<0xFF800000> : vector<16xf32>
    %100 = vector.multi_reduction <maximumf>, %99, %cst_49 [1] : vector<16x16xf32> to vector<16xf32>
    %101 = vector.shape_cast %100 : vector<16xf32> to vector<16x1xf32>
    %102 = vector.broadcast %101 : vector<16x1xf32> to vector<16x16xf32>
    %103 = arith.subf %99, %102 : vector<16x16xf32>
    %104 = math.exp %103 : vector<16x16xf32>
    %cst_50 = arith.constant dense<0.000000e+00> : vector<16xf32>
    %105 = vector.multi_reduction <add>, %104, %cst_50 [1] : vector<16x16xf32> to vector<16xf32>
    %106 = vector.shape_cast %105 : vector<16xf32> to vector<16x1xf32>
    %107 = tpu.reciprocal %106 {approx = true} : vector<16x1xf32> -> vector<16x1xf32>
    %108 = vector.broadcast %107 : vector<16x1xf32> to vector<16x16xf32>
    %109 = arith.mulf %104, %108 : vector<16x16xf32>
    %cst_51 = arith.constant dense<0.000000e+00> : vector<16x16xf32>
    %110 = tpu.matmul %109, %96, %cst_51 {dimension_numbers = #tpu.dot_dimension_numbers<[1], [0], [0], [1], [0, 0, 1, 1], [], []>} : vector<16x16xf32>, vector<16x16xf32>, vector<16x16xf32> -> vector<16x16xf32>
    %c0_52 = arith.constant 0 : index
    %c4 = arith.constant 4 : index
    %c0_53 = arith.constant 0 : index
    %c0_54 = arith.constant 0 : index
    %111 = vector.load %arg7[%c0_52, %c4, %c0_53, %c0_54] : memref<1x8x16x16xf32, #tpu.memory_space<vmem>>, vector<1x1x16x16xf32>
    %112 = vector.shape_cast %111 : vector<1x1x16x16xf32> to vector<16x16xf32>
    %113 = vector.shape_cast %110 : vector<16x16xf32> to vector<1x1x16x16xf32>
    tpu.vector_store %arg7[%c0_52, %c4, %c0_53, %c0_54], %113 {strides = array<i32>} : memref<1x8x16x16xf32, #tpu.memory_space<vmem>>, vector<1x1x16x16xf32>,
    %114 = vector.extract_strided_slice %13 {offsets = [0, 80], sizes = [16, 16], strides = [1, 1]} : vector<16x128xf32> to vector<16x16xf32>
    %115 = vector.extract_strided_slice %6 {offsets = [0, 160], sizes = [16, 16], strides = [1, 1]} : vector<16x256xf32> to vector<16x16xf32>
    %116 = vector.extract_strided_slice %6 {offsets = [0, 176], sizes = [16, 16], strides = [1, 1]} : vector<16x256xf32> to vector<16x16xf32>
    %cst_55 = arith.constant dense<0.000000e+00> : vector<16x16xf32>
    %117 = tpu.matmul %114, %115, %cst_55 {dimension_numbers = #tpu.dot_dimension_numbers<[1], [1], [0], [0], [0, 0, 1, 0], [], []>} : vector<16x16xf32>, vector<16x16xf32>, vector<16x16xf32> -> vector<16x16xf32>
    %cst_56 = arith.constant 2.500000e-01 : f32
    %118 = vector.broadcast %cst_56 : f32 to vector<16x16xf32>
    %119 = arith.mulf %117, %118 : vector<16x16xf32>
    %cst_57 = arith.constant dense<0xFF800000> : vector<16xf32>
    %120 = vector.multi_reduction <maximumf>, %119, %cst_57 [1] : vector<16x16xf32> to vector<16xf32>
    %121 = vector.shape_cast %120 : vector<16xf32> to vector<16x1xf32>
    %122 = vector.broadcast %121 : vector<16x1xf32> to vector<16x16xf32>
    %123 = arith.subf %119, %122 : vector<16x16xf32>
    %124 = math.exp %123 : vector<16x16xf32>
    %cst_58 = arith.constant dense<0.000000e+00> : vector<16xf32>
    %125 = vector.multi_reduction <add>, %124, %cst_58 [1] : vector<16x16xf32> to vector<16xf32>
    %126 = vector.shape_cast %125 : vector<16xf32> to vector<16x1xf32>
    %127 = tpu.reciprocal %126 {approx = true} : vector<16x1xf32> -> vector<16x1xf32>
    %128 = vector.broadcast %127 : vector<16x1xf32> to vector<16x16xf32>
    %129 = arith.mulf %124, %128 : vector<16x16xf32>
    %cst_59 = arith.constant dense<0.000000e+00> : vector<16x16xf32>
    %130 = tpu.matmul %129, %116, %cst_59 {dimension_numbers = #tpu.dot_dimension_numbers<[1], [0], [0], [1], [0, 0, 1, 1], [], []>} : vector<16x16xf32>, vector<16x16xf32>, vector<16x16xf32> -> vector<16x16xf32>
    %c0_60 = arith.constant 0 : index
    %c5 = arith.constant 5 : index
    %c0_61 = arith.constant 0 : index
    %c0_62 = arith.constant 0 : index
    %131 = vector.load %arg7[%c0_60, %c5, %c0_61, %c0_62] : memref<1x8x16x16xf32, #tpu.memory_space<vmem>>, vector<1x1x16x16xf32>
    %132 = vector.shape_cast %131 : vector<1x1x16x16xf32> to vector<16x16xf32>
    %133 = vector.shape_cast %130 : vector<16x16xf32> to vector<1x1x16x16xf32>
    tpu.vector_store %arg7[%c0_60, %c5, %c0_61, %c0_62], %133 {strides = array<i32>} : memref<1x8x16x16xf32, #tpu.memory_space<vmem>>, vector<1x1x16x16xf32>,
    %134 = vector.extract_strided_slice %13 {offsets = [0, 96], sizes = [16, 16], strides = [1, 1]} : vector<16x128xf32> to vector<16x16xf32>
    %135 = vector.extract_strided_slice %6 {offsets = [0, 192], sizes = [16, 16], strides = [1, 1]} : vector<16x256xf32> to vector<16x16xf32>
    %136 = vector.extract_strided_slice %6 {offsets = [0, 208], sizes = [16, 16], strides = [1, 1]} : vector<16x256xf32> to vector<16x16xf32>
    %cst_63 = arith.constant dense<0.000000e+00> : vector<16x16xf32>
    %137 = tpu.matmul %134, %135, %cst_63 {dimension_numbers = #tpu.dot_dimension_numbers<[1], [1], [0], [0], [0, 0, 1, 0], [], []>} : vector<16x16xf32>, vector<16x16xf32>, vector<16x16xf32> -> vector<16x16xf32>
    %cst_64 = arith.constant 2.500000e-01 : f32
    %138 = vector.broadcast %cst_64 : f32 to vector<16x16xf32>
    %139 = arith.mulf %137, %138 : vector<16x16xf32>
    %cst_65 = arith.constant dense<0xFF800000> : vector<16xf32>
    %140 = vector.multi_reduction <maximumf>, %139, %cst_65 [1] : vector<16x16xf32> to vector<16xf32>
    %141 = vector.shape_cast %140 : vector<16xf32> to vector<16x1xf32>
    %142 = vector.broadcast %141 : vector<16x1xf32> to vector<16x16xf32>
    %143 = arith.subf %139, %142 : vector<16x16xf32>
    %144 = math.exp %143 : vector<16x16xf32>
    %cst_66 = arith.constant dense<0.000000e+00> : vector<16xf32>
    %145 = vector.multi_reduction <add>, %144, %cst_66 [1] : vector<16x16xf32> to vector<16xf32>
    %146 = vector.shape_cast %145 : vector<16xf32> to vector<16x1xf32>
    %147 = tpu.reciprocal %146 {approx = true} : vector<16x1xf32> -> vector<16x1xf32>
    %148 = vector.broadcast %147 : vector<16x1xf32> to vector<16x16xf32>
    %149 = arith.mulf %144, %148 : vector<16x16xf32>
    %cst_67 = arith.constant dense<0.000000e+00> : vector<16x16xf32>
    %150 = tpu.matmul %149, %136, %cst_67 {dimension_numbers = #tpu.dot_dimension_numbers<[1], [0], [0], [1], [0, 0, 1, 1], [], []>} : vector<16x16xf32>, vector<16x16xf32>, vector<16x16xf32> -> vector<16x16xf32>
    %c0_68 = arith.constant 0 : index
    %c6 = arith.constant 6 : index
    %c0_69 = arith.constant 0 : index
    %c0_70 = arith.constant 0 : index
    %151 = vector.load %arg7[%c0_68, %c6, %c0_69, %c0_70] : memref<1x8x16x16xf32, #tpu.memory_space<vmem>>, vector<1x1x16x16xf32>
    %152 = vector.shape_cast %151 : vector<1x1x16x16xf32> to vector<16x16xf32>
    %153 = vector.shape_cast %150 : vector<16x16xf32> to vector<1x1x16x16xf32>
    tpu.vector_store %arg7[%c0_68, %c6, %c0_69, %c0_70], %153 {strides = array<i32>} : memref<1x8x16x16xf32, #tpu.memory_space<vmem>>, vector<1x1x16x16xf32>,
    %154 = vector.extract_strided_slice %13 {offsets = [0, 112], sizes = [16, 16], strides = [1, 1]} : vector<16x128xf32> to vector<16x16xf32>
    %155 = vector.extract_strided_slice %6 {offsets = [0, 224], sizes = [16, 16], strides = [1, 1]} : vector<16x256xf32> to vector<16x16xf32>
    %156 = vector.extract_strided_slice %6 {offsets = [0, 240], sizes = [16, 16], strides = [1, 1]} : vector<16x256xf32> to vector<16x16xf32>
    %cst_71 = arith.constant dense<0.000000e+00> : vector<16x16xf32>
    %157 = tpu.matmul %154, %155, %cst_71 {dimension_numbers = #tpu.dot_dimension_numbers<[1], [1], [0], [0], [0, 0, 1, 0], [], []>} : vector<16x16xf32>, vector<16x16xf32>, vector<16x16xf32> -> vector<16x16xf32>
    %cst_72 = arith.constant 2.500000e-01 : f32
    %158 = vector.broadcast %cst_72 : f32 to vector<16x16xf32>
    %159 = arith.mulf %157, %158 : vector<16x16xf32>
    %cst_73 = arith.constant dense<0xFF800000> : vector<16xf32>
    %160 = vector.multi_reduction <maximumf>, %159, %cst_73 [1] : vector<16x16xf32> to vector<16xf32>
    %161 = vector.shape_cast %160 : vector<16xf32> to vector<16x1xf32>
    %162 = vector.broadcast %161 : vector<16x1xf32> to vector<16x16xf32>
    %163 = arith.subf %159, %162 : vector<16x16xf32>
    %164 = math.exp %163 : vector<16x16xf32>
    %cst_74 = arith.constant dense<0.000000e+00> : vector<16xf32>
    %165 = vector.multi_reduction <add>, %164, %cst_74 [1] : vector<16x16xf32> to vector<16xf32>
    %166 = vector.shape_cast %165 : vector<16xf32> to vector<16x1xf32>
    %167 = tpu.reciprocal %166 {approx = true} : vector<16x1xf32> -> vector<16x1xf32>
    %168 = vector.broadcast %167 : vector<16x1xf32> to vector<16x16xf32>
    %169 = arith.mulf %164, %168 : vector<16x16xf32>
    %cst_75 = arith.constant dense<0.000000e+00> : vector<16x16xf32>
    %170 = tpu.matmul %169, %156, %cst_75 {dimension_numbers = #tpu.dot_dimension_numbers<[1], [0], [0], [1], [0, 0, 1, 1], [], []>} : vector<16x16xf32>, vector<16x16xf32>, vector<16x16xf32> -> vector<16x16xf32>
    %c0_76 = arith.constant 0 : index
    %c7 = arith.constant 7 : index
    %c0_77 = arith.constant 0 : index
    %c0_78 = arith.constant 0 : index
    %171 = vector.load %arg7[%c0_76, %c7, %c0_77, %c0_78] : memref<1x8x16x16xf32, #tpu.memory_space<vmem>>, vector<1x1x16x16xf32>
    %172 = vector.shape_cast %171 : vector<1x1x16x16xf32> to vector<16x16xf32>
    %173 = vector.shape_cast %170 : vector<16x16xf32> to vector<1x1x16x16xf32>
    tpu.vector_store %arg7[%c0_76, %c7, %c0_77, %c0_78], %173 {strides = array<i32>} : memref<1x8x16x16xf32, #tpu.memory_space<vmem>>, vector<1x1x16x16xf32>,
    return
  }
  func.func @transform_0(%arg0: i32) -> (i32, i32, i32) {
    %c0_i32 = arith.constant 0 : i32
    %c0_i32_0 = arith.constant 0 : i32
    %c0_i32_1 = arith.constant 0 : i32
    return %arg0, %c0_i32, %c0_i32_0 : i32, i32, i32
  }
  func.func @transform_1(%arg0: i32) -> (i32, i32, i32) {
    %c0_i32 = arith.constant 0 : i32
    %c0_i32_0 = arith.constant 0 : i32
    %c0_i32_1 = arith.constant 0 : i32
    return %arg0, %c0_i32, %c0_i32_0 : i32, i32, i32
  }
  func.func @transform_2(%arg0: i32) -> (i32, i32) {
    %c0_i32 = arith.constant 0 : i32
    %c0_i32_0 = arith.constant 0 : i32
    %c0_i32_1 = arith.constant 0 : i32
    return %c0_i32, %c0_i32_0 : i32, i32
  }
  func.func @transform_3(%arg0: i32) -> (i32, i32) {
    %c0_i32 = arith.constant 0 : i32
    %c0_i32_0 = arith.constant 0 : i32
    %c0_i32_1 = arith.constant 0 : i32
    return %c0_i32, %c0_i32_0 : i32, i32
  }
  func.func @transform_4(%arg0: i32) -> (i32, i32) {
    %c0_i32 = arith.constant 0 : i32
    %c0_i32_0 = arith.constant 0 : i32
    %c0_i32_1 = arith.constant 0 : i32
    return %c0_i32, %c0_i32_0 : i32, i32
  }
  func.func @transform_5(%arg0: i32) -> (i32, i32) {
    %c0_i32 = arith.constant 0 : i32
    %c0_i32_0 = arith.constant 0 : i32
    %c0_i32_1 = arith.constant 0 : i32
    return %c0_i32, %c0_i32_0 : i32, i32
  }
  func.func @transform_6(%arg0: i32) -> (i32, i32, i32, i32) {
    %c0_i32 = arith.constant 0 : i32
    %c0_i32_0 = arith.constant 0 : i32
    %c0_i32_1 = arith.constant 0 : i32
    %c0_i32_2 = arith.constant 0 : i32
    return %arg0, %c0_i32, %c0_i32_0, %c0_i32_1 : i32, i32, i32, i32
  }
}

</mosaic_0001>

<bundles_post_ra>
// kernel: decoder_layer.6
= control target key start
LH: loop header
LB: loop body
LE: loop exit
PB: predicated region body
PF: predicated region fallthrough
CT: control target
= control target key end

     0   :  { %11 = vsyncpa [#allocation3], 0  ;;  %s303_s24 = smov [#allocation2]   ;;  %s304_s26 = smov 128   ;;  %s405_s0 = inlined_call_operand.vmem [shape: f32[32,128], index: 0, kind: input, shape index: {}]   ;;  %s406_s1 = inlined_call_operand.vmem [shape: f32[32,128], index: 1, kind: input, shape index: {}]   ;;  %s407_s2 = inlined_call_operand.hbm [shape: f32[128,128], index: 2, kind: input, shape index: {}]   ;;  %s408_s3 = inlined_call_operand.vmem [shape: f32[1,128], index: 3, kind: input, shape index: {}]   ;;  %s409_s4 = inlined_call_operand.vmem [shape: f32[1,128], index: 4, kind: input, shape index: {}]   ;;  %s410_s5 = inlined_call_operand.vmem [shape: f32[1,128], index: 5, kind: input, shape index: {}]   ;;  %s411_s6 = inlined_call_operand.vmem [shape: f32[32,128], index: 6, kind: output, shape index: {}]  }
   0x1   :  { %s20_s23 = sshll.u32 %s407_s2, 4  ;;  %s22_s25 = sshll.u32 %s303_s24, 4  ;;  %s21_s23 = int_to_ptr.hbm [resolvable:$true] %s20_s23  ;;  %s23_s25 = int_to_ptr.vmem [resolvable:$true] %s22_s25 }
   0x2   :  { %s305_s27 = smov 8  }
   0x3   :  { %28 = dma.hbm_to_vmem [thread:$0]  %s21_s23, 2048, %s23_s25, [#allocation3], %s304_s26, %s304_s26, %s305_s27  }
   0x4   :  { %301 = dma.done.wait [#allocation3], 2048  }
   0x5   :  { %302 = vsyncadd [#allocation3], 4294965248  ;;  %v58_v0 = vld [vmem:[#allocation2 + $0x78] sm:$0xff]  ;;  %v57_v1 = vld [vmem:[#allocation2 + $0x70] sm:$0xff]  ;;  %v306_v37 = vmov 128.0  }
   0x6   :  { %63 = vmatpush.msra.mxu0 %v58_v0  ;;  %213 = vmatpush.msra.mxu2 %v58_v0  ;;  %v56_v2 = vld [vmem:[#allocation2 + $0x68] sm:$0xff]  ;;  %v55_v3 = vld [vmem:[#allocation2 + $0x60] sm:$0xff]  ;;  %v54_v4 = vld [vmem:[#allocation2 + $0x58] sm:$0xff]  ;;  %267 = vrcp.f32 %v306_v37 }
   0x7   :  { %212 = vmatpush.msra.mxu1 %v58_v0  ;;  %214 = vmatpush.msra.mxu3 %v58_v0  ;;  %v53_v5 = vld [vmem:[#allocation2 + $0x50] sm:$0xff]  ;;  %v52_v6 = vld [vmem:[#allocation2 + $0x48] sm:$0xff]  ;;  %v51_v7 = vld [vmem:[#allocation2 + $0x40] sm:$0xff] }
   0x8   :  { %64 = vmatpush.msra.mxu0 %v57_v1  ;;  %216 = vmatpush.msra.mxu2 %v57_v1  ;;  %v50_v8 = vld [vmem:[#allocation2 + $0x38] sm:$0xff]  ;;  %v49_v9 = vld [vmem:[#allocation2 + $0x30] sm:$0xff]  ;;  %v48_v10 = vld [vmem:[#allocation2 + $0x28] sm:$0xff] }
   0x9   :  { %215 = vmatpush.msra.mxu1 %v57_v1  ;;  %217 = vmatpush.msra.mxu3 %v57_v1  ;;  %v47_v11 = vld [vmem:[#allocation2 + $0x20] sm:$0xff]  ;;  %v46_v12 = vld [vmem:[#allocation2 + $0x18] sm:$0xff]  ;;  %v45_v13 = vld [vmem:[#allocation2 + $0x10] sm:$0xff] }
   0xa   :  { %65 = vmatpush.msra.mxu0 %v56_v2  ;;  %219 = vmatpush.msra.mxu2 %v56_v2  ;;  %v44_v14 = vld [vmem:[#allocation2 + $0x8] sm:$0xff]  ;;  %v43_v15 = vld [vmem:[#allocation2] sm:$0xff]  ;;  %v41_v17 = vld [vmem:[%s405_s0 + $0x10] sm:$0xff] }
   0xb   :  { %218 = vmatpush.msra.mxu1 %v56_v2  ;;  %220 = vmatpush.msra.mxu3 %v56_v2  ;;  %v39_v16 = vld [vmem:[%s405_s0] sm:$0xff]  ;;  %v40_v18 = vld [vmem:[%s405_s0 + $0x8] sm:$0xff]  ;;  %v42_v19 = vld [vmem:[%s405_s0 + $0x18] sm:$0xff] }
   0xc   :  { %66 = vmatpush.msra.mxu0 %v55_v3  ;;  %222 = vmatpush.msra.mxu2 %v55_v3  ;;  %v264_v20 = vld [vmem:[%s408_s3] ss:$0 sm:$0xff]  ;;  %v94_v28 = vld [vmem:[%s406_s1 + $0x10] sm:$0xff]  ;;  %v93_v29 = vld [vmem:[%s406_s1 + $0x8] sm:$0xff]  ;;  %v268_v38 = vpop.eup %267 }
   0xd   :  { %221 = vmatpush.msra.mxu1 %v55_v3  ;;  %223 = vmatpush.msra.mxu3 %v55_v3  ;;  %v92_v22 = vld [vmem:[%s406_s1] sm:$0xff]  ;;  %v95_v35 = vld [vmem:[%s406_s1 + $0x18] sm:$0xff]  ;;  %v109_v39 = vmul.f32 128.0, %v268_v38  ;;  %vm113_vm0 = vweird.f32 %v268_v38 }
   0xe   :  { %67 = vmatpush.msra.mxu0 %v54_v4  ;;  %225 = vmatpush.msra.mxu2 %v54_v4 }
   0xf   :  { %224 = vmatpush.msra.mxu1 %v54_v4  ;;  %226 = vmatpush.msra.mxu3 %v54_v4  ;;  %v110_v40 = vsub.f32 1.0, %v109_v39 }
  0x10   :  { %68 = vmatpush.msra.mxu0 %v53_v5  ;;  %228 = vmatpush.msra.mxu2 %v53_v5 }
  0x11   :  { %227 = vmatpush.msra.mxu1 %v53_v5  ;;  %229 = vmatpush.msra.mxu3 %v53_v5  ;;  %v111_v41 = vmul.f32 %v268_v38, %v110_v40 }
  0x12   :  { %69 = vmatpush.msra.mxu0 %v52_v6  ;;  %231 = vmatpush.msra.mxu2 %v52_v6 }
  0x13   :  { %230 = vmatpush.msra.mxu1 %v52_v6  ;;  %232 = vmatpush.msra.mxu3 %v52_v6  ;;  %v112_v42 = vadd.f32 %v268_v38, %v111_v41 }
  0x14   :  { %70 = vmatpush.msra.mxu0 %v51_v7  ;;  %234 = vmatpush.msra.mxu2 %v51_v7 }
  0x15   :  { %233 = vmatpush.msra.mxu1 %v51_v7  ;;  %235 = vmatpush.msra.mxu3 %v51_v7  ;;  %v114_v43 = vsel %vm113_vm0, %v268_v38, %v112_v42 }
  0x16   :  { %71 = vmatpush.msra.mxu0 %v50_v8  ;;  %237 = vmatpush.msra.mxu2 %v50_v8 }
  0x17   :  { %236 = vmatpush.msra.mxu1 %v50_v8  ;;  %238 = vmatpush.msra.mxu3 %v50_v8 }
  0x18   :  { %72 = vmatpush.msra.mxu0 %v49_v9  ;;  %240 = vmatpush.msra.mxu2 %v49_v9 }
  0x19   :  { %239 = vmatpush.msra.mxu1 %v49_v9  ;;  %241 = vmatpush.msra.mxu3 %v49_v9 }
  0x1a   :  { %73 = vmatpush.msra.mxu0 %v48_v10  ;;  %243 = vmatpush.msra.mxu2 %v48_v10 }
  0x1b   :  { %242 = vmatpush.msra.mxu1 %v48_v10  ;;  %244 = vmatpush.msra.mxu3 %v48_v10 }
  0x1c   :  { %74 = vmatpush.msra.mxu0 %v47_v11  ;;  %246 = vmatpush.msra.mxu2 %v47_v11 }
  0x1d   :  { %245 = vmatpush.msra.mxu1 %v47_v11  ;;  %247 = vmatpush.msra.mxu3 %v47_v11 }
  0x1e   :  { %75 = vmatpush.msra.mxu0 %v46_v12  ;;  %249 = vmatpush.msra.mxu2 %v46_v12 }
  0x1f   :  { %248 = vmatpush.msra.mxu1 %v46_v12  ;;  %250 = vmatpush.msra.mxu3 %v46_v12 }
  0x20   :  { %76 = vmatpush.msra.mxu0 %v45_v13  ;;  %252 = vmatpush.msra.mxu2 %v45_v13 }
  0x21   :  { %251 = vmatpush.msra.mxu1 %v45_v13  ;;  %253 = vmatpush.msra.mxu3 %v45_v13 }
  0x22   :  { %77 = vmatpush.msra.mxu0 %v44_v14  ;;  %255 = vmatpush.msra.mxu2 %v44_v14 }
  0x23   :  { %254 = vmatpush.msra.mxu1 %v44_v14  ;;  %256 = vmatpush.msra.mxu3 %v44_v14 }
  0x24   :  { %78 = vmatpush.msra.mxu0 %v43_v15  ;;  %258 = vmatpush.msra.mxu2 %v43_v15 }
  0x25   :  { %79 = vmatmul.f32.vlgmr.msra.gmra.mxu0 %v39_v16  ;;  %85 = vmatmul.f32.vlgmr.msra.gmra.mxu2 %v41_v17 }
  0x26   :  { %257 = vmatpush.msra.mxu1 %v43_v15  ;;  %259 = vmatpush.msra.mxu3 %v43_v15 }
  0x27   :  { %82 = vmatmul.f32.vlgmr.msra.gmra.mxu1 %v40_v18  ;;  %88 = vmatmul.f32.vlgmr.msra.gmra.mxu3 %v42_v19  ;;  %v265_v19 = vld [vmem:[%s409_s4] ss:$0 sm:$0xff] }
  0xa2   :  { %v80_v21 = vpop.f32.mrf.mxu0 }
  0xa3   :  { %v81_v23 = vadd.f32 %v264_v20, %v80_v21 }
  0xa4   :  { %v83_v24 = vpop.f32.mrf.mxu1 }
  0xa5   :  { %v96_v25 = vadd.f32 %v92_v22, %v81_v23  ;;  %v84_v26 = vadd.f32 %v264_v20, %v83_v24  ;;  %v266_v23 = vld [vmem:[%s410_s5] ss:$0 sm:$0xff] }
  0xa7   :  { %100 = vadd.xlane.f32.xlu0 %v96_v25  ;;  %v97_v33 = vadd.f32 %v93_v29, %v84_v26 }
  0xa8   :  { %v86_v27 = vpop.f32.mrf.mxu2 }
  0xa9   :  { %v87_v30 = vadd.f32 %v264_v20, %v86_v27 }
  0xaa   :  { %v89_v31 = vpop.f32.mrf.mxu3 }
  0xab   :  { %v98_v32 = vadd.f32 %v94_v28, %v87_v30  ;;  %v90_v34 = vadd.f32 %v264_v20, %v89_v31 }
  0xad   :  { %104 = vadd.xlane.f32.xlu1 %v98_v32  ;;  %v99_v36 = vadd.f32 %v95_v35, %v90_v34 }
  0xaf   :  { %102 = vadd.xlane.f32.xlu0 %v97_v33 }
  0xb5   :  { %106 = vadd.xlane.f32.xlu1 %v99_v36 }
 0x11a   :  { %v101_v44 = vpop.xlane.xlu0 %100 }
 0x11b   :  { %v115_v45 = vmul.f32 %v114_v43, %v101_v44 }
 0x11d   :  { %v119_v46 = vsub.f32 %v96_v25, %v115_v45 }
 0x11f   :  { %v123_v47 = vmul.f32 %v119_v46, %v119_v46 }
 0x120   :  { %v105_v48 = vpop.xlane.xlu1 %104 }
 0x121   :  { %v117_v49 = vmul.f32 %v114_v43, %v105_v48  ;;  %127 = vadd.xlane.f32.xlu2 %v123_v47 }
 0x122   :  { %v103_v50 = vpop.xlane.xlu0 %102 }
 0x123   :  { %v372_v51 = vsub.f32 %v98_v32, %v117_v49  ;;  %v116_v52 = vmul.f32 %v114_v43, %v103_v50 }
 0x125   :  { %v374_v53 = vsub.f32 %v97_v33, %v116_v52  ;;  %v125_v54 = vmul.f32 %v372_v51, %v372_v51 }
 0x127   :  { %131 = vadd.xlane.f32.xlu0 %v125_v54  ;;  %v124_v55 = vmul.f32 %v374_v53, %v374_v53 }
 0x128   :  { %v107_v56 = vpop.xlane.xlu1 %106 }
 0x129   :  { %v118_v57 = vmul.f32 %v114_v43, %v107_v56  ;;  %129 = vadd.xlane.f32.xlu2 %v124_v55 }
 0x12b   :  { %v380_v58 = vsub.f32 %v99_v36, %v118_v57 }
 0x12d   :  { %v126_v59 = vmul.f32 %v380_v58, %v380_v58 }
 0x12f   :  { %133 = vadd.xlane.f32.xlu1 %v126_v59 }
 0x194   :  { %v128_v60 = vpop.xlane.xlu2 %127 }
 0x195   :  { %v135_v61 = vmul.f32 %v128_v60, %v114_v43 }
 0x197   :  { %v139_v62 = vadd.f32 1e-05, %v135_v61 }
 0x199   :  { %269 = vrsqrt.f32 %v139_v62  ;;  %vm149_vm2 = vweird.f32 %v139_v62 }
 0x19a   :  { %v132_v63 = vpop.xlane.xlu0 %131 }
 0x19b   :  { %v137_v0 = vmul.f32 %v132_v63, %v114_v43 }
 0x19c   :  { %v130_v1 = vpop.xlane.xlu2 %129 }
 0x19d   :  { %v141_v2 = vadd.f32 1e-05, %v137_v0  ;;  %v136_v3 = vmul.f32 %v130_v1, %v114_v43 }
 0x19f   :  { %v270_v4 = vpop.eup %269  ;;  %271 = vrsqrt.f32 %v141_v2  ;;  %v140_v5 = vadd.f32 1e-05, %v136_v3  ;;  %vm169_vm5 = vweird.f32 %v141_v2 }
 0x1a0   :  { %v144_v6 = vmul.f32 %v270_v4, %v139_v62  ;;  %vm150_vm1 = vweird.f32 %v270_v4 }
 0x1a1   :  { %273 = vrsqrt.f32 %v140_v5  ;;  %vm151_vm3 = vmor %vm149_vm2, %vm150_vm1  ;;  %vm159_vm8 = vweird.f32 %v140_v5 }
 0x1a2   :  { %v145_v7 = vmul.f32 %v270_v4, %v144_v6  ;;  %v134_v8 = vpop.xlane.xlu1 %133 }
 0x1a3   :  { %v138_v9 = vmul.f32 %v134_v8, %v114_v43 }
 0x1a4   :  { %v146_v10 = vmul.f32 0.5, %v145_v7 }
 0x1a5   :  { %v272_v11 = vpop.eup %271  ;;  %v142_v12 = vadd.f32 1e-05, %v138_v9 }
 0x1a6   :  { %v147_v13 = vsub.f32 1.5, %v146_v10  ;;  %v164_v14 = vmul.f32 %v272_v11, %v141_v2  ;;  %vm170_vm4 = vweird.f32 %v272_v11 }
 0x1a7   :  { %v274_v15 = vpop.eup %273  ;;  %275 = vrsqrt.f32 %v142_v12  ;;  %vm171_vm7 = vmor %vm169_vm5, %vm170_vm4  ;;  %vm179_vm11 = vweird.f32 %v142_v12 }
 0x1a8   :  { %v148_v16 = vmul.f32 %v270_v4, %v147_v13  ;;  %v165_v17 = vmul.f32 %v272_v11, %v164_v14  ;;  %v154_v18 = vmul.f32 %v274_v15, %v140_v5  ;;  %vm160_vm6 = vweird.f32 %v274_v15 }
 0x1a9   :  { %vm161_vm9 = vmor %vm159_vm8, %vm160_vm6 }
 0x1aa   :  { %v152_v20 = vsel %vm151_vm3, %v270_v4, %v148_v16  ;;  %v166_v21 = vmul.f32 0.5, %v165_v17  ;;  %v155_v22 = vmul.f32 %v274_v15, %v154_v18 }
 0x1ab   :  { %v183_v24 = vmul.f32 %v152_v20, %v119_v46 }
 0x1ac   :  { %v167_v25 = vsub.f32 1.5, %v166_v21  ;;  %v156_v26 = vmul.f32 0.5, %v155_v22 }
 0x1ad   :  { %v276_v27 = vpop.eup %275  ;;  %v191_v28 = vmul.f32 %v265_v19, %v183_v24 }
 0x1ae   :  { %v168_v29 = vmul.f32 %v272_v11, %v167_v25  ;;  %v157_v30 = vsub.f32 1.5, %v156_v26  ;;  %v174_v31 = vmul.f32 %v276_v27, %v142_v12  ;;  %vm180_vm10 = vweird.f32 %v276_v27 }
 0x1af   :  { %v199_v32 = vadd.f32 %v266_v23, %v191_v28  ;;  %vm181_vm12 = vmor %vm179_vm11, %vm180_vm10 }
 0x1b0   :  { %v172_v33 = vsel %vm171_vm7, %v272_v11, %v168_v29  ;;  %v158_v34 = vmul.f32 %v274_v15, %v157_v30  ;;  %v175_v35 = vmul.f32 %v276_v27, %v174_v31 }
 0x1b1   :  { %203 = vst [vmem:[%s411_s6] sm:$0xff] %v199_v32  ;;  %v185_v36 = vmul.f32 %v172_v33, %v372_v51 }
 0x1b2   :  { %v162_v37 = vsel %vm161_vm9, %v274_v15, %v158_v34  ;;  %v176_v38 = vmul.f32 0.5, %v175_v35 }
 0x1b3   :  { %v193_v39 = vmul.f32 %v265_v19, %v185_v36  ;;  %v184_v40 = vmul.f32 %v162_v37, %v374_v53 }
 0x1b4   :  { %v177_v41 = vsub.f32 1.5, %v176_v38 }
 0x1b5   :  { %v201_v42 = vadd.f32 %v266_v23, %v193_v39  ;;  %v192_v43 = vmul.f32 %v265_v19, %v184_v40 }
 0x1b6   :  { %v178_v44 = vmul.f32 %v276_v27, %v177_v41 }
 0x1b7   :  { %205 = vst [vmem:[%s411_s6 + $0x10] sm:$0xff] %v201_v42  ;;  %v200_v45 = vadd.f32 %v266_v23, %v192_v43 }
 0x1b8   :  { %v182_v46 = vsel %vm181_vm12, %v276_v27, %v178_v44 }
 0x1b9   :  { %204 = vst [vmem:[%s411_s6 + $0x8] sm:$0xff] %v200_v45  ;;  %v186_v47 = vmul.f32 %v182_v46, %v380_v58 }
 0x1bb   :  { %v194_v48 = vmul.f32 %v265_v19, %v186_v47 }
 0x1bd   :  { %v202_v49 = vadd.f32 %v266_v23, %v194_v48 }
 0x1bf   :  { %206 = vst [vmem:[%s411_s6 + $0x18] sm:$0xff] %v202_v49 }
 0x1c0   :  { %211 = vsyncpa [#allocation3], 1 }

// kernel: decoder_layer.9
= control target key start
LH: loop header
LB: loop body
LE: loop exit
PB: predicated region body
PF: predicated region fallthrough
CT: control target
= control target key end

     0   :  { %12 = vsyncpa [#allocation3], 0  ;;  %s652_s0 = inlined_call_operand.vmem [shape: f32[32,128], index: 0, kind: input, shape index: {}]   ;;  %s653_s1 = inlined_call_operand.vmem [shape: f32[128,256], index: 1, kind: input, shape index: {}]   ;;  %s654_s2 = inlined_call_operand.vmem [shape: f32[1,256], index: 2, kind: input, shape index: {}]   ;;  %s655_s3 = inlined_call_operand.hbm [shape: f32[256,128], index: 3, kind: input, shape index: {}]   ;;  %s656_s4 = inlined_call_operand.vmem [shape: f32[1,128], index: 4, kind: input, shape index: {}]   ;;  %s657_s5 = inlined_call_operand.vmem [shape: f32[1,128], index: 5, kind: input, shape index: {}]   ;;  %s658_s6 = inlined_call_operand.vmem [shape: f32[1,128], index: 6, kind: input, shape index: {}]   ;;  %s659_s7 = inlined_call_operand.hbm [shape: f32[32,128], index: 7, kind: output, shape index: {}]  }
   0x1   :  { %13 = vsyncpa [#allocation4], 0  ;;  %s24_s26 = sshll.u32 %s655_s3, 4  ;;  %s445_s27 = smov [#allocation2]   ;;  %s25_s26 = int_to_ptr.hbm [resolvable:$true] %s24_s26 }
   0x2   :  { %s26_s28 = sshll.u32 %s445_s27, 4  ;;  %s446_s29 = smov 128   ;;  %s27_s28 = int_to_ptr.vmem [resolvable:$true] %s26_s28 }
   0x3   :  { %s447_s30 = smov 8  }
   0x4   :  { %32 = dma.hbm_to_vmem [thread:$0]  %s25_s26, 4096, %s27_s28, [#allocation3], %s446_s29, %s446_s29, %s447_s30  }
   0x5   :  { %441 = dma.done.wait [#allocation3], 4096  }
   0x6   :  { %442 = vsyncadd [#allocation3], 4294963200  ;;  %v77_v0 = vld [vmem:[%s653_s1 + $0xf0] sm:$0xff]  ;;  %v75_v1 = vld [vmem:[%s653_s1 + $0xe0] sm:$0xff]  ;;  %s362_s19 = sshll.u32 %s659_s7, 4  ;;  %s363_s19 = int_to_ptr.hbm [resolvable:$true] %s362_s19 }
   0x7   :  { %v78_v2 = vld [vmem:[%s653_s1 + $0xf8] sm:$0xff]  ;;  %85 = vmatpush.msra.mxu0 %v77_v0  ;;  %v76_v3 = vld [vmem:[%s653_s1 + $0xe8] sm:$0xff]  ;;  %v73_v4 = vld [vmem:[%s653_s1 + $0xd0] sm:$0xff] }
   0x8   :  { %114 = vmatpush.msra.mxu1 %v78_v2  ;;  %v74_v5 = vld [vmem:[%s653_s1 + $0xd8] sm:$0xff]  ;;  %v71_v6 = vld [vmem:[%s653_s1 + $0xc0] sm:$0xff]  ;;  %v72_v7 = vld [vmem:[%s653_s1 + $0xc8] sm:$0xff] }
   0x9   :  { %86 = vmatpush.msra.mxu0 %v75_v1  ;;  %v69_v8 = vld [vmem:[%s653_s1 + $0xb0] sm:$0xff]  ;;  %v70_v9 = vld [vmem:[%s653_s1 + $0xb8] sm:$0xff]  ;;  %v67_v10 = vld [vmem:[%s653_s1 + $0xa0] sm:$0xff] }
   0xa   :  { %115 = vmatpush.msra.mxu1 %v76_v3  ;;  %v68_v11 = vld [vmem:[%s653_s1 + $0xa8] sm:$0xff]  ;;  %v65_v12 = vld [vmem:[%s653_s1 + $0x90] sm:$0xff]  ;;  %v66_v13 = vld [vmem:[%s653_s1 + $0x98] sm:$0xff] }
   0xb   :  { %87 = vmatpush.msra.mxu0 %v73_v4  ;;  %v63_v14 = vld [vmem:[%s653_s1 + $0x80] sm:$0xff]  ;;  %v64_v15 = vld [vmem:[%s653_s1 + $0x88] sm:$0xff]  ;;  %v61_v16 = vld [vmem:[%s653_s1 + $0x70] sm:$0xff] }
   0xc   :  { %116 = vmatpush.msra.mxu1 %v74_v5  ;;  %v62_v17 = vld [vmem:[%s653_s1 + $0x78] sm:$0xff]  ;;  %v59_v18 = vld [vmem:[%s653_s1 + $0x60] sm:$0xff]  ;;  %v60_v19 = vld [vmem:[%s653_s1 + $0x68] sm:$0xff] }
   0xd   :  { %88 = vmatpush.msra.mxu0 %v71_v6  ;;  %v57_v20 = vld [vmem:[%s653_s1 + $0x50] sm:$0xff]  ;;  %v58_v21 = vld [vmem:[%s653_s1 + $0x58] sm:$0xff]  ;;  %v55_v22 = vld [vmem:[%s653_s1 + $0x40] sm:$0xff] }
   0xe   :  { %117 = vmatpush.msra.mxu1 %v72_v7  ;;  %v56_v23 = vld [vmem:[%s653_s1 + $0x48] sm:$0xff]  ;;  %v53_v24 = vld [vmem:[%s653_s1 + $0x30] sm:$0xff]  ;;  %v54_v25 = vld [vmem:[%s653_s1 + $0x38] sm:$0xff] }
   0xf   :  { %89 = vmatpush.msra.mxu0 %v69_v8  ;;  %v51_v26 = vld [vmem:[%s653_s1 + $0x20] sm:$0xff]  ;;  %v52_v27 = vld [vmem:[%s653_s1 + $0x28] sm:$0xff]  ;;  %v166_v28 = vld [vmem:[#allocation2 + $0x78] sm:$0xff] }
  0x10   :  { %118 = vmatpush.msra.mxu1 %v70_v9  ;;  %v182_v29 = vld [vmem:[#allocation2 + $0xf8] sm:$0xff]  ;;  %v165_v30 = vld [vmem:[#allocation2 + $0x70] sm:$0xff]  ;;  %187 = vmatpush.msra.mxu2 %v166_v28  ;;  %v164_v34 = vld [vmem:[#allocation2 + $0x68] sm:$0xff] }
  0x11   :  { %90 = vmatpush.msra.mxu0 %v67_v10  ;;  %v181_v31 = vld [vmem:[#allocation2 + $0xf0] sm:$0xff]  ;;  %v50_v33 = vld [vmem:[%s653_s1 + $0x18] sm:$0xff]  ;;  %216 = vmatpush.msra.mxu3 %v182_v29  ;;  %v180_v35 = vld [vmem:[#allocation2 + $0xe8] sm:$0xff] }
  0x12   :  { %119 = vmatpush.msra.mxu1 %v68_v11  ;;  %v49_v32 = vld [vmem:[%s653_s1 + $0x10] sm:$0xff]  ;;  %v47_v36 = vld [vmem:[%s653_s1] sm:$0xff]  ;;  %v48_v37 = vld [vmem:[%s653_s1 + $0x8] sm:$0xff]  ;;  %188 = vmatpush.msra.mxu2 %v165_v30 }
  0x13   :  { %91 = vmatpush.msra.mxu0 %v65_v12  ;;  %217 = vmatpush.msra.mxu3 %v181_v31  ;;  %v595_v38 = vld [vmem:[%s652_s0] sm:$0xff]  ;;  %v162_v41 = vld [vmem:[#allocation2 + $0x58] sm:$0xff]  ;;  %v161_v43 = vld [vmem:[#allocation2 + $0x50] sm:$0xff] }
  0x14   :  { %120 = vmatpush.msra.mxu1 %v66_v13  ;;  %189 = vmatpush.msra.mxu2 %v164_v34  ;;  %v163_v39 = vld [vmem:[#allocation2 + $0x60] sm:$0xff]  ;;  %v178_v42 = vld [vmem:[#allocation2 + $0xd8] sm:$0xff]  ;;  %v177_v44 = vld [vmem:[#allocation2 + $0xd0] sm:$0xff] }
  0x15   :  { %92 = vmatpush.msra.mxu0 %v63_v14  ;;  %218 = vmatpush.msra.mxu3 %v180_v35  ;;  %v179_v40 = vld [vmem:[#allocation2 + $0xe0] sm:$0xff]  ;;  %v160_v45 = vld [vmem:[#allocation2 + $0x48] sm:$0xff]  ;;  %v158_v50 = vld [vmem:[#allocation2 + $0x38] sm:$0xff] }
  0x16   :  { %121 = vmatpush.msra.mxu1 %v64_v15  ;;  %190 = vmatpush.msra.mxu2 %v163_v39  ;;  %v176_v46 = vld [vmem:[#allocation2 + $0xc8] sm:$0xff]  ;;  %v159_v48 = vld [vmem:[#allocation2 + $0x40] sm:$0xff]  ;;  %v174_v51 = vld [vmem:[#allocation2 + $0xb8] sm:$0xff] }
  0x17   :  { %93 = vmatpush.msra.mxu0 %v61_v16  ;;  %219 = vmatpush.msra.mxu3 %v179_v40  ;;  %v602_v47 = vld [vmem:[%s652_s0 + $0x8] sm:$0xff]  ;;  %v175_v49 = vld [vmem:[#allocation2 + $0xc0] sm:$0xff]  ;;  %v157_v52 = vld [vmem:[#allocation2 + $0x30] sm:$0xff] }
  0x18   :  { %122 = vmatpush.msra.mxu1 %v62_v17  ;;  %191 = vmatpush.msra.mxu2 %v162_v41  ;;  %v173_v53 = vld [vmem:[#allocation2 + $0xb0] sm:$0xff]  ;;  %v156_v54 = vld [vmem:[#allocation2 + $0x28] sm:$0xff]  ;;  %v155_v57 = vld [vmem:[#allocation2 + $0x20] sm:$0xff] }
  0x19   :  { %94 = vmatpush.msra.mxu0 %v59_v18  ;;  %220 = vmatpush.msra.mxu3 %v178_v42  ;;  %v172_v55 = vld [vmem:[#allocation2 + $0xa8] sm:$0xff]  ;;  %v609_v56 = vld [vmem:[%s652_s0 + $0x10] sm:$0xff]  ;;  %v171_v58 = vld [vmem:[#allocation2 + $0xa0] sm:$0xff] }
  0x1a   :  { %123 = vmatpush.msra.mxu1 %v60_v19  ;;  %192 = vmatpush.msra.mxu2 %v161_v43  ;;  %v154_v59 = vld [vmem:[#allocation2 + $0x18] sm:$0xff]  ;;  %v153_v61 = vld [vmem:[#allocation2 + $0x10] sm:$0xff]  ;;  %v152_v63 = vld [vmem:[#allocation2 + $0x8] sm:$0xff] }
  0x1b   :  { %95 = vmatpush.msra.mxu0 %v57_v20  ;;  %221 = vmatpush.msra.mxu3 %v177_v44  ;;  %v616_v60 = vld [vmem:[%s652_s0 + $0x18] sm:$0xff]  ;;  %v169_v0 = vld [vmem:[#allocation2 + $0x90] sm:$0xff]  ;;  %v151_v1 = vld [vmem:[#allocation2] sm:$0xff] }
  0x1c   :  { %124 = vmatpush.msra.mxu1 %v58_v21  ;;  %193 = vmatpush.msra.mxu2 %v160_v45  ;;  %v170_v62 = vld [vmem:[#allocation2 + $0x98] sm:$0xff]  ;;  %v168_v2 = vld [vmem:[#allocation2 + $0x88] sm:$0xff]  ;;  %v167_v3 = vld [vmem:[#allocation2 + $0x80] sm:$0xff] }
  0x1d   :  { %96 = vmatpush.msra.mxu0 %v55_v22  ;;  %222 = vmatpush.msra.mxu3 %v176_v46  ;;  %v79_v4 = vld [vmem:[%s654_s2] sm:$0x3] }
  0x1e   :  { %125 = vmatpush.msra.mxu1 %v56_v23  ;;  %194 = vmatpush.msra.mxu2 %v159_v48  ;;  %v81_v5 = vperm.slane %v79_v4, 0  ;;  %v82_v6 = vperm.slane %v79_v4, 1  ;;  %v380_v31 = vld [vmem:[%s656_s4] ss:$0 sm:$0xff] }
  0x1f   :  { %97 = vmatpush.msra.mxu0 %v53_v24  ;;  %223 = vmatpush.msra.mxu3 %v175_v49 }
  0x20   :  { %126 = vmatpush.msra.mxu1 %v54_v25  ;;  %195 = vmatpush.msra.mxu2 %v158_v50 }
  0x21   :  { %98 = vmatpush.msra.mxu0 %v51_v26  ;;  %224 = vmatpush.msra.mxu3 %v174_v51 }
  0x22   :  { %127 = vmatpush.msra.mxu1 %v52_v27  ;;  %196 = vmatpush.msra.mxu2 %v157_v52 }
  0x23   :  { %99 = vmatpush.msra.mxu0 %v49_v32  ;;  %225 = vmatpush.msra.mxu3 %v173_v53  ;;  %v448_v53 = vmov 128.0  }
  0x24   :  { %128 = vmatpush.msra.mxu1 %v50_v33  ;;  %197 = vmatpush.msra.mxu2 %v156_v54  ;;  %383 = vrcp.f32 %v448_v53 }
  0x25   :  { %100 = vmatpush.msra.mxu0 %v47_v36  ;;  %226 = vmatpush.msra.mxu3 %v172_v55 }
  0x26   :  { %129 = vmatpush.msra.mxu1 %v48_v37  ;;  %101 = vmatmul.f32.vlgmr.msra.gmra.mxu0 %v595_v38 }
  0x27   :  { %130 = vmatmul.f32.vlgmr.msra.gmra.mxu1 %v595_v38  ;;  %198 = vmatpush.msra.mxu2 %v155_v57 }
  0x28   :  { %227 = vmatpush.msra.mxu3 %v171_v58 }
  0x29   :  { %199 = vmatpush.msra.mxu2 %v154_v59 }
  0x2a   :  { %228 = vmatpush.msra.mxu3 %v170_v62  ;;  %v384_v54 = vpop.eup %383 }
  0x2b   :  { %200 = vmatpush.msra.mxu2 %v153_v61  ;;  %v258_v55 = vmul.f32 128.0, %v384_v54  ;;  %vm262_vm0 = vweird.f32 %v384_v54 }
  0x2c   :  { %229 = vmatpush.msra.mxu3 %v169_v0 }
  0x2d   :  { %201 = vmatpush.msra.mxu2 %v152_v63 }
  0x2e   :  { %104 = vmatmul.f32.gmra.mxu0 %v602_v47  ;;  %230 = vmatpush.msra.mxu3 %v168_v2 }
  0x2f   :  { %133 = vmatmul.f32.gmra.mxu1 %v602_v47  ;;  %202 = vmatpush.msra.mxu2 %v151_v1 }
  0x30   :  { %231 = vmatpush.msra.mxu3 %v167_v3 }
  0x36   :  { %107 = vmatmul.f32.gmra.mxu0 %v609_v56 }
  0x37   :  { %136 = vmatmul.f32.gmra.mxu1 %v609_v56 }
  0x3e   :  { %110 = vmatmul.f32.gmra.mxu0 %v616_v60 }
  0x3f   :  { %139 = vmatmul.f32.gmra.mxu1 %v616_v60 }
  0xa3   :  { %v102_v7 = vpop.f32.mrf.mxu0 }
  0xa4   :  { %v131_v8 = vpop.f32.mrf.mxu1  ;;  %v103_v9 = vadd.f32 %v102_v7, %v81_v5 }
  0xa5   :  { %v132_v10 = vadd.f32 %v131_v8, %v82_v6 }
  0xa6   :  { %v143_v11 = vmax.f32 %v103_v9, 0.0 }
  0xa7   :  { %v144_v12 = vmax.f32 %v132_v10, 0.0 }
  0xa8   :  { %203 = vmatmul.f32.vlgmr.msra.gmra.mxu2 %v143_v11 }
  0xa9   :  { %232 = vmatmul.f32.vlgmr.msra.gmra.mxu3 %v144_v12 }
  0xab   :  { %v105_v13 = vpop.f32.mrf.mxu0 }
  0xac   :  { %v134_v14 = vpop.f32.mrf.mxu1  ;;  %v106_v15 = vadd.f32 %v105_v13, %v81_v5 }
  0xad   :  { %v135_v16 = vadd.f32 %v134_v14, %v82_v6 }
  0xae   :  { %v145_v17 = vmax.f32 %v106_v15, 0.0 }
  0xaf   :  { %v146_v18 = vmax.f32 %v135_v16, 0.0 }
  0xb0   :  { %206 = vmatmul.f32.gmra.mxu2 %v145_v17 }
  0xb1   :  { %235 = vmatmul.f32.gmra.mxu3 %v146_v18 }
  0xb3   :  { %v108_v19 = vpop.f32.mrf.mxu0 }
  0xb4   :  { %v137_v20 = vpop.f32.mrf.mxu1  ;;  %v109_v21 = vadd.f32 %v108_v19, %v81_v5 }
  0xb5   :  { %v138_v22 = vadd.f32 %v137_v20, %v82_v6 }
  0xb6   :  { %v147_v23 = vmax.f32 %v109_v21, 0.0 }
  0xb7   :  { %v148_v24 = vmax.f32 %v138_v22, 0.0 }
  0xb8   :  { %209 = vmatmul.f32.gmra.mxu2 %v147_v23 }
  0xb9   :  { %238 = vmatmul.f32.gmra.mxu3 %v148_v24 }
  0xbb   :  { %v111_v25 = vpop.f32.mrf.mxu0 }
  0xbc   :  { %v140_v26 = vpop.f32.mrf.mxu1  ;;  %v112_v27 = vadd.f32 %v111_v25, %v81_v5 }
  0xbd   :  { %v141_v28 = vadd.f32 %v140_v26, %v82_v6 }
  0xbe   :  { %v149_v29 = vmax.f32 %v112_v27, 0.0 }
  0xbf   :  { %v150_v30 = vmax.f32 %v141_v28, 0.0  ;;  %v381_v28 = vld [vmem:[%s657_s5] ss:$0 sm:$0xff]  ;;  %s449_s5 = smov [#allocation5]  }
  0xc0   :  { %212 = vmatmul.f32.gmra.mxu2 %v149_v29 }
  0xc1   :  { %241 = vmatmul.f32.gmra.mxu3 %v150_v30 }
 0x12b   :  { %v204_v32 = vpop.f32.mrf.mxu2 }
 0x12c   :  { %v233_v33 = vpop.f32.mrf.mxu3  ;;  %v205_v34 = vadd.f32 %v380_v31, %v204_v32  ;;  %v382_v32 = vld [vmem:[%s658_s6] ss:$0 sm:$0xff]  ;;  %s360_s6 = sshll.u32 %s449_s5, 4  ;;  %s361_s6 = int_to_ptr.vmem [resolvable:$true] %s360_s6 }
 0x12e   :  { %v234_v35 = vadd.f32 %v233_v33, %v205_v34 }
 0x130   :  { %v245_v36 = vadd.f32 %v234_v35, %v595_v38 }
 0x132   :  { %249 = vadd.xlane.f32.xlu0 %v245_v36 }
 0x133   :  { %v207_v37 = vpop.f32.mrf.mxu2 }
 0x134   :  { %v236_v39 = vpop.f32.mrf.mxu3  ;;  %v208_v40 = vadd.f32 %v380_v31, %v207_v37 }
 0x136   :  { %v237_v41 = vadd.f32 %v236_v39, %v208_v40 }
 0x138   :  { %v246_v42 = vadd.f32 %v237_v41, %v602_v47  ;;  %v259_v47 = vsub.f32 1.0, %v258_v55 }
 0x13a   :  { %251 = vadd.xlane.f32.xlu0 %v246_v42  ;;  %v260_v57 = vmul.f32 %v384_v54, %v259_v47 }
 0x13b   :  { %v210_v43 = vpop.f32.mrf.mxu2 }
 0x13c   :  { %v239_v44 = vpop.f32.mrf.mxu3  ;;  %v211_v45 = vadd.f32 %v380_v31, %v210_v43  ;;  %v261_v58 = vadd.f32 %v384_v54, %v260_v57 }
 0x13e   :  { %v240_v46 = vadd.f32 %v239_v44, %v211_v45  ;;  %v263_v59 = vsel %vm262_vm0, %v384_v54, %v261_v58 }
 0x140   :  { %v247_v48 = vadd.f32 %v240_v46, %v609_v56 }
 0x142   :  { %253 = vadd.xlane.f32.xlu1 %v247_v48 }
 0x143   :  { %v213_v49 = vpop.f32.mrf.mxu2 }
 0x144   :  { %v242_v50 = vpop.f32.mrf.mxu3  ;;  %v214_v51 = vadd.f32 %v380_v31, %v213_v49 }
 0x146   :  { %v243_v52 = vadd.f32 %v242_v50, %v214_v51 }
 0x148   :  { %v248_v38 = vadd.f32 %v243_v52, %v616_v60 }
 0x14a   :  { %255 = vadd.xlane.f32.xlu1 %v248_v38 }
 0x1a5   :  { %v250_v61 = vpop.xlane.xlu0 %249 }
 0x1a6   :  { %v264_v62 = vmul.f32 %v263_v59, %v250_v61 }
 0x1a8   :  { %v268_v56 = vsub.f32 %v245_v36, %v264_v62 }
 0x1aa   :  { %v272_v63 = vmul.f32 %v268_v56, %v268_v56 }
 0x1ac   :  { %276 = vadd.xlane.f32.xlu2 %v272_v63 }
 0x1ad   :  { %v252_v0 = vpop.xlane.xlu0 %251 }
 0x1ae   :  { %v265_v1 = vmul.f32 %v263_v59, %v252_v0 }
 0x1b0   :  { %v269_v2 = vsub.f32 %v246_v42, %v265_v1 }
 0x1b2   :  { %v273_v3 = vmul.f32 %v269_v2, %v269_v2 }
 0x1b4   :  { %278 = vadd.xlane.f32.xlu2 %v273_v3 }
 0x1b5   :  { %v254_v60 = vpop.xlane.xlu1 %253 }
 0x1b6   :  { %v266_v4 = vmul.f32 %v263_v59, %v254_v60 }
 0x1b8   :  { %v630_v5 = vsub.f32 %v247_v48, %v266_v4 }
 0x1ba   :  { %v274_v6 = vmul.f32 %v630_v5, %v630_v5 }
 0x1bc   :  { %280 = vadd.xlane.f32.xlu0 %v274_v6 }
 0x1bd   :  { %v256_v7 = vpop.xlane.xlu1 %255 }
 0x1be   :  { %v267_v8 = vmul.f32 %v263_v59, %v256_v7 }
 0x1c0   :  { %v634_v9 = vsub.f32 %v248_v38, %v267_v8 }
 0x1c2   :  { %v275_v10 = vmul.f32 %v634_v9, %v634_v9 }
 0x1c4   :  { %282 = vadd.xlane.f32.xlu1 %v275_v10 }
 0x21f   :  { %v277_v11 = vpop.xlane.xlu2 %276 }
 0x220   :  { %v284_v12 = vmul.f32 %v277_v11, %v263_v59 }
 0x222   :  { %v288_v13 = vadd.f32 1e-05, %v284_v12 }
 0x224   :  { %385 = vrsqrt.f32 %v288_v13  ;;  %vm298_vm2 = vweird.f32 %v288_v13 }
 0x227   :  { %v279_v14 = vpop.xlane.xlu2 %278 }
 0x228   :  { %v285_v15 = vmul.f32 %v279_v14, %v263_v59 }
 0x22a   :  { %v386_v16 = vpop.eup %385  ;;  %v289_v17 = vadd.f32 1e-05, %v285_v15 }
 0x22b   :  { %v293_v18 = vmul.f32 %v386_v16, %v288_v13  ;;  %vm299_vm1 = vweird.f32 %v386_v16 }
 0x22c   :  { %387 = vrsqrt.f32 %v289_v17  ;;  %vm300_vm3 = vmor %vm298_vm2, %vm299_vm1  ;;  %vm308_vm5 = vweird.f32 %v289_v17 }
 0x22d   :  { %v294_v19 = vmul.f32 %v386_v16, %v293_v18 }
 0x22f   :  { %v295_v20 = vmul.f32 0.5, %v294_v19  ;;  %v281_v21 = vpop.xlane.xlu0 %280 }
 0x230   :  { %v286_v22 = vmul.f32 %v281_v21, %v263_v59 }
 0x231   :  { %v296_v23 = vsub.f32 1.5, %v295_v20 }
 0x232   :  { %v388_v24 = vpop.eup %387  ;;  %v290_v25 = vadd.f32 1e-05, %v286_v22 }
 0x233   :  { %v297_v26 = vmul.f32 %v386_v16, %v296_v23  ;;  %v303_v27 = vmul.f32 %v388_v24, %v289_v17  ;;  %vm309_vm4 = vweird.f32 %v388_v24 }
 0x234   :  { %389 = vrsqrt.f32 %v290_v25  ;;  %vm310_vm6 = vmor %vm308_vm5, %vm309_vm4  ;;  %vm318_vm8 = vweird.f32 %v290_v25 }
 0x235   :  { %v301_v29 = vsel %vm300_vm3, %v386_v16, %v297_v26  ;;  %v304_v30 = vmul.f32 %v388_v24, %v303_v27 }
 0x236   :  { %v332_v31 = vmul.f32 %v301_v29, %v268_v56 }
 0x237   :  { %v305_v33 = vmul.f32 0.5, %v304_v30  ;;  %v283_v34 = vpop.xlane.xlu1 %282 }
 0x238   :  { %v340_v35 = vmul.f32 %v381_v28, %v332_v31  ;;  %v287_v36 = vmul.f32 %v283_v34, %v263_v59 }
 0x239   :  { %v306_v37 = vsub.f32 1.5, %v305_v33 }
 0x23a   :  { %v390_v39 = vpop.eup %389  ;;  %v291_v40 = vadd.f32 1e-05, %v287_v36  ;;  %v348_v41 = vadd.f32 %v382_v32, %v340_v35 }
 0x23b   :  { %v307_v42 = vmul.f32 %v388_v24, %v306_v37  ;;  %v313_v43 = vmul.f32 %v390_v39, %v290_v25  ;;  %vm319_vm7 = vweird.f32 %v390_v39 }
 0x23c   :  { %391 = vrsqrt.f32 %v291_v40  ;;  %352 = vst [vmem:[#allocation5] sm:$0xff] %v348_v41  ;;  %vm320_vm9 = vmor %vm318_vm8, %vm319_vm7  ;;  %vm328_vm11 = vweird.f32 %v291_v40 }
 0x23d   :  { %v311_v44 = vsel %vm310_vm6, %v388_v24, %v307_v42  ;;  %v314_v45 = vmul.f32 %v390_v39, %v313_v43 }
 0x23e   :  { %v333_v46 = vmul.f32 %v311_v44, %v269_v2 }
 0x23f   :  { %v315_v48 = vmul.f32 0.5, %v314_v45 }
 0x240   :  { %v341_v49 = vmul.f32 %v381_v28, %v333_v46 }
 0x241   :  { %v316_v50 = vsub.f32 1.5, %v315_v48 }
 0x242   :  { %v392_v51 = vpop.eup %391  ;;  %v349_v52 = vadd.f32 %v382_v32, %v341_v49 }
 0x243   :  { %v317_v38 = vmul.f32 %v390_v39, %v316_v50  ;;  %v323_v53 = vmul.f32 %v392_v51, %v291_v40  ;;  %vm329_vm10 = vweird.f32 %v392_v51 }
 0x244   :  { %353 = vst [vmem:[#allocation5 + $0x8] sm:$0xff] %v349_v52  ;;  %vm330_vm12 = vmor %vm328_vm11, %vm329_vm10 }
 0x245   :  { %v321_v54 = vsel %vm320_vm9, %v390_v39, %v317_v38  ;;  %v324_v55 = vmul.f32 %v392_v51, %v323_v53 }
 0x246   :  { %v334_v47 = vmul.f32 %v321_v54, %v630_v5 }
 0x247   :  { %v325_v57 = vmul.f32 0.5, %v324_v55 }
 0x248   :  { %v342_v58 = vmul.f32 %v381_v28, %v334_v47 }
 0x249   :  { %v326_v59 = vsub.f32 1.5, %v325_v57 }
 0x24a   :  { %v350_v61 = vadd.f32 %v382_v32, %v342_v58 }
 0x24b   :  { %v327_v62 = vmul.f32 %v392_v51, %v326_v59 }
 0x24c   :  { %354 = vst [vmem:[#allocation5 + $0x10] sm:$0xff] %v350_v61 }
 0x24d   :  { %v331_v56 = vsel %vm330_vm12, %v392_v51, %v327_v62 }
 0x24e   :  { %v335_v63 = vmul.f32 %v331_v56, %v634_v9 }
 0x250   :  { %v343_v0 = vmul.f32 %v381_v28, %v335_v63 }
 0x252   :  { %v351_v1 = vadd.f32 %v382_v32, %v343_v0 }
 0x254   :  { %355 = vst [vmem:[#allocation5 + $0x18] sm:$0xff] %v351_v1 }
 0x255   :  { %368 = dma.vmem_to_hbm [thread:$0]  %s361_s6, 512, %s363_s19, [#allocation4], %s446_s29, %s446_s29, %s447_s30  }
 0x256   :  { %443 = dma.done.wait [#allocation4], 512  }
 0x257   :  { %444 = vsyncadd [#allocation4], 4294966784 }
 0x258   :  { %373 = vsyncpa [#allocation3], 1 }
 0x259   :  { %374 = vsyncpa [#allocation4], 1 }

// kernel: decoder_layer.5
= control target key start
LH: loop header
LB: loop body
LE: loop exit
PB: predicated region body
PF: predicated region fallthrough
CT: control target
= control target key end

     0   :  { %8 = vsyncpa [#allocation3], 0  ;;  %s2070_s0 = inlined_call_operand.hbm [shape: f32[2,16,128], index: 0, kind: input, shape index: {}]   ;;  %s2071_s1 = inlined_call_operand.hbm [shape: f32[128,384], index: 1, kind: input, shape index: {}]   ;;  %s2072_s2 = inlined_call_operand.vmem [shape: f32[1,384], index: 2, kind: input, shape index: {}]   ;;  %s2073_s3 = inlined_call_operand.vmem [shape: f32[2,8,16,16], index: 3, kind: output, shape index: {}]  }
   0x1   :  { %10 = vsyncpa [#allocation3 + $0x1], 0 }
   0x2   :  { %11 = vsyncpa [#allocation5], 0  ;;  %s1613_s12 = smov 0   ;;  %s1615_s13 = smov 0  }
   0x3   :  { %s1617_s14 = smov 0   ;;  %s1619_s15 = smov 0  }
   0x4 LB: > { %s1632_s16 = sadd.s32 4294967295, %s1578_s15   ;;  %p37_p0 = scmp.ne.s32.totalorder %s1570_s13, %s1566_s12  ;;  %s1578_s15 = sphi %s1619_s15, %s2080_s15   ;;  %s1574_s14 = sphi %s1617_s14, %s2079_s14   ;;  %s1570_s13 = sphi %s1615_s13, %s2078_s13   ;;  %s1566_s12 = sphi %s1613_s12, %s2077_s12  }
   0x5   : > { %p38_p1 = scmp.eq.s32.totalorder %s1632_s16, 0  ;;  %p1240_p2 = scmp.ge.s32.totalorder %s1578_s15, 1 }
   0x6   : > { %p116_p3 = scmp.lt.s32.totalorder %s1578_s15, 3  ;;  %s127_s20 = sshll.u32 %s2071_s1, 4  ;;  %s128_s20 = int_to_ptr.hbm [resolvable:$true] %s127_s20 }
   0x7   : > { %p1640_p4 = por %p38_p1, %p37_p0  ;;  %s1580_s22 = smov [#allocation4]  }
   0x8   : > { %p1647_p5 = pnand %p1240_p2, %p116_p3  ;;  %s129_s23 = sshll.u32 %s1580_s22, 4  ;;  %s130_s23 = int_to_ptr.vmem [resolvable:$true] %s129_s23 }
   0x9   : > { %s1656_s24 = sadd.s32 1, %s1578_s15   ;;  %s1581_s25 = smov 384  }
   0xa   : > { %p1325_p6 = pneg %p1647_p5  ;;  %s1582_s26 = smov 24  }
   0xb   : > { %s21_s27 = ssub.s32 %s1578_s15, %s1656_s24  ;;  %s24_s28 = sadd.s32 1, %s1574_s14 }
   0xc   : > { %p1326_p7 = pnand %p1325_p6, %p38_p1  ;;  %p22_p8 = scmp.eq.s32.totalorder %s21_s27, 0 }
   0xd   : > { %p31_p9 = scmp.ne.s32.totalorder %s1574_s14, %s1570_s13  ;;  %p32_p10 = scmp.eq.s32.totalorder %s1578_s15, 0 }
   0xe   : > { %1328 = dma.hbm_to_vmem [thread:$0]  (!%p1326_p7), %s128_s20, 6144, %s130_s23, [#allocation5], %s1581_s25, %s1581_s25, %s1582_s26  }
   0xf   : > { %p1334_p11 = scmp.lt.s32.totalorder %s1578_s15, 2  ;;  %p33_p12 = por %p32_p10, %p31_p9 }
  0x10   : > { %s1666_s29 = scalar_select %p22_p8, %s1574_s14, %s24_s28  }
  0x11   : > { %s146_s30 = sand.u32 1, %s1574_s14   ;;  %s1315_s5 = sshll.u32 %s1578_s15, 4 }
  0x12   : > { %s1243_s4 = sshll.u32 %s146_s30, 4  ;;  %s155_s8 = scalar_lea.hbm %s2070_s0, %s1315_s5 }
  0x13   : > { %s150_s9 = scalar_lea.vmem [#allocation2], %s1243_s4  ;;  %s156_s11 = sshll.u32 %s155_s8, 4  ;;  %s157_s11 = int_to_ptr.hbm [resolvable:$true] %s156_s11 }
  0x14   : > { %s158_s10 = sshll.u32 %s150_s9, 4  ;;  %p1673_p13 = pnand %p1334_p11, %p33_p12  ;;  %s159_s10 = int_to_ptr.vmem [resolvable:$true] %s158_s10 }
  0x15   : > { %s147_s18 = scalar_lea.sflag [#allocation3], %s146_s30  ;;  %s1510_s19 = sshra.s32 %s157_s11, 4  ;;  %s1511_s19 = int_to_ptr.hbm [resolvable:$true] %s1510_s19 }
  0x16   : > { %s1512_s20 = scalar_lea.hbm %s1511_s19, 16  ;;  %p1514_p2 = pneg %p1673_p13 }
  0x17   : > { %p1513_p0 = scmp.ne.s32.totalorder %s1511_s19, %s1512_s20  ;;  %s1517_s23 = scalar_lea.hbm %s2070_s0, 32 }
  0x18   : > { %p1518_p7 = scmp.lt.s32.totalorder %s1511_s19, %s2070_s0  ;;  %p1519_p8 = scmp.lt.s32.totalorder %s1517_s23, %s1512_s20 }
  0x19   : > { %p1515_p3 = pnand %p1514_p2, %p1513_p0 }
  0x1a   : > { %p1520_p9 = por %p1519_p8, %p1518_p7 }
  0x1b   : > { %p1516_p6 = pneg %p1515_p3 }
  0x1d   : > { %p1521_p10 = pnand %p1520_p9, %p1516_p6 }
  0x1f   : > { %1524 = shalt.err (!%p1521_p10)
}
  0x20   : > { %s1583_s27 = smov 128   ;;  %s1584_s28 = smov 8  }
  0x21   : > { %1332 = dma.hbm_to_vmem [thread:$0]  (!%p1673_p13), %s157_s11, 256, %s159_s10, %s147_s18, %s1583_s27, %s1583_s27, %s1584_s28  }
  0x22   : > { %170 = sbr.rel (%p1647_p5) target bundleno = 1745 (0x6d1), region = 32  ;;  %s172_s30 = sand.u32 (!%p1647_p5), 1, %s1570_s13  }
  0x23   : > { %s1690_s4 = sshll.u32 (!%p1647_p5), %s172_s30, 4  ;;  %s173_s5 = scalar_lea.sflag (!%p1647_p5), [#allocation3], %s172_s30 }
  0x24   : > { %s176_s6 = scalar_lea.vmem (!%p1647_p5), [#allocation2], %s1690_s4 }
  0x27   : > { %1557 = dma.done.wait (%p1640_p4), %s173_s5, 256  }
  0x28   : > { %1559 = vsyncadd (%p1640_p4), %s173_s5, 4294967040 }
  0x29   : > { %1561 = dma.done.wait (%p38_p1), [#allocation5], 6144  }
  0x2a   : > { %1563 = vsyncadd (%p38_p1), [#allocation5], 4294961152  ;;  %v257_v0 = vld [vmem:[#allocation4 + $0x168] sm:$0xff]  ;;  %v254_v1 = vld [vmem:[#allocation4 + $0x150] sm:$0xff]  ;;  %s1585_s7 = smov 112   ;;  %s1586_s8 = smov 96   ;;  %v337_v37 = vlaneseq }
  0x2b   : > { %268 = vmatpush.msra.mxu0 %v257_v0  ;;  %v251_v2 = vld [vmem:[#allocation4 + $0x138] sm:$0xff]  ;;  %v248_v3 = vld [vmem:[#allocation4 + $0x120] sm:$0xff]  ;;  %v245_v4 = vld [vmem:[#allocation4 + $0x108] sm:$0xff]  ;;  %vm352_vm0 = vcmask 130048   ;;  %v1587_v46 = vmov 0.0   ;;  %s1588_s9 = smov 64  }
  0x2c   : > { %v242_v5 = vld [vmem:[#allocation4 + $0xf0] sm:$0xff]  ;;  %v239_v6 = vld [vmem:[#allocation4 + $0xd8] sm:$0xff]  ;;  %v236_v7 = vld [vmem:[#allocation4 + $0xc0] sm:$0xff]  ;;  %v338_v40 = vshrl.u32 %v337_v37, 7  ;;  %v341_v41 = vand.u32 127, %v337_v37  ;;  %s1589_s10 = smov 80  }
  0x2d   : > { %269 = vmatpush.msra.mxu0 %v254_v1  ;;  %v233_v8 = vld [vmem:[#allocation4 + $0xa8] sm:$0xff]  ;;  %v230_v9 = vld [vmem:[#allocation4 + $0x90] sm:$0xff]  ;;  %v227_v10 = vld [vmem:[#allocation4 + $0x78] sm:$0xff]  ;;  %s1590_s11 = smov 48   ;;  %s1591_s12 = smov 16  }
  0x2e   : > { %v224_v11 = vld [vmem:[#allocation4 + $0x60] sm:$0xff]  ;;  %v221_v12 = vld [vmem:[#allocation4 + $0x48] sm:$0xff]  ;;  %v218_v13 = vld [vmem:[#allocation4 + $0x30] sm:$0xff]  ;;  %vm342_vm1 = vcmp.gt.s32.totalorder %v341_v41, %v338_v40  ;;  %v339_v50 = vadd.s32 8, %v338_v40  ;;  %s1592_s18 = smov 32   ;;  %p205_p1 = scmp.lt.s32.totalorder %s1632_s16, 1 }
  0x2f   : > { %270 = vmatpush.msra.mxu0 %v251_v2  ;;  %v215_v14 = vld [vmem:[#allocation4 + $0x18] sm:$0xff]  ;;  %v212_v15 = vld [vmem:[#allocation4] sm:$0xff]  ;;  %v258_v30 = vld [vmem:[#allocation4 + $0x170] sm:$0xff]  ;;  %v1737_v47 = vsel %vm342_vm1, -1e+09, %v1587_v46 }
  0x30   : > { %v1703_v16 = vld [vmem:[%s176_s6] sm:$0xff]  ;;  %v1708_v17 = vld [vmem:[%s176_s6 + $0x8] sm:$0xff]  ;;  %291 = vmatpush.msra.mxu1 %v258_v30  ;;  %vm343_vm2 = vcmp.gt.s32.totalorder %v341_v41, %v339_v50  ;;  %s2082_s16 = smov (!%p205_p1, %s1632_s16), 1 }
  0x31   : > { %271 = vmatpush.msra.mxu0 %v248_v3  ;;  %v1714_v19 = vld [vmem:[%s2072_s2] sm:$0x7]  ;;  %v255_v31 = vld [vmem:[#allocation4 + $0x158] sm:$0xff]  ;;  %v249_v33 = vld [vmem:[#allocation4 + $0x128] sm:$0xff]  ;;  %v1741_v57 = vsel %vm343_vm2, -1e+09, %v1587_v46 }
  0x32   : > { %v262_v20 = vperm.slane %v1714_v19, 0  ;;  %292 = vmatpush.msra.mxu1 %v255_v31  ;;  %v252_v32 = vld [vmem:[#allocation4 + $0x140] sm:$0xff]  ;;  %v246_v34 = vld [vmem:[#allocation4 + $0x110] sm:$0xff]  ;;  %v243_v35 = vld [vmem:[#allocation4 + $0xf8] sm:$0xff]  ;;  %s1316_s19 = sshll.u32 %s2082_s16, 7 }
  0x33   : > { %272 = vmatpush.msra.mxu0 %v245_v4  ;;  %v240_v36 = vld [vmem:[#allocation4 + $0xe0] sm:$0xff]  ;;  %v237_v38 = vld [vmem:[#allocation4 + $0xc8] sm:$0xff]  ;;  %v234_v39 = vld [vmem:[#allocation4 + $0xb0] sm:$0xff]  ;;  %s1801_s22 = scalar_lea.vmem %s2073_s3, %s1316_s19 }
  0x34   : > { %293 = vmatpush.msra.mxu1 %v252_v32  ;;  %v231_v42 = vld [vmem:[#allocation4 + $0x98] sm:$0xff]  ;;  %v228_v43 = vld [vmem:[#allocation4 + $0x80] sm:$0xff]  ;;  %v225_v44 = vld [vmem:[#allocation4 + $0x68] sm:$0xff] }
  0x35   : > { %273 = vmatpush.msra.mxu0 %v242_v5  ;;  %v222_v48 = vld [vmem:[#allocation4 + $0x50] sm:$0xff]  ;;  %v219_v51 = vld [vmem:[#allocation4 + $0x38] sm:$0xff]  ;;  %v216_v53 = vld [vmem:[#allocation4 + $0x20] sm:$0xff]  ;;  %v263_v5 = vperm.slane %v1714_v19, 1 }
  0x36   : > { %294 = vmatpush.msra.mxu1 %v249_v33  ;;  %v213_v55 = vld [vmem:[#allocation4 + $0x8] sm:$0xff]  ;;  %v250_v33 = vld [vmem:[#allocation4 + $0x130] sm:$0xff]  ;;  %v232_v40 = vld [vmem:[#allocation4 + $0xa0] sm:$0xff] }
  0x37   : > { %274 = vmatpush.msra.mxu0 %v239_v6  ;;  %v253_v30 = vld [vmem:[#allocation4 + $0x148] sm:$0xff]  ;;  %v238_v37 = vld [vmem:[#allocation4 + $0xd0] sm:$0xff] }
  0x38   : > { %295 = vmatpush.msra.mxu1 %v246_v34  ;;  %v247_v34 = vld [vmem:[#allocation4 + $0x118] sm:$0xff]  ;;  %v229_v41 = vld [vmem:[#allocation4 + $0x88] sm:$0xff]  ;;  %v214_v46 = vld [vmem:[#allocation4 + $0x10] sm:$0xff] }
  0x39   : > { %275 = vmatpush.msra.mxu0 %v236_v7 }
  0x3a   : > { %296 = vmatpush.msra.mxu1 %v243_v35  ;;  %v244_v35 = vld [vmem:[#allocation4 + $0x100] sm:$0xff] }
  0x3b   : > { %276 = vmatpush.msra.mxu0 %v233_v8 }
  0x3c   : > { %297 = vmatpush.msra.mxu1 %v240_v36  ;;  %v241_v36 = vld [vmem:[#allocation4 + $0xe8] sm:$0xff] }
  0x3d   : > { %277 = vmatpush.msra.mxu0 %v230_v9 }
  0x3e   : > { %298 = vmatpush.msra.mxu1 %v237_v38 }
  0x3f   : > { %278 = vmatpush.msra.mxu0 %v227_v10 }
  0x40   : > { %299 = vmatpush.msra.mxu1 %v234_v39  ;;  %v235_v39 = vld [vmem:[#allocation4 + $0xb8] sm:$0xff] }
  0x41   : > { %279 = vmatpush.msra.mxu0 %v224_v11 }
  0x42   : > { %300 = vmatpush.msra.mxu1 %v231_v42  ;;  %v226_v42 = vld [vmem:[#allocation4 + $0x70] sm:$0xff] }
  0x43   : > { %280 = vmatpush.msra.mxu0 %v221_v12 }
  0x44   : > { %301 = vmatpush.msra.mxu1 %v228_v43  ;;  %v223_v43 = vld [vmem:[#allocation4 + $0x58] sm:$0xff] }
  0x45   : > { %281 = vmatpush.msra.mxu0 %v218_v13 }
  0x46   : > { %302 = vmatpush.msra.mxu1 %v225_v44  ;;  %v220_v44 = vld [vmem:[#allocation4 + $0x40] sm:$0xff] }
  0x47   : > { %282 = vmatpush.msra.mxu0 %v215_v14 }
  0x48   : > { %303 = vmatpush.msra.mxu1 %v222_v48 }
  0x49   : > { %283 = vmatpush.msra.mxu0 %v212_v15 }
  0x4a   : > { %284 = vmatmul.f32.vlgmr.msra.gmra.mxu0 %v1703_v16  ;;  %304 = vmatpush.msra.mxu1 %v219_v51 }
  0x4c   : > { %305 = vmatpush.msra.mxu1 %v216_v53 }
  0x4e   : > { %306 = vmatpush.msra.mxu1 %v213_v55 }
  0x4f   : > { %307 = vmatmul.f32.vlgmr.msra.gmra.mxu1 %v1703_v16 }
  0x52   : > { %287 = vmatmul.f32.gmra.mxu0 %v1708_v17 }
  0x57   : > { %310 = vmatmul.f32.gmra.mxu1 %v1708_v17 }
  0xc7   : > { %v285_v18 = vpop.f32.mrf.mxu0 }
  0xc8   : > { %v1717_v22 = vadd.f32 %v285_v18, %v262_v20 }
  0xcc   : > { %v308_v6 = vpop.f32.mrf.mxu1 }
  0xcd   : > { %v1753_v7 = vadd.f32 %v308_v6, %v263_v5 }
  0xcf   : > { %v288_v21 = vpop.f32.mrf.mxu0 }
  0xd0   : > { %v1719_v23 = vadd.f32 %v288_v21, %v262_v20 }
  0xd2   : > { %350 = vrot.lane.b32.xlu0 %v1719_v23, %s1585_s7  ;;  %v1725_v24 = vpack.i.bf16 %v1717_v22, %v1719_v23 }
  0xd4   : > { %1382 = vrot.lane.b32.xlu2 %v1725_v24, %s1586_s8  ;;  %v311_v10 = vpop.f32.mrf.mxu1 }
  0xd5   : > { %v1758_v11 = vadd.f32 %v311_v10, %v263_v5 }
  0xda   : > { %348 = vrot.lane.b32.xlu0 %v1717_v22, %s1585_s7 }
 0x12e   : > { %v1383_v26 = vpop.permute.xlu2 %1382 }
 0x12f   : > { %v1384_v28 = vunpack.i.l.bf16 %v1383_v26  ;;  %v1385_v29 = vunpack.i.h.bf16 %v1383_v26  ;;  %v259_v26 = vld [vmem:[#allocation4 + $0x178] sm:$0xff] }
 0x130   : > { %314 = vmatpush.msra.mxu2 %v259_v26 }
 0x144   : > { %v351_v25 = vpop.permute.xlu0 %350 }
 0x145   : > { %1251 = vmatpush.xpose.msk.msra.mxu3 %vm352_vm0, %v351_v25 }
 0x14c   : > { %v349_v27 = vpop.permute.xlu0 %348 }
 0x14d   : > { %1252 = vmatpush.xpose.msk.msra.mxu3 %vm352_vm0, %v349_v27 }
 0x150   : > { %1253 = vmatmul.msk.f32.vlgmr.msra.gmra.mxu3 %vm352_vm0, %v1717_v22 }
 0x151   : > { %436 = vmatpush.msrb.mxu3 %v1384_v28  ;;  %v256_v28 = vld [vmem:[#allocation4 + $0x160] sm:$0xff] }
 0x152   : > { %315 = vmatpush.msra.mxu2 %v256_v28 }
 0x153   : > { %437 = vmatpush.msrb.mxu3 %v1385_v29 }
 0x154   : > { %316 = vmatpush.msra.mxu2 %v253_v30 }
 0x156   : > { %317 = vmatpush.msra.mxu2 %v250_v33 }
 0x158   : > { %1254 = vmatmul.msk.f32.gmra.mxu3 %vm352_vm0, %v1719_v23  ;;  %318 = vmatpush.msra.mxu2 %v247_v34 }
 0x15a   : > { %319 = vmatpush.msra.mxu2 %v244_v35 }
 0x15c   : > { %320 = vmatpush.msra.mxu2 %v241_v36 }
 0x15e   : > { %321 = vmatpush.msra.mxu2 %v238_v37 }
 0x160   : > { %322 = vmatpush.msra.mxu2 %v235_v39 }
 0x162   : > { %323 = vmatpush.msra.mxu2 %v232_v40 }
 0x164   : > { %324 = vmatpush.msra.mxu2 %v229_v41 }
 0x166   : > { %325 = vmatpush.msra.mxu2 %v226_v42 }
 0x168   : > { %326 = vmatpush.msra.mxu2 %v223_v43 }
 0x16a   : > { %327 = vmatpush.msra.mxu2 %v220_v44 }
 0x1d3   : > { %v378_v45 = vpop.f32.mrf.mxu3 }
 0x1d4   : > { %v384_v49 = vmul.f32 0.25, %v378_v45  ;;  %v217_v45 = vld [vmem:[#allocation4 + $0x28] sm:$0xff] }
 0x1d5   : > { %328 = vmatpush.msra.mxu2 %v217_v45 }
 0x1d6   : > { %v386_v52 = vadd.f32 %v384_v49, %v1737_v47 }
 0x1d7   : > { %329 = vmatpush.msra.mxu2 %v214_v46 }
 0x1d8   : > { %v388_v54 = vsel %vm352_vm0, %v386_v52, -inf  ;;  %330 = vmatmul.f32.vlgmr.msra.gmra.mxu2 %v1703_v16 }
 0x1d9   : > { %389 = vmax.xlane.f32.xlu1 %v388_v54  ;;  %635 = vmatpush.msrb.mxu2 %v1758_v11 }
 0x1db   : > { %v381_v56 = vpop.f32.mrf.mxu3  ;;  %636 = vmatpush.msrb.mxu2 %v1753_v7 }
 0x1dc   : > { %v385_v58 = vmul.f32 0.25, %v381_v56  ;;  %v264_v56 = vperm.slane %v1714_v19, 2 }
 0x1de   : > { %v387_v59 = vadd.f32 %v385_v58, %v1741_v57 }
 0x1e0   : > { %v391_v60 = vsel %vm352_vm0, %v387_v59, -inf  ;;  %333 = vmatmul.f32.gmra.mxu2 %v1708_v17 }
 0x1e1   : > { %392 = vmax.xlane.f32.xlu1 %v391_v60 }
 0x1fa   : > { %453 = vrot.lane.b32.xlu1 %v1719_v23, %s1588_s9 }
 0x202   : > { %449 = vrot.lane.b32.xlu1 %v1719_v23, %s1589_s10 }
 0x20a   : > { %653 = vrot.lane.b32.xlu1 %v1753_v7, %s1586_s8 }
 0x212   : > { %758 = vrot.lane.b32.xlu1 %v1758_v11, %s1590_s11 }
 0x21a   : > { %855 = vrot.lane.b32.xlu1 %v1753_v7, %s1591_s12 }
 0x24c   : > { %v390_v61 = vpop.xlane.xlu1 %389 }
 0x24d   : > { %v394_v62 = vsub.f32 %v386_v52, %v390_v61 }
 0x24f   : > { %v396_v63 = vmul.f32 1.442695, %v394_v62 }
 0x251   : > { %1416 = vpow2.f32 %v396_v63 }
 0x254   : > { %v393_v0 = vpop.xlane.xlu1 %392 }
 0x255   : > { %v395_v1 = vsub.f32 %v387_v59, %v393_v0 }
 0x257   : > { %v1417_v2 = vpop.eup %1416  ;;  %v398_v3 = vmul.f32 1.442695, %v395_v1 }
 0x258   : > { %v400_v4 = vsel %vm352_vm0, %v1417_v2, 0.0 }
 0x259   : > { %1418 = vpow2.f32 %v398_v3  ;;  %401 = vadd.xlane.f32.xlu2 %v400_v4 }
 0x25b   : > { %v331_v58 = vpop.f32.mrf.mxu2 }
 0x25f   : > { %v1419_v8 = vpop.eup %1418 }
 0x260   : > { %v403_v9 = vsel %vm352_vm0, %v1419_v8, 0.0 }
 0x261   : > { %404 = vadd.xlane.f32.xlu0 %v403_v9 }
 0x263   : > { %v334_v60 = vpop.f32.mrf.mxu2 }
 0x264   : > { %v1826_v61 = vadd.f32 %v334_v60, %v264_v56 }
 0x26c   : > { %v454_v12 = vpop.permute.xlu1 %453 }
 0x26d   : > { %1257 = vmatpush.xpose.msk.msra.mxu3 %vm352_vm0, %v454_v12 }
 0x271   : > { %451 = vrot.lane.b32.xlu2 %v1717_v22, %s1588_s9 }
 0x274   : > { %v450_v31 = vpop.permute.xlu1 %449 }
 0x275   : > { %1387 = vrot.lane.b32.xlu0 %v1725_v24, %s1590_s11 }
 0x279   : > { %447 = vrot.lane.b32.xlu2 %v1717_v22, %s1589_s10 }
 0x27c   : > { %v654_v54 = vpop.permute.xlu1 %653 }
 0x27d   : > { %556 = vrot.lane.b32.xlu0 %v1719_v23, %s1591_s12 }
 0x284   : > { %v759_v5 = vpop.permute.xlu1 %758 }
 0x285   : > { %655 = vrot.lane.b32.xlu0 %v1758_v11, %s1586_s8 }
 0x28d   : > { %550 = vrot.lane.b32.xlu0 %v1717_v22, %s1592_s18 }
 0x295   : > { %649 = vrot.lane.b32.xlu0 %v1753_v7, %s1585_s7 }
 0x29d   : > { %552 = vrot.lane.b32.xlu0 %v1719_v23, %s1592_s18 }
 0x2a5   : > { %756 = vrot.lane.b32.xlu0 %v1753_v7, %s1590_s11 }
 0x2ad   : > { %754 = vrot.lane.b32.xlu0 %v1758_v11, %s1588_s9 }
 0x2b5   : > { %1065 = vrot.lane.b32.xlu0 %v1826_v61, %s1592_s18 }
 0x2cc   : > { %v402_v13 = vpop.xlane.xlu2 %401 }
 0x2cd   : > { %1420 = vrcp.f32 %v402_v13 }
 0x2d3   : > { %v1421_v14 = vpop.eup %1420 }
 0x2d4   : > { %v452_v15 = vpop.permute.xlu2 %451  ;;  %v405_v18 = vpop.xlane.xlu0 %404  ;;  %v408_v20 = vmul.f32 %v1421_v14, %v1417_v2 }
 0x2d5   : > { %1422 = vrcp.f32 %v405_v18  ;;  %1258 = vmatpush.xpose.msk.msra.mxu3 %vm352_vm0, %v452_v15 }
 0x2d6   : > { %1255 = vmatmul.msk.f32.vlgmr.msrb.gmra.mxu3 %vm352_vm0, %v408_v20 }
 0x2db   : > { %v1423_v21 = vpop.eup %1422 }
 0x2dc   : > { %v409_v24 = vmul.f32 %v1423_v21, %v1419_v8  ;;  %v448_v23 = vpop.permute.xlu2 %447  ;;  %v856_v8 = vpop.permute.xlu1 %855 }
 0x2de   : > { %1256 = vmatmul.msk.f32.gmra.mxu3 %vm352_vm0, %v409_v24 }
 0x2e6   : > { %1259 = vmatmul.msk.f32.vlgmr.msra.gmra.mxu3 %vm352_vm0, %v448_v23 }
 0x2e7   : > { %v1388_v25 = vpop.permute.xlu0 %1387 }
 0x2e8   : > { %v1389_v27 = vunpack.i.l.bf16 %v1388_v25  ;;  %v1390_v29 = vunpack.i.h.bf16 %v1388_v25 }
 0x2ea   : > { %538 = vmatpush.msrb.mxu0 %v1389_v27  ;;  %1317 = vmatpush.msrb.mxu1 %v1389_v27 }
 0x2ec   : > { %539 = vmatpush.msrb.mxu0 %v1390_v29  ;;  %1318 = vmatpush.msrb.mxu1 %v1390_v29 }
 0x2ee   : > { %1260 = vmatmul.msk.f32.gmra.mxu3 %vm352_vm0, %v450_v31 }
 0x2ef   : > { %v557_v32 = vpop.permute.xlu0 %556 }
 0x2f0   : > { %1265 = vmatpush.xpose.msk.msra.mxu1 %vm352_vm0, %v557_v32 }
 0x2f7   : > { %v656_v38 = vpop.permute.xlu0 %655 }
 0x2f8   : > { %1273 = vmatpush.xpose.msk.msrb.mxu3 %vm352_vm0, %v656_v38 }
 0x2fc   : > { %1274 = vmatpush.xpose.msk.msrb.mxu3 %vm352_vm0, %v654_v54 }
 0x2ff   : > { %v551_v53 = vpop.permute.xlu0 %550 }
 0x300   : > { %1289 = vmatpush.xpose.msk.msra.mxu3 %vm352_vm0, %v1826_v61 }
 0x307   : > { %v650_v55 = vpop.permute.xlu0 %649 }
 0x308   : > { %1275 = vmatmul.msk.f32.vlgmr.msrb.gmra.mxu3 %vm352_vm0, %v650_v55 }
 0x30f   : > { %v553_v18 = vpop.permute.xlu0 %552 }
 0x317   : > { %v757_v20 = vpop.permute.xlu0 %756 }
 0x31f   : > { %v755_v21 = vpop.permute.xlu0 %754 }
 0x327   : > { %v1066_v24 = vpop.permute.xlu0 %1065 }
 0x359   : > { %v439_v48 = vpop.f32.mrf.mxu3 }
 0x35a   : > { %445 = vst.msk [vmem:[%s1801_s22] sm:$0xff] %vm352_vm0, %v439_v48 }
 0x361   : > { %v442_v16 = vpop.f32.mrf.mxu3 }
 0x362   : > { %446 = vst.msk [vmem:[%s1801_s22 + $0x8] sm:$0xff] %vm352_vm0, %v442_v16 }
 0x369   : > { %v480_v49 = vpop.f32.mrf.mxu3 }
 0x36a   : > { %v486_v59 = vmul.f32 0.25, %v480_v49 }
 0x36c   : > { %v1833_v19 = vadd.f32 %v486_v59, %v1737_v47 }
 0x36e   : > { %v490_v62 = vsel %vm352_vm0, %v1833_v19, -inf }
 0x371   : > { %v483_v50 = vpop.f32.mrf.mxu3 }
 0x372   : > { %v487_v51 = vmul.f32 0.25, %v483_v50 }
 0x374   : > { %v489_v17 = vadd.f32 %v487_v51, %v1741_v57 }
 0x376   : > { %v493_v52 = vsel %vm352_vm0, %v489_v17, -inf }
 0x377   : > { %494 = vmax.xlane.f32.xlu2 %v493_v52 }
 0x38b   : > { %v682_v12 = vpop.f32.mrf.mxu3 }
 0x38c   : > { %v688_v13 = vmul.f32 0.25, %v682_v12 }
 0x38e   : > { %v1855_v14 = vadd.f32 %v688_v13, %v1737_v47 }
 0x38f   : > { %554 = vrot.lane.b32.xlu2 %v1717_v22, %s1591_s12  ;;  %v1820_v22 = vadd.f32 %v331_v58, %v264_v56 }
 0x390   : > { %v692_v15 = vsel %vm352_vm0, %v1855_v14, -inf }
 0x391   : > { %1290 = vmatpush.xpose.msk.msra.mxu3 %vm352_vm0, %v1820_v22  ;;  %956 = vrot.lane.b32.xlu0 %v1820_v22, %s1586_s8 }
 0x395   : > { %1305 = vmatpush.xpose.msk.msrb.mxu3 %vm352_vm0, %v1066_v24 }
 0x397   : > { %651 = vrot.lane.b32.xlu2 %v1758_v11, %s1585_s7 }
 0x399   : > { %1061 = vrot.lane.b32.xlu0 %v1826_v61, %s1590_s11 }
 0x39f   : > { %752 = vrot.lane.b32.xlu2 %v1753_v7, %s1588_s9 }
 0x3a7   : > { %857 = vrot.lane.b32.xlu2 %v1758_v11, %s1591_s12 }
 0x3af   : > { %960 = vrot.lane.b32.xlu2 %v1820_v22, %s1589_s10 }
 0x3b7   : > { %1059 = vrot.lane.b32.xlu2 %v1820_v22, %s1590_s11 }
 0x3c3   : > { %693 = vmax.xlane.f32.xlu0 %v692_v15 }
 0x3e0   : > { %491 = vmax.xlane.f32.xlu2 %v490_v62 }
 0x3ea   : > { %v495_v63 = vpop.xlane.xlu2 %494 }
 0x3eb   : > { %v497_v0 = vsub.f32 %v489_v17, %v495_v63 }
 0x3ed   : > { %v500_v1 = vmul.f32 1.442695, %v497_v0 }
 0x3ef   : > { %1424 = vpow2.f32 %v500_v1 }
 0x3f2   : > { %v555_v2 = vpop.permute.xlu2 %554 }
 0x3f3   : > { %1266 = vmatpush.xpose.msk.msra.mxu1 %vm352_vm0, %v555_v2 }
 0x3f5   : > { %v1425_v3 = vpop.eup %1424 }
 0x3f6   : > { %v505_v4 = vsel %vm352_vm0, %v1425_v3, 0.0 }
 0x3f7   : > { %506 = vadd.xlane.f32.xlu1 %v505_v4 }
 0x3fa   : > { %v652_v6 = vpop.permute.xlu2 %651 }
 0x3fb   : > { %1276 = vmatmul.msk.f32.gmra.mxu3 %vm352_vm0, %v652_v6 }
 0x402   : > { %v753_v9 = vpop.permute.xlu2 %752 }
 0x403   : > { %1291 = vmatmul.msk.f32.vlgmr.msra.gmra.mxu3 %vm352_vm0, %v856_v8  ;;  %v957_v31 = vpop.permute.xlu0 %956 }
 0x40a   : > { %v858_v10 = vpop.permute.xlu2 %857 }
 0x40b   : > { %1292 = vmatmul.msk.f32.gmra.mxu3 %vm352_vm0, %v858_v10  ;;  %v1062_v38 = vpop.permute.xlu0 %1061 }
 0x410   : > { %962 = vrot.lane.b32.xlu1 %v1826_v61, %s1589_s10 }
 0x412   : > { %v961_v29 = vpop.permute.xlu2 %960 }
 0x418   : > { %1063 = vrot.lane.b32.xlu1 %v1820_v22, %s1592_s18 }
 0x41a   : > { %v1060_v33 = vpop.permute.xlu2 %1059 }
 0x420   : > { %958 = vrot.lane.b32.xlu1 %v1826_v61, %s1586_s8 }
 0x436   : > { %v694_v8 = vpop.xlane.xlu0 %693 }
 0x453   : > { %v492_v62 = vpop.xlane.xlu2 %491 }
 0x454   : > { %v496_v1 = vsub.f32 %v1833_v19, %v492_v62  ;;  %v698_v19 = vsub.f32 %v1855_v14, %v694_v8 }
 0x456   : > { %v498_v4 = vmul.f32 1.442695, %v496_v1 }
 0x46a   : > { %v507_v23 = vpop.xlane.xlu1 %506 }
 0x46b   : > { %1426 = vrcp.f32 %v507_v23 }
 0x46c   : > { %1428 = vpow2.f32 %v498_v4 }
 0x471   : > { %v1427_v25 = vpop.eup %1426 }
 0x472   : > { %v511_v26 = vmul.f32 %v1427_v25, %v1425_v3  ;;  %v1928_v24 = vpop.eup %1428 }
 0x473   : > { %v502_v23 = vsel %vm352_vm0, %v1928_v24, 0.0 }
 0x474   : > { %1262 = vmatmul.msk.f32.vlgmr.msrb.gmra.mxu1 %vm352_vm0, %v511_v26 }
 0x475   : > { %1281 = vmatpush.xpose.msk.msrb.mxu1 %vm352_vm0, %v759_v5 }
 0x479   : > { %1282 = vmatpush.xpose.msk.msrb.mxu1 %vm352_vm0, %v757_v20 }
 0x47c   : > { %1267 = vmatmul.msk.f32.vlgmr.msra.gmra.mxu1 %vm352_vm0, %v551_v53 }
 0x47e   : > { %v685_v27 = vpop.f32.mrf.mxu3 }
 0x47f   : > { %v689_v44 = vmul.f32 0.25, %v685_v27 }
 0x481   : > { %v1887_v16 = vadd.f32 %v689_v44, %v1741_v57 }
 0x482   : > { %v963_v28 = vpop.permute.xlu1 %962 }
 0x483   : > { %1297 = vmatpush.xpose.msk.msra.mxu1 %vm352_vm0, %v963_v28  ;;  %v695_v51 = vsel %vm352_vm0, %v1887_v16, -inf }
 0x484   : > { %1268 = vmatmul.msk.f32.gmra.mxu1 %vm352_vm0, %v553_v18 }
 0x486   : > { %v886_v30 = vpop.f32.mrf.mxu3 }
 0x487   : > { %1298 = vmatpush.xpose.msk.msra.mxu1 %vm352_vm0, %v961_v29  ;;  %v892_v50 = vmul.f32 0.25, %v886_v30 }
 0x489   : > { %v1897_v54 = vadd.f32 %v892_v50, %v1737_v47 }
 0x48a   : > { %v1064_v32 = vpop.permute.xlu1 %1063 }
 0x48b   : > { %1306 = vmatpush.xpose.msk.msrb.mxu3 %vm352_vm0, %v1064_v32  ;;  %v896_v58 = vsel %vm352_vm0, %v1897_v54, -inf }
 0x48c   : > { %1283 = vmatmul.msk.f32.vlgmr.msrb.gmra.mxu1 %vm352_vm0, %v753_v9 }
 0x48e   : > { %v889_v34 = vpop.f32.mrf.mxu3  ;;  %1307 = vmatmul.msk.f32.vlgmr.msrb.gmra.mxu3 %vm352_vm0, %v1060_v33 }
 0x48f   : > { %v893_v35 = vmul.f32 0.25, %v889_v34 }
 0x491   : > { %v1871_v36 = vadd.f32 %v893_v35, %v1741_v57 }
 0x492   : > { %v959_v39 = vpop.permute.xlu1 %958 }
 0x493   : > { %v899_v37 = vsel %vm352_vm0, %v1871_v36, -inf }
 0x494   : > { %900 = vmax.xlane.f32.xlu0 %v899_v37  ;;  %1284 = vmatmul.msk.f32.gmra.mxu1 %vm352_vm0, %v755_v21  ;;  %v700_v21 = vmul.f32 1.442695, %v698_v19 }
 0x496   : > { %1308 = vmatmul.msk.f32.gmra.mxu3 %vm352_vm0, %v1062_v38  ;;  %1430 = vpow2.f32 %v700_v21 }
 0x49c   : > { %1299 = vmatmul.msk.f32.vlgmr.msra.gmra.mxu1 %vm352_vm0, %v957_v31  ;;  %v1935_v25 = vpop.eup %1430 }
 0x49d   : > { %v704_v26 = vsel %vm352_vm0, %v1935_v25, 0.0 }
 0x4a4   : > { %1300 = vmatmul.msk.f32.gmra.mxu1 %vm352_vm0, %v959_v39 }
 0x4f1   : > { %v544_v40 = vpop.f32.mrf.mxu1 }
 0x4f2   : > { %1264 = vst.msk [vmem:[%s1801_s22 + $0x18] sm:$0xff] %vm352_vm0, %v544_v40 }
 0x4f9   : > { %v583_v41 = vpop.f32.mrf.mxu1 }
 0x4fa   : > { %v589_v42 = vmul.f32 0.25, %v583_v41 }
 0x4fc   : > { %v1882_v43 = vadd.f32 %v589_v42, %v1737_v47 }
 0x4fe   : > { %v593_v45 = vsel %vm352_vm0, %v1882_v43, -inf }
 0x4ff   : > { %594 = vmax.xlane.f32.xlu1 %v593_v45 }
 0x501   : > { %v586_v46 = vpop.f32.mrf.mxu1 }
 0x502   : > { %v590_v48 = vmul.f32 0.25, %v586_v46 }
 0x504   : > { %v1890_v49 = vadd.f32 %v590_v48, %v1741_v57 }
 0x506   : > { %v596_v17 = vsel %vm352_vm0, %v1890_v49, -inf }
 0x507   : > { %696 = vmax.xlane.f32.xlu1 %v695_v51  ;;  %597 = vmax.xlane.f32.xlu2 %v596_v17  ;;  %v901_v32 = vpop.xlane.xlu0 %900 }
 0x509   : > { %v785_v52 = vpop.f32.mrf.mxu1 }
 0x50a   : > { %v791_v53 = vmul.f32 0.25, %v785_v52 }
 0x50c   : > { %v1900_v55 = vadd.f32 %v791_v53, %v1737_v47 }
 0x50e   : > { %v795_v56 = vsel %vm352_vm0, %v1900_v55, -inf }
 0x50f   : > { %796 = vmax.xlane.f32.xlu0 %v795_v56  ;;  %897 = vmax.xlane.f32.xlu2 %v896_v58  ;;  %v1401_v56 = vpack.i.bf16 %v1820_v22, %v1826_v61 }
 0x511   : > { %v788_v59 = vpop.f32.mrf.mxu1  ;;  %v1092_v60 = vpop.f32.mrf.mxu3 }
 0x512   : > { %v1098_v63 = vmul.f32 0.25, %v1092_v60  ;;  %v792_v2 = vmul.f32 0.25, %v788_v59 }
 0x514   : > { %v1907_v0 = vadd.f32 %v1098_v63, %v1737_v47  ;;  %v1913_v10 = vadd.f32 %v792_v2, %v1741_v57 }
 0x516   : > { %v1102_v3 = vsel %vm352_vm0, %v1907_v0, -inf  ;;  %v798_v18 = vsel %vm352_vm0, %v1913_v10, -inf }
 0x517   : > { %1103 = vmax.xlane.f32.xlu1 %v1102_v3 }
 0x519   : > { %v989_v5 = vpop.f32.mrf.mxu1  ;;  %v1095_v6 = vpop.f32.mrf.mxu3 }
 0x51a   : > { %v995_v9 = vmul.f32 0.25, %v989_v5  ;;  %v1099_v13 = vmul.f32 0.25, %v1095_v6 }
 0x51c   : > { %v1916_v12 = vadd.f32 %v995_v9, %v1737_v47  ;;  %v1924_v20 = vadd.f32 %v1099_v13, %v1741_v57  ;;  %v1391_v47 = vpack.i.bf16 %v1753_v7, %v1758_v11 }
 0x51e   : > { %v999_v15 = vsel %vm352_vm0, %v1916_v12, -inf  ;;  %v1105_v14 = vsel %vm352_vm0, %v1924_v20, -inf }
 0x51f   : > { %1000 = vmax.xlane.f32.xlu2 %v999_v15  ;;  %799 = vmax.xlane.f32.xlu1 %v798_v18 }
 0x521   : > { %v992_v7 = vpop.f32.mrf.mxu1 }
 0x522   : > { %v996_v11 = vmul.f32 0.25, %v992_v7 }
 0x523   : > { %1392 = vrot.lane.b32.xlu0 %v1391_v47, %s1589_s10 }
 0x524   : > { %v1941_v27 = vadd.f32 %v996_v11, %v1741_v57 }
 0x526   : > { %v1002_v28 = vsel %vm352_vm0, %v1941_v27, -inf }
 0x527   : > { %503 = vadd.xlane.f32.xlu1 %v502_v23  ;;  %1106 = vmax.xlane.f32.xlu2 %v1105_v14 }
 0x52f   : > { %705 = vadd.xlane.f32.xlu2 %v704_v26 }
 0x540   : > { %1397 = vrot.lane.b32.xlu1 %v1391_v47, %s1592_s18 }
 0x54d   : > { %1003 = vmax.xlane.f32.xlu0 %v1002_v28 }
 0x572   : > { %v595_v29 = vpop.xlane.xlu1 %594 }
 0x573   : > { %v599_v30 = vsub.f32 %v1882_v43, %v595_v29 }
 0x575   : > { %v601_v31 = vmul.f32 1.442695, %v599_v30 }
 0x577   : > { %1432 = vpow2.f32 %v601_v31 }
 0x57a   : > { %v598_v33 = vpop.xlane.xlu2 %597  ;;  %v697_v34 = vpop.xlane.xlu1 %696 }
 0x57b   : > { %v600_v35 = vsub.f32 %v1890_v49, %v598_v33  ;;  %v699_v37 = vsub.f32 %v1887_v16, %v697_v34  ;;  %v903_v49 = vsub.f32 %v1871_v36, %v901_v32 }
 0x57d   : > { %v1948_v38 = vpop.eup %1432  ;;  %v603_v57 = vmul.f32 1.442695, %v600_v35  ;;  %v702_v39 = vmul.f32 1.442695, %v699_v37  ;;  %v906_v17 = vmul.f32 1.442695, %v903_v49 }
 0x57e   : > { %v605_v40 = vsel %vm352_vm0, %v1948_v38, 0.0 }
 0x57f   : > { %1434 = vpow2.f32 %v603_v57  ;;  %606 = vadd.xlane.f32.xlu0 %v605_v40 }
 0x580   : > { %1436 = vpow2.f32 %v702_v39 }
 0x582   : > { %v797_v41 = vpop.xlane.xlu0 %796  ;;  %v898_v42 = vpop.xlane.xlu2 %897 }
 0x583   : > { %v801_v43 = vsub.f32 %v1900_v55, %v797_v41  ;;  %v902_v44 = vsub.f32 %v1897_v54, %v898_v42 }
 0x585   : > { %v1954_v45 = vpop.eup %1434  ;;  %v803_v46 = vmul.f32 1.442695, %v801_v43  ;;  %v904_v48 = vmul.f32 1.442695, %v902_v44 }
 0x586   : > { %v1956_v16 = vpop.eup %1436  ;;  %v608_v50 = vsel %vm352_vm0, %v1954_v45, 0.0 }
 0x587   : > { %1438 = vpow2.f32 %v803_v46  ;;  %609 = vadd.xlane.f32.xlu1 %v608_v50  ;;  %v707_v51 = vsel %vm352_vm0, %v1956_v16, 0.0 }
 0x588   : > { %1440 = vpow2.f32 %v904_v48  ;;  %708 = vadd.xlane.f32.xlu2 %v707_v51 }
 0x589   : > { %1442 = vpow2.f32 %v906_v17 }
 0x58a   : > { %v1104_v52 = vpop.xlane.xlu1 %1103 }
 0x58b   : > { %v1108_v2 = vsub.f32 %v1907_v0, %v1104_v52 }
 0x58d   : > { %v1963_v53 = vpop.eup %1438  ;;  %v1110_v22 = vmul.f32 1.442695, %v1108_v2 }
 0x58e   : > { %v1965_v54 = vpop.eup %1440  ;;  %v807_v36 = vsel %vm352_vm0, %v1963_v53, 0.0 }
 0x58f   : > { %808 = vadd.xlane.f32.xlu1 %v807_v36  ;;  %v908_v55 = vsel %vm352_vm0, %v1965_v54, 0.0  ;;  %v1975_v62 = vpop.eup %1442 }
 0x590   : > { %909 = vadd.xlane.f32.xlu2 %v908_v55  ;;  %v911_v4 = vsel %vm352_vm0, %v1975_v62, 0.0 }
 0x592   : > { %v1001_v58 = vpop.xlane.xlu2 %1000  ;;  %v800_v59 = vpop.xlane.xlu1 %799 }
 0x593   : > { %v802_v60 = vsub.f32 %v1913_v10, %v800_v59  ;;  %1402 = vrot.lane.b32.xlu0 %v1401_v56, %s1585_s7  ;;  %v1005_v47 = vsub.f32 %v1916_v12, %v1001_v58 }
 0x595   : > { %v805_v63 = vmul.f32 1.442695, %v802_v60  ;;  %v1393_v1 = vpop.permute.xlu0 %1392  ;;  %v1007_v14 = vmul.f32 1.442695, %v1005_v47 }
 0x596   : > { %v1394_v3 = vunpack.i.l.bf16 %v1393_v1  ;;  %v1395_v5 = vunpack.i.h.bf16 %v1393_v1 }
 0x597   : > { %1444 = vpow2.f32 %v805_v63 }
 0x598   : > { %912 = vadd.xlane.f32.xlu2 %v911_v4  ;;  %740 = vmatpush.msra.mxu0 %v1394_v3 }
 0x59a   : > { %741 = vmatpush.msra.mxu0 %v1395_v5  ;;  %v1107_v61 = vpop.xlane.xlu2 %1106  ;;  %v504_v6 = vpop.xlane.xlu1 %503 }
 0x59b   : > { %1446 = vrcp.f32 %v504_v6  ;;  %v1109_v28 = vsub.f32 %v1924_v20, %v1107_v61 }
 0x59c   : > { %1448 = vpow2.f32 %v1110_v22 }
 0x59d   : > { %v1980_v8 = vpop.eup %1444  ;;  %v1112_v30 = vmul.f32 1.442695, %v1109_v28 }
 0x59e   : > { %v810_v9 = vsel %vm352_vm0, %v1980_v8, 0.0 }
 0x5a0   : > { %811 = vadd.xlane.f32.xlu2 %v810_v9 }
 0x5a1   : > { %v1447_v0 = vpop.eup %1446 }
 0x5a2   : > { %v706_v10 = vpop.xlane.xlu2 %705  ;;  %v510_v13 = vmul.f32 %v1447_v0, %v1928_v24  ;;  %v1985_v19 = vpop.eup %1448 }
 0x5a3   : > { %1450 = vrcp.f32 %v706_v10  ;;  %v1114_v15 = vsel %vm352_vm0, %v1985_v19, 0.0 }
 0x5a4   : > { %1261 = vmatmul.msk.f32.vlgmr.msrb.gmra.mxu0 %vm352_vm0, %v510_v13  ;;  %1452 = vpow2.f32 %v1007_v14 }
 0x5a8   : > { %1115 = vadd.xlane.f32.xlu2 %v1114_v15  ;;  %1407 = vrot.lane.b32.xlu1 %v1401_v56, %s1588_s9 }
 0x5a9   : > { %v1451_v18 = vpop.eup %1450 }
 0x5aa   : > { %v712_v21 = vmul.f32 %v1451_v18, %v1935_v25  ;;  %v1995_v7 = vpop.eup %1452 }
 0x5ab   : > { %v1011_v11 = vsel %vm352_vm0, %v1995_v7, 0.0 }
 0x5ac   : > { %1277 = vmatmul.msk.f32.vlgmr.msra.gmra.mxu0 %vm352_vm0, %v712_v21 }
 0x5b0   : > { %1412 = vrot.lane.b32.xlu1 %v1401_v56, %s1591_s12 }
 0x5b2   : > { %v1398_v24 = vpop.permute.xlu1 %1397 }
 0x5b3   : > { %v1399_v23 = vunpack.i.l.bf16 %v1398_v24  ;;  %v1400_v26 = vunpack.i.h.bf16 %v1398_v24 }
 0x5b5   : > { %843 = vmatpush.msra.mxu2 %v1399_v23 }
 0x5b7   : > { %844 = vmatpush.msra.mxu2 %v1400_v26 }
 0x5bd   : > { %1012 = vadd.xlane.f32.xlu0 %v1011_v11 }
 0x5c0   : > { %v1004_v25 = vpop.xlane.xlu0 %1003 }
 0x5c1   : > { %v1006_v12 = vsub.f32 %v1941_v27, %v1004_v25 }
 0x5c3   : > { %v1009_v29 = vmul.f32 1.442695, %v1006_v12 }
 0x5c5   : > { %1454 = vpow2.f32 %v1009_v29 }
 0x5c6   : > { %1456 = vpow2.f32 %v1112_v30 }
 0x5cb   : > { %v2001_v31 = vpop.eup %1454 }
 0x5cc   : > { %v1014_v32 = vsel %vm352_vm0, %v2001_v31, 0.0  ;;  %v2005_v33 = vpop.eup %1456 }
 0x5cd   : > { %1015 = vadd.xlane.f32.xlu2 %v1014_v32  ;;  %v1117_v34 = vsel %vm352_vm0, %v2005_v33, 0.0 }
 0x5d5   : > { %1118 = vadd.xlane.f32.xlu2 %v1117_v34 }
 0x5f2   : > { %v607_v35 = vpop.xlane.xlu0 %606 }
 0x5f3   : > { %1458 = vrcp.f32 %v607_v35 }
 0x5f9   : > { %v1459_v27 = vpop.eup %1458 }
 0x5fa   : > { %v610_v20 = vpop.xlane.xlu1 %609  ;;  %v613_v37 = vmul.f32 %v1459_v27, %v1948_v38 }
 0x5fb   : > { %v709_v57 = vpop.xlane.xlu2 %708  ;;  %1460 = vrcp.f32 %v610_v20 }
 0x5fc   : > { %1462 = vrcp.f32 %v709_v57  ;;  %1269 = vmatmul.msk.f32.vlgmr.msrb.gmra.mxu2 %vm352_vm0, %v613_v37 }
 0x601   : > { %v1461_v39 = vpop.eup %1460 }
 0x602   : > { %v1463_v40 = vpop.eup %1462  ;;  %v809_v41 = vpop.xlane.xlu1 %808  ;;  %v614_v42 = vmul.f32 %v1461_v39, %v1954_v45 }
 0x603   : > { %v910_v43 = vpop.xlane.xlu2 %909  ;;  %1464 = vrcp.f32 %v809_v41  ;;  %v713_v44 = vmul.f32 %v1463_v40, %v1956_v16 }
 0x604   : > { %1466 = vrcp.f32 %v910_v43  ;;  %1270 = vmatmul.msk.f32.gmra.mxu2 %vm352_vm0, %v614_v42 }
 0x605   : > { %1278 = vmatmul.msk.f32.gmra.mxu0 %vm352_vm0, %v713_v44  ;;  %v1403_v38 = vpop.permute.xlu0 %1402 }
 0x606   : > { %v1404_v46 = vunpack.i.l.bf16 %v1403_v38  ;;  %v1405_v48 = vunpack.i.h.bf16 %v1403_v38 }
 0x608   : > { %944 = vmatpush.msrb.mxu0 %v1404_v46 }
 0x609   : > { %v1465_v49 = vpop.eup %1464 }
 0x60a   : > { %v1467_v50 = vpop.eup %1466  ;;  %v815_v51 = vmul.f32 %v1465_v49, %v1963_v53  ;;  %945 = vmatpush.msrb.mxu0 %v1405_v48 }
 0x60b   : > { %v916_v45 = vmul.f32 %v1467_v50, %v1965_v54  ;;  %v913_v17 = vpop.xlane.xlu2 %912 }
 0x60c   : > { %1468 = vrcp.f32 %v913_v17  ;;  %1285 = vmatmul.msk.f32.vlgmr.msra.gmra.mxu2 %vm352_vm0, %v815_v51 }
 0x60d   : > { %1293 = vmatmul.msk.f32.vlgmr.msrb.gmra.mxu0 %vm352_vm0, %v916_v45 }
 0x612   : > { %v1469_v16 = vpop.eup %1468 }
 0x613   : > { %v812_v52 = vpop.xlane.xlu2 %811  ;;  %v917_v36 = vmul.f32 %v1469_v16, %v1975_v62 }
 0x614   : > { %1470 = vrcp.f32 %v812_v52 }
 0x615   : > { %1294 = vmatmul.msk.f32.gmra.mxu0 %vm352_vm0, %v917_v36 }
 0x61a   : > { %v1471_v55 = vpop.eup %1470  ;;  %v1408_v56 = vpop.permute.xlu1 %1407 }
 0x61b   : > { %v1116_v53 = vpop.xlane.xlu2 %1115  ;;  %v1409_v58 = vunpack.i.l.bf16 %v1408_v56  ;;  %v816_v54 = vmul.f32 %v1471_v55, %v1980_v8  ;;  %v1410_v59 = vunpack.i.h.bf16 %v1408_v56 }
 0x61c   : > { %1472 = vrcp.f32 %v1116_v53 }
 0x61d   : > { %1286 = vmatmul.msk.f32.gmra.mxu2 %vm352_vm0, %v816_v54 }
 0x61e   : > { %1047 = vmatpush.msrb.mxu2 %v1409_v58 }
 0x620   : > { %1048 = vmatpush.msrb.mxu2 %v1410_v59 }
 0x621   : > { %v541_v60 = vpop.f32.mrf.mxu0 }
 0x622   : > { %1263 = vst.msk [vmem:[%s1801_s22 + $0x10] sm:$0xff] %vm352_vm0, %v541_v60  ;;  %v1413_v62 = vpop.permute.xlu1 %1412  ;;  %v1473_v63 = vpop.eup %1472 }
 0x623   : > { %v1414_v1 = vunpack.i.l.bf16 %v1413_v62  ;;  %v1415_v2 = vunpack.i.h.bf16 %v1413_v62  ;;  %v1122_v3 = vmul.f32 %v1473_v63, %v1985_v19 }
 0x625   : > { %1150 = vmatpush.msra.mxu0 %v1414_v1 }
 0x627   : > { %1151 = vmatpush.msra.mxu0 %v1415_v2 }
 0x628   : > { %1309 = vmatmul.msk.f32.vlgmr.msra.gmra.mxu0 %vm352_vm0, %v1122_v3 }
 0x629   : > { %v743_v4 = vpop.f32.mrf.mxu0 }
 0x62a   : > { %1279 = vst.msk [vmem:[%s1801_s22 + $0x30] sm:$0xff] %vm352_vm0, %v743_v4 }
 0x630   : > { %v1013_v5 = vpop.xlane.xlu0 %1012 }
 0x631   : > { %1474 = vrcp.f32 %v1013_v5 }
 0x637   : > { %v1475_v22 = vpop.eup %1474 }
 0x638   : > { %v1019_v61 = vmul.f32 %v1475_v22, %v1995_v7 }
 0x63a   : > { %1301 = vmatmul.msk.f32.vlgmr.msrb.gmra.mxu2 %vm352_vm0, %v1019_v61 }
 0x640   : > { %v1016_v6 = vpop.xlane.xlu2 %1015 }
 0x641   : > { %1476 = vrcp.f32 %v1016_v6 }
 0x647   : > { %v1477_v8 = vpop.eup %1476 }
 0x648   : > { %v1119_v9 = vpop.xlane.xlu2 %1118  ;;  %v1020_v0 = vmul.f32 %v1477_v8, %v2001_v31 }
 0x649   : > { %1478 = vrcp.f32 %v1119_v9 }
 0x64a   : > { %1302 = vmatmul.msk.f32.gmra.mxu2 %vm352_vm0, %v1020_v0 }
 0x64f   : > { %v1479_v10 = vpop.eup %1478 }
 0x650   : > { %v1123_v13 = vmul.f32 %v1479_v10, %v2005_v33 }
 0x652   : > { %1310 = vmatmul.msk.f32.gmra.mxu0 %vm352_vm0, %v1123_v13 }
 0x67f   : > { %v638_v19 = vpop.f32.mrf.mxu2 }
 0x680   : > { %1271 = vst.msk [vmem:[%s1801_s22 + $0x20] sm:$0xff] %vm352_vm0, %v638_v19 }
 0x682   : > { %v746_v15 = vpop.f32.mrf.mxu0 }
 0x683   : > { %1280 = vst.msk [vmem:[%s1801_s22 + $0x38] sm:$0xff] %vm352_vm0, %v746_v15 }
 0x687   : > { %v641_v18 = vpop.f32.mrf.mxu2 }
 0x688   : > { %1272 = vst.msk [vmem:[%s1801_s22 + $0x28] sm:$0xff] %vm352_vm0, %v641_v18 }
 0x68a   : > { %v947_v21 = vpop.f32.mrf.mxu0 }
 0x68b   : > { %1295 = vst.msk [vmem:[%s1801_s22 + $0x50] sm:$0xff] %vm352_vm0, %v947_v21 }
 0x68f   : > { %v846_v47 = vpop.f32.mrf.mxu2 }
 0x690   : > { %1287 = vst.msk [vmem:[%s1801_s22 + $0x40] sm:$0xff] %vm352_vm0, %v846_v47 }
 0x692   : > { %v950_v14 = vpop.f32.mrf.mxu0 }
 0x693   : > { %1296 = vst.msk [vmem:[%s1801_s22 + $0x58] sm:$0xff] %vm352_vm0, %v950_v14 }
 0x6a0   : > { %v849_v24 = vpop.f32.mrf.mxu2 }
 0x6a1   : > { %1288 = vst.msk [vmem:[%s1801_s22 + $0x48] sm:$0xff] %vm352_vm0, %v849_v24 }
 0x6a5   : > { %v1153_v23 = vpop.f32.mrf.mxu0 }
 0x6a6   : > { %1311 = vst.msk [vmem:[%s1801_s22 + $0x70] sm:$0xff] %vm352_vm0, %v1153_v23 }
 0x6bd   : > { %v1050_v26 = vpop.f32.mrf.mxu2 }
 0x6be   : > { %1303 = vst.msk [vmem:[%s1801_s22 + $0x60] sm:$0xff] %vm352_vm0, %v1050_v26 }
 0x6cd   : > { %v1053_v7 = vpop.f32.mrf.mxu2 }
 0x6ce   : > { %1304 = vst.msk [vmem:[%s1801_s22 + $0x68] sm:$0xff] %vm352_vm0, %v1053_v7 }
 0x6cf   : > { %v1156_v11 = vpop.f32.mrf.mxu0 }
 0x6d0   : > { %1312 = vst.msk [vmem:[%s1801_s22 + $0x78] sm:$0xff] %vm352_vm0, %v1156_v11 }
 0x6d1 PF: > { %p14_p4 = scmp.ge.s32.totalorder %s1656_s24, 4   ;;  %s2077_s12 = smov %s1570_s13 }
 0x6d2   : > { %s2078_s13 = smov %s1574_s14  ;;  %s2079_s14 = smov %s1666_s29 }
 0x6d3   : > { %s2080_s15 = smov %s1656_s24  ;;  %16 = sbr.rel (!%p14_p4) target bundleno = 4 (0x4), region = 83 }
 0x6d8   :  { %1183 = vsyncpa [#allocation3], 1 }
 0x6d9   :  { %1185 = vsyncpa [#allocation3 + $0x1], 1 }
 0x6da   :  { %1186 = vsyncpa [#allocation5], 1 }

// kernel: decoder_layer.7
= control target key start
LH: loop header
LB: loop body
LE: loop exit
PB: predicated region body
PF: predicated region fallthrough
CT: control target
= control target key end

     0   :  { %11 = vsyncpa [#allocation3], 0  ;;  %s2259_s0 = inlined_call_operand.hbm [shape: f32[2,16,128], index: 0, kind: input, shape index: {}]   ;;  %s2260_s1 = inlined_call_operand.vmem [shape: f32[2,16,128], index: 1, kind: input, shape index: {}]   ;;  %s2261_s2 = inlined_call_operand.vmem [shape: f32[128,256], index: 2, kind: input, shape index: {}]   ;;  %s2262_s3 = inlined_call_operand.vmem [shape: f32[1,256], index: 3, kind: input, shape index: {}]   ;;  %s2263_s4 = inlined_call_operand.hbm [shape: f32[128,128], index: 4, kind: input, shape index: {}]   ;;  %s2264_s5 = inlined_call_operand.vmem [shape: f32[1,128], index: 5, kind: input, shape index: {}]   ;;  %s2265_s6 = inlined_call_operand.vmem [shape: f32[2,8,16,16], index: 6, kind: output, shape index: {}]  }
   0x1   :  { %13 = vsyncpa [#allocation3 + $0x1], 0 }
   0x2   :  { %14 = vsyncpa [#allocation5], 0  ;;  %s1725_s21 = smov 0   ;;  %s1727_s22 = smov 0  }
   0x3   :  { %s1729_s23 = smov 0   ;;  %s1731_s24 = smov 0  }
   0x4 LB: > { %s1744_s25 = sadd.s32 4294967295, %s1678_s24   ;;  %p40_p0 = scmp.ne.s32.totalorder %s1670_s22, %s1666_s21  ;;  %s1678_s24 = sphi %s1731_s24, %s2272_s24   ;;  %s1674_s23 = sphi %s1729_s23, %s2271_s23   ;;  %s1670_s22 = sphi %s1727_s22, %s2270_s22   ;;  %s1666_s21 = sphi %s1725_s21, %s2269_s21  }
   0x5   : > { %p41_p1 = scmp.eq.s32.totalorder %s1744_s25, 0  ;;  %p1334_p2 = scmp.ge.s32.totalorder %s1678_s24, 1 }
   0x6   : > { %p187_p3 = scmp.lt.s32.totalorder %s1678_s24, 3  ;;  %s204_s29 = sshll.u32 %s2263_s4, 4  ;;  %s205_s29 = int_to_ptr.hbm [resolvable:$true] %s204_s29 }
   0x7   : > { %p1752_p4 = por %p41_p1, %p40_p0  ;;  %s1680_s7 = smov [#allocation4]  }
   0x8   : > { %p1759_p5 = pnand %p1334_p2, %p187_p3  ;;  %s206_s8 = sshll.u32 %s1680_s7, 4  ;;  %s207_s8 = int_to_ptr.vmem [resolvable:$true] %s206_s8 }
   0x9   : > { %s1768_s9 = sadd.s32 1, %s1678_s24   ;;  %s1681_s10 = smov 128  }
   0xa   : > { %p1422_p6 = pneg %p1759_p5  ;;  %s1682_s11 = smov 8  }
   0xb   : > { %s24_s12 = ssub.s32 %s1678_s24, %s1768_s9  ;;  %s27_s13 = sadd.s32 1, %s1674_s23 }
   0xc   : > { %p1423_p7 = pnand %p1422_p6, %p41_p1  ;;  %p25_p8 = scmp.eq.s32.totalorder %s24_s12, 0 }
   0xd   : > { %p34_p9 = scmp.ne.s32.totalorder %s1674_s23, %s1670_s22  ;;  %p35_p10 = scmp.eq.s32.totalorder %s1678_s24, 0 }
   0xe   : > { %1425 = dma.hbm_to_vmem [thread:$0]  (!%p1423_p7), %s205_s29, 2048, %s207_s8, [#allocation5], %s1681_s10, %s1681_s10, %s1682_s11  }
   0xf   : > { %p1431_p11 = scmp.lt.s32.totalorder %s1678_s24, 2  ;;  %p36_p12 = por %p35_p10, %p34_p9 }
  0x10   : > { %s1781_s14 = scalar_select %p25_p8, %s1674_s23, %s27_s13  }
  0x11   : > { %s223_s15 = sand.u32 1, %s1674_s23   ;;  %s1411_s17 = sshll.u32 %s1678_s24, 4 }
  0x12   : > { %s1337_s16 = sshll.u32 %s223_s15, 4  ;;  %s232_s20 = scalar_lea.hbm %s2259_s0, %s1411_s17 }
  0x13   : > { %s227_s21 = scalar_lea.vmem [#allocation2], %s1337_s16  ;;  %s233_s28 = sshll.u32 %s232_s20, 4  ;;  %s234_s28 = int_to_ptr.hbm [resolvable:$true] %s233_s28 }
  0x14   : > { %s235_s27 = sshll.u32 %s227_s21, 4  ;;  %p1788_p13 = pnand %p1431_p11, %p36_p12  ;;  %s236_s27 = int_to_ptr.vmem [resolvable:$true] %s235_s27 }
  0x15   : > { %s224_s7 = scalar_lea.sflag [#allocation3], %s223_s15  ;;  %s1610_s8 = sshra.s32 %s234_s28, 4  ;;  %s1611_s8 = int_to_ptr.hbm [resolvable:$true] %s1610_s8 }
  0x16   : > { %s1612_s12 = scalar_lea.hbm %s1611_s8, 16  ;;  %p1614_p2 = pneg %p1788_p13 }
  0x17   : > { %p1613_p0 = scmp.ne.s32.totalorder %s1611_s8, %s1612_s12  ;;  %s1617_s16 = scalar_lea.hbm %s2259_s0, 32 }
  0x18   : > { %p1618_p7 = scmp.lt.s32.totalorder %s1611_s8, %s2259_s0  ;;  %p1619_p8 = scmp.lt.s32.totalorder %s1617_s16, %s1612_s12 }
  0x19   : > { %p1615_p3 = pnand %p1614_p2, %p1613_p0 }
  0x1a   : > { %p1620_p9 = por %p1619_p8, %p1618_p7 }
  0x1b   : > { %p1616_p6 = pneg %p1615_p3 }
  0x1d   : > { %p1621_p10 = pnand %p1620_p9, %p1616_p6 }
  0x1f   : > { %1624 = shalt.err (!%p1621_p10)
}
  0x20   : > { %1429 = dma.hbm_to_vmem [thread:$0]  (!%p1788_p13), %s234_s28, 256, %s236_s27, %s224_s7, %s1681_s10, %s1681_s10, %s1682_s11  }
  0x21   : > { %255 = sbr.rel (%p1759_p5) target bundleno = 1657 (0x679), region = 44  ;;  %s257_s15 = sand.u32 (!%p1759_p5), 1, %s1670_s22  }
  0x22   : > { %s1808_s19 = sshll.u32 (!%p1759_p5), %s257_s15, 4  ;;  %s258_s20 = scalar_lea.sflag (!%p1759_p5), [#allocation3], %s257_s15 }
  0x23   : > { %s261_s21 = scalar_lea.vmem (!%p1759_p5), [#allocation2], %s1808_s19 }
  0x26   : > { %1657 = dma.done.wait (%p1752_p4), %s258_s20, 256  }
  0x27   : > { %1659 = vsyncadd (%p1752_p4), %s258_s20, 4294967040 }
  0x28   : > { %1661 = dma.done.wait (%p41_p1), [#allocation5], 2048  }
  0x29   : > { %1663 = vsyncadd (%p41_p1), [#allocation5], 4294965248  ;;  %v343_v0 = vld [vmem:[%s2261_s2 + $0xf0] sm:$0xff]  ;;  %v341_v1 = vld [vmem:[%s2261_s2 + $0xe0] sm:$0xff]  ;;  %p301_p1 = scmp.lt.s32.totalorder %s1744_s25, 1  ;;  %vm442_vm0 = vcmask 130048  }
  0x2a   : > { %351 = vmatpush.msra.mxu0 %v343_v0  ;;  %v414_v2 = vld [vmem:[#allocation4 + $0x78] sm:$0xff]  ;;  %v339_v3 = vld [vmem:[%s2261_s2 + $0xd0] sm:$0xff]  ;;  %v412_v5 = vld [vmem:[#allocation4 + $0x68] sm:$0xff]  ;;  %s1683_s28 = smov 96   ;;  %s1684_s29 = smov 112  }
  0x2b   : > { %419 = vmatpush.msra.mxu2 %v414_v2  ;;  %v413_v4 = vld [vmem:[#allocation4 + $0x70] sm:$0xff]  ;;  %v337_v6 = vld [vmem:[%s2261_s2 + $0xc0] sm:$0xff]  ;;  %v410_v9 = vld [vmem:[#allocation4 + $0x58] sm:$0xff]  ;;  %s2274_s25 = smov (!%p301_p1, %s1744_s25), 1  ;;  %s1685_s19 = smov 80  }
  0x2c   : > { %352 = vmatpush.msra.mxu0 %v341_v1  ;;  %v411_v7 = vld [vmem:[#allocation4 + $0x60] sm:$0xff]  ;;  %v335_v8 = vld [vmem:[%s2261_s2 + $0xb0] sm:$0xff]  ;;  %v408_v13 = vld [vmem:[#allocation4 + $0x48] sm:$0xff]  ;;  %s1412_s13 = sshll.u32 %s2274_s25, 4  ;;  %s1687_s26 = smov 48  }
  0x2d   : > { %420 = vmatpush.msra.mxu2 %v413_v4  ;;  %v333_v10 = vld [vmem:[%s2261_s2 + $0xa0] sm:$0xff]  ;;  %v409_v11 = vld [vmem:[#allocation4 + $0x50] sm:$0xff]  ;;  %v406_v17 = vld [vmem:[#allocation4 + $0x38] sm:$0xff]  ;;  %s305_s20 = scalar_lea.vmem %s2260_s1, %s1412_s13  ;;  %s1688_s7 = smov 32  }
  0x2e   : > { %353 = vmatpush.msra.mxu0 %v339_v3  ;;  %v331_v12 = vld [vmem:[%s2261_s2 + $0x90] sm:$0xff]  ;;  %v329_v14 = vld [vmem:[%s2261_s2 + $0x80] sm:$0xff]  ;;  %v404_v21 = vld [vmem:[#allocation4 + $0x28] sm:$0xff]  ;;  %s1689_s8 = smov 16   ;;  %s1413_s12 = sshll.u32 %s2274_s25, 7 }
  0x2f   : > { %421 = vmatpush.msra.mxu2 %v412_v5  ;;  %v407_v15 = vld [vmem:[#allocation4 + $0x40] sm:$0xff]  ;;  %v327_v16 = vld [vmem:[%s2261_s2 + $0x70] sm:$0xff]  ;;  %v402_v25 = vld [vmem:[#allocation4 + $0x18] sm:$0xff]  ;;  %s2028_s16 = scalar_lea.vmem %s2265_s6, %s1413_s12 }
  0x30   : > { %354 = vmatpush.msra.mxu0 %v337_v6  ;;  %v325_v18 = vld [vmem:[%s2261_s2 + $0x60] sm:$0xff]  ;;  %v405_v19 = vld [vmem:[#allocation4 + $0x30] sm:$0xff]  ;;  %v400_v29 = vld [vmem:[#allocation4 + $0x8] sm:$0xff] }
  0x31   : > { %422 = vmatpush.msra.mxu2 %v411_v7  ;;  %v323_v20 = vld [vmem:[%s2261_s2 + $0x50] sm:$0xff]  ;;  %v321_v22 = vld [vmem:[%s2261_s2 + $0x40] sm:$0xff]  ;;  %v1882_v34 = vld [vmem:[%s261_s21 + $0x8] sm:$0xff] }
  0x32   : > { %355 = vmatpush.msra.mxu0 %v335_v8  ;;  %v403_v23 = vld [vmem:[#allocation4 + $0x20] sm:$0xff]  ;;  %v319_v24 = vld [vmem:[%s2261_s2 + $0x30] sm:$0xff]  ;;  %v398_v35 = vld [vmem:[%s305_s20 + $0x8] sm:$0xff] }
  0x33   : > { %423 = vmatpush.msra.mxu2 %v410_v9  ;;  %v317_v26 = vld [vmem:[%s2261_s2 + $0x20] sm:$0xff]  ;;  %v401_v27 = vld [vmem:[#allocation4 + $0x10] sm:$0xff]  ;;  %v344_v53 = vld [vmem:[%s2261_s2 + $0xf8] sm:$0xff] }
  0x34   : > { %356 = vmatpush.msra.mxu0 %v333_v10  ;;  %v315_v28 = vld [vmem:[%s2261_s2 + $0x10] sm:$0xff]  ;;  %v313_v30 = vld [vmem:[%s2261_s2] sm:$0xff]  ;;  %v342_v54 = vld [vmem:[%s2261_s2 + $0xe8] sm:$0xff]  ;;  %374 = vmatpush.msra.mxu1 %v344_v53 }
  0x35   : > { %424 = vmatpush.msra.mxu2 %v409_v11  ;;  %v1877_v31 = vld [vmem:[%s261_s21] sm:$0xff]  ;;  %v340_v56 = vld [vmem:[%s2261_s2 + $0xd8] sm:$0xff]  ;;  %v338_v58 = vld [vmem:[%s2261_s2 + $0xc8] sm:$0xff]  ;;  %s1686_s21 = smov 64  }
  0x36   : > { %357 = vmatpush.msra.mxu0 %v331_v12  ;;  %v399_v32 = vld [vmem:[#allocation4] sm:$0xff]  ;;  %375 = vmatpush.msra.mxu1 %v342_v54  ;;  %v336_v59 = vld [vmem:[%s2261_s2 + $0xb8] sm:$0xff]  ;;  %v334_v61 = vld [vmem:[%s2261_s2 + $0xa8] sm:$0xff] }
  0x37   : > { %425 = vmatpush.msra.mxu2 %v408_v13  ;;  %v397_v33 = vld [vmem:[%s305_s20] sm:$0xff]  ;;  %v332_v63 = vld [vmem:[%s2261_s2 + $0x98] sm:$0xff]  ;;  %v330_v1 = vld [vmem:[%s2261_s2 + $0x88] sm:$0xff] }
  0x38   : > { %358 = vmatpush.msra.mxu0 %v329_v14  ;;  %v1888_v37 = vld [vmem:[%s2262_s3] sm:$0x3]  ;;  %376 = vmatpush.msra.mxu1 %v340_v56  ;;  %v328_v2 = vld [vmem:[%s2261_s2 + $0x78] sm:$0xff]  ;;  %v326_v3 = vld [vmem:[%s2261_s2 + $0x68] sm:$0xff] }
  0x39   : > { %426 = vmatpush.msra.mxu2 %v407_v15  ;;  %v347_v38 = vperm.slane %v1888_v37, 0  ;;  %v1515_v43 = vld [vmem:[%s2264_s5] ss:$0 sm:$0xff]  ;;  %v324_v4 = vld [vmem:[%s2261_s2 + $0x58] sm:$0xff]  ;;  %v322_v5 = vld [vmem:[%s2261_s2 + $0x48] sm:$0xff] }
  0x3a   : > { %359 = vmatpush.msra.mxu0 %v327_v16  ;;  %377 = vmatpush.msra.mxu1 %v338_v58  ;;  %v320_v6 = vld [vmem:[%s2261_s2 + $0x38] sm:$0xff]  ;;  %v318_v7 = vld [vmem:[%s2261_s2 + $0x28] sm:$0xff] }
  0x3b   : > { %427 = vmatpush.msra.mxu2 %v406_v17  ;;  %v316_v8 = vld [vmem:[%s2261_s2 + $0x18] sm:$0xff]  ;;  %v314_v9 = vld [vmem:[%s2261_s2 + $0x8] sm:$0xff] }
  0x3c   : > { %360 = vmatpush.msra.mxu0 %v325_v18  ;;  %378 = vmatpush.msra.mxu1 %v336_v59 }
  0x3d   : > { %428 = vmatpush.msra.mxu2 %v405_v19 }
  0x3e   : > { %361 = vmatpush.msra.mxu0 %v323_v20  ;;  %379 = vmatpush.msra.mxu1 %v334_v61 }
  0x3f   : > { %429 = vmatpush.msra.mxu2 %v404_v21 }
  0x40   : > { %362 = vmatpush.msra.mxu0 %v321_v22  ;;  %380 = vmatpush.msra.mxu1 %v332_v63  ;;  %v348_v22 = vperm.slane %v1888_v37, 1 }
  0x41   : > { %430 = vmatpush.msra.mxu2 %v403_v23 }
  0x42   : > { %363 = vmatpush.msra.mxu0 %v319_v24  ;;  %381 = vmatpush.msra.mxu1 %v330_v1 }
  0x43   : > { %431 = vmatpush.msra.mxu2 %v402_v25 }
  0x44   : > { %364 = vmatpush.msra.mxu0 %v317_v26  ;;  %382 = vmatpush.msra.mxu1 %v328_v2 }
  0x45   : > { %432 = vmatpush.msra.mxu2 %v401_v27 }
  0x46   : > { %365 = vmatpush.msra.mxu0 %v315_v28  ;;  %383 = vmatpush.msra.mxu1 %v326_v3 }
  0x47   : > { %433 = vmatpush.msra.mxu2 %v400_v29 }
  0x48   : > { %366 = vmatpush.msra.mxu0 %v313_v30  ;;  %384 = vmatpush.msra.mxu1 %v324_v4 }
  0x49   : > { %367 = vmatmul.f32.vlgmr.msra.gmra.mxu0 %v1877_v31  ;;  %434 = vmatpush.msra.mxu2 %v399_v32 }
  0x4a   : > { %435 = vmatmul.f32.vlgmr.msra.gmra.mxu2 %v397_v33  ;;  %385 = vmatpush.msra.mxu1 %v322_v5 }
  0x4c   : > { %386 = vmatpush.msra.mxu1 %v320_v6 }
  0x4e   : > { %387 = vmatpush.msra.mxu1 %v318_v7 }
  0x50   : > { %388 = vmatpush.msra.mxu1 %v316_v8 }
  0x51   : > { %370 = vmatmul.f32.gmra.mxu0 %v1882_v34 }
  0x52   : > { %438 = vmatmul.f32.gmra.mxu2 %v398_v35  ;;  %389 = vmatpush.msra.mxu1 %v314_v9 }
  0x53   : > { %390 = vmatmul.f32.vlgmr.msra.gmra.mxu1 %v1877_v31 }
  0x5b   : > { %393 = vmatmul.f32.gmra.mxu1 %v1882_v34 }
  0xc6   : > { %v368_v36 = vpop.f32.mrf.mxu0 }
  0xc7   : > { %v1891_v40 = vadd.f32 %v368_v36, %v347_v38 }
  0xcd   : > { %v436_v42 = vpop.f32.mrf.mxu2 }
  0xce   : > { %v371_v39 = vpop.f32.mrf.mxu0  ;;  %v1908_v45 = vadd.f32 %v1515_v43, %v436_v42 }
  0xcf   : > { %v1893_v41 = vadd.f32 %v371_v39, %v347_v38 }
  0xd0   : > { %v391_v21 = vpop.f32.mrf.mxu1 }
  0xd1   : > { %545 = vrot.lane.b32.xlu2 %v1893_v41, %s1683_s28  ;;  %1347 = vmatpush.xpose.msk.msra.mxu3 %vm442_vm0, %v1893_v41  ;;  %v1904_v44 = vpack.i.bf16 %v1891_v40, %v1893_v41  ;;  %v2007_v25 = vadd.f32 %v391_v21, %v348_v22 }
  0xd3   : > { %1476 = vrot.lane.b32.xlu1 %v1904_v44, %s1684_s29 }
  0xd5   : > { %1348 = vmatpush.xpose.msk.msra.mxu3 %vm442_vm0, %v1891_v40  ;;  %v439_v46 = vpop.f32.mrf.mxu2 }
  0xd6   : > { %v1914_v47 = vadd.f32 %v1515_v43, %v439_v46 }
  0xd8   : > { %1349 = vmatmul.msk.f32.vlgmr.msra.gmra.mxu3 %vm442_vm0, %v1908_v45  ;;  %v394_v23 = vpop.f32.mrf.mxu1 }
  0xd9   : > { %v1999_v24 = vadd.f32 %v394_v23, %v348_v22 }
  0xe0   : > { %1350 = vmatmul.msk.f32.gmra.mxu3 %vm442_vm0, %v1914_v47 }
 0x12b   : > { %v546_v51 = vpop.permute.xlu2 %545 }
 0x145   : > { %v1477_v48 = vpop.permute.xlu1 %1476 }
 0x146   : > { %v1478_v49 = vunpack.i.l.bf16 %v1477_v48  ;;  %v1479_v50 = vunpack.i.h.bf16 %v1477_v48 }
 0x148   : > { %528 = vmatpush.msrb.mxu3 %v1478_v49 }
 0x14a   : > { %529 = vmatpush.msrb.mxu3 %v1479_v50 }
 0x14c   : > { %1353 = vmatpush.xpose.msk.msra.mxu3 %vm442_vm0, %v546_v51 }
 0x15b   : > { %v472_v52 = vpop.f32.mrf.mxu3 }
 0x15c   : > { %v478_v55 = vmul.f32 0.25, %v472_v52 }
 0x15e   : > { %v480_v57 = vsel %vm442_vm0, %v478_v55, -inf }
 0x15f   : > { %481 = vmax.xlane.f32.xlu0 %v480_v57 }
 0x163   : > { %v475_v60 = vpop.f32.mrf.mxu3 }
 0x164   : > { %v479_v62 = vmul.f32 0.25, %v475_v60 }
 0x166   : > { %v483_v0 = vsel %vm442_vm0, %v479_v62, -inf }
 0x167   : > { %484 = vmax.xlane.f32.xlu0 %v483_v0 }
 0x17b   : > { %543 = vrot.lane.b32.xlu0 %v1891_v40, %s1683_s28 }
 0x1d2   : > { %v482_v10 = vpop.xlane.xlu0 %481 }
 0x1d3   : > { %v486_v11 = vsub.f32 %v478_v55, %v482_v10 }
 0x1d5   : > { %v488_v12 = vmul.f32 1.442695, %v486_v11 }
 0x1d7   : > { %1516 = vpow2.f32 %v488_v12 }
 0x1da   : > { %v485_v13 = vpop.xlane.xlu0 %484 }
 0x1db   : > { %v487_v14 = vsub.f32 %v479_v62, %v485_v13 }
 0x1dd   : > { %v1517_v15 = vpop.eup %1516  ;;  %v490_v16 = vmul.f32 1.442695, %v487_v14 }
 0x1de   : > { %v492_v17 = vsel %vm442_vm0, %v1517_v15, 0.0 }
 0x1df   : > { %1518 = vpow2.f32 %v490_v16  ;;  %493 = vadd.xlane.f32.xlu1 %v492_v17 }
 0x1e5   : > { %v1519_v18 = vpop.eup %1518 }
 0x1e6   : > { %v495_v19 = vsel %vm442_vm0, %v1519_v18, 0.0 }
 0x1e7   : > { %496 = vadd.xlane.f32.xlu2 %v495_v19 }
 0x1ed   : > { %v544_v20 = vpop.permute.xlu0 %543 }
 0x1ee   : > { %1354 = vmatpush.xpose.msk.msra.mxu3 %vm442_vm0, %v544_v20 }
 0x1f8   : > { %541 = vrot.lane.b32.xlu1 %v1914_v47, %s1684_s29 }
 0x1ff   : > { %539 = vrot.lane.b32.xlu2 %v1908_v45, %s1684_s29 }
 0x200   : > { %1481 = vrot.lane.b32.xlu1 %v1904_v44, %s1685_s19 }
 0x207   : > { %642 = vrot.lane.b32.xlu2 %v1914_v47, %s1683_s28 }
 0x208   : > { %646 = vrot.lane.b32.xlu1 %v1893_v41, %s1686_s21 }
 0x20f   : > { %941 = vrot.lane.b32.xlu2 %v1908_v45, %s1687_s26 }
 0x210   : > { %747 = vrot.lane.b32.xlu1 %v1893_v41, %s1688_s7 }
 0x218   : > { %644 = vrot.lane.b32.xlu1 %v1891_v40, %s1686_s21 }
 0x220   : > { %745 = vrot.lane.b32.xlu1 %v1891_v40, %s1688_s7 }
 0x228   : > { %741 = vrot.lane.b32.xlu1 %v1908_v45, %s1685_s19 }
 0x230   : > { %743 = vrot.lane.b32.xlu1 %v1914_v47, %s1685_s19 }
 0x238   : > { %947 = vrot.lane.b32.xlu1 %v1999_v24, %s1683_s28 }
 0x240   : > { %842 = vrot.lane.b32.xlu1 %v1908_v45, %s1686_s21 }
 0x248   : > { %943 = vrot.lane.b32.xlu1 %v1914_v47, %s1687_s26 }
 0x250   : > { %1046 = vrot.lane.b32.xlu1 %v2007_v25, %s1686_s21 }
 0x252   : > { %v494_v26 = vpop.xlane.xlu1 %493 }
 0x253   : > { %1520 = vrcp.f32 %v494_v26 }
 0x258   : > { %1143 = vrot.lane.b32.xlu1 %v1908_v45, %s1689_s8 }
 0x259   : > { %v1521_v27 = vpop.eup %1520 }
 0x25a   : > { %v497_v28 = vpop.xlane.xlu2 %496  ;;  %v500_v29 = vmul.f32 %v1521_v27, %v1517_v15 }
 0x25b   : > { %1522 = vrcp.f32 %v497_v28 }
 0x25c   : > { %1351 = vmatmul.msk.f32.vlgmr.msrb.gmra.mxu3 %vm442_vm0, %v500_v29 }
 0x261   : > { %v1523_v30 = vpop.eup %1522 }
 0x262   : > { %v501_v31 = vmul.f32 %v1523_v30, %v1519_v18  ;;  %v540_v33 = vpop.permute.xlu2 %539 }
 0x264   : > { %1352 = vmatmul.msk.f32.gmra.mxu3 %vm442_vm0, %v501_v31 }
 0x26a   : > { %v542_v32 = vpop.permute.xlu1 %541  ;;  %v643_v3 = vpop.permute.xlu2 %642 }
 0x26c   : > { %1355 = vmatmul.msk.f32.vlgmr.msra.gmra.mxu3 %vm442_vm0, %v540_v33 }
 0x272   : > { %v1482_v34 = vpop.permute.xlu1 %1481  ;;  %v942_v5 = vpop.permute.xlu2 %941 }
 0x273   : > { %v1483_v35 = vunpack.i.l.bf16 %v1482_v34  ;;  %v1484_v36 = vunpack.i.h.bf16 %v1482_v34 }
 0x274   : > { %1356 = vmatmul.msk.f32.gmra.mxu3 %vm442_vm0, %v542_v32 }
 0x275   : > { %628 = vmatpush.msrb.mxu0 %v1483_v35  ;;  %1414 = vmatpush.msrb.mxu1 %v1483_v35 }
 0x277   : > { %629 = vmatpush.msrb.mxu0 %v1484_v36  ;;  %1415 = vmatpush.msrb.mxu1 %v1484_v36 }
 0x27a   : > { %v647_v37 = vpop.permute.xlu1 %646 }
 0x27b   : > { %1361 = vmatpush.xpose.msk.msra.mxu1 %vm442_vm0, %v647_v37 }
 0x282   : > { %v748_v38 = vpop.permute.xlu1 %747 }
 0x283   : > { %1369 = vmatpush.xpose.msk.msrb.mxu3 %vm442_vm0, %v748_v38 }
 0x28a   : > { %v645_v39 = vpop.permute.xlu1 %644 }
 0x28b   : > { %1362 = vmatpush.xpose.msk.msra.mxu1 %vm442_vm0, %v645_v39 }
 0x292   : > { %v746_v40 = vpop.permute.xlu1 %745 }
 0x293   : > { %1370 = vmatpush.xpose.msk.msrb.mxu3 %vm442_vm0, %v746_v40 }
 0x29a   : > { %v742_v41 = vpop.permute.xlu1 %741 }
 0x29b   : > { %1371 = vmatmul.msk.f32.vlgmr.msrb.gmra.mxu3 %vm442_vm0, %v742_v41 }
 0x2a2   : > { %v744_v42 = vpop.permute.xlu1 %743 }
 0x2a3   : > { %1372 = vmatmul.msk.f32.gmra.mxu3 %vm442_vm0, %v744_v42 }
 0x2aa   : > { %v948_v43 = vpop.permute.xlu1 %947 }
 0x2ab   : > { %1385 = vmatpush.xpose.msk.msra.mxu3 %vm442_vm0, %v948_v43 }
 0x2b2   : > { %v843_v4 = vpop.permute.xlu1 %842 }
 0x2ba   : > { %v944_v7 = vpop.permute.xlu1 %943 }
 0x2c2   : > { %v1047_v11 = vpop.permute.xlu1 %1046 }
 0x2ca   : > { %v1144_v15 = vpop.permute.xlu1 %1143 }
 0x2df   : > { %v531_v46 = vpop.f32.mrf.mxu3 }
 0x2e0   : > { %537 = vst.msk [vmem:[%s2028_s16] sm:$0xff] %vm442_vm0, %v531_v46 }
 0x2e7   : > { %v534_v48 = vpop.f32.mrf.mxu3 }
 0x2e8   : > { %538 = vst.msk [vmem:[%s2028_s16 + $0x8] sm:$0xff] %vm442_vm0, %v534_v48 }
 0x2ef   : > { %v572_v49 = vpop.f32.mrf.mxu3 }
 0x2f0   : > { %v2034_v50 = vmul.f32 0.25, %v572_v49 }
 0x2f2   : > { %v580_v51 = vsel %vm442_vm0, %v2034_v50, -inf }
 0x2f3   : > { %581 = vmax.xlane.f32.xlu1 %v580_v51 }
 0x2f7   : > { %v575_v52 = vpop.f32.mrf.mxu3 }
 0x2f8   : > { %v579_v53 = vmul.f32 0.25, %v575_v52 }
 0x2fa   : > { %v583_v54 = vsel %vm442_vm0, %v579_v53, -inf }
 0x2fb   : > { %584 = vmax.xlane.f32.xlu0 %v583_v54 }
 0x30f   : > { %640 = vrot.lane.b32.xlu0 %v1908_v45, %s1683_s28 }
 0x317   : > { %945 = vrot.lane.b32.xlu0 %v2007_v25, %s1683_s28 }
 0x31e   : > { %v774_v55 = vpop.f32.mrf.mxu3 }
 0x31f   : > { %844 = vrot.lane.b32.xlu0 %v1914_v47, %s1686_s21  ;;  %v2052_v59 = vmul.f32 0.25, %v774_v55 }
 0x321   : > { %v782_v60 = vsel %vm442_vm0, %v2052_v59, -inf }
 0x326   : > { %v777_v56 = vpop.f32.mrf.mxu3 }
 0x327   : > { %v781_v57 = vmul.f32 0.25, %v777_v56  ;;  %1149 = vrot.lane.b32.xlu0 %v1999_v24, %s1688_s7 }
 0x329   : > { %v785_v58 = vsel %vm442_vm0, %v781_v57, -inf }
 0x32a   : > { %786 = vmax.xlane.f32.xlu1 %v785_v58 }
 0x32f   : > { %1042 = vrot.lane.b32.xlu0 %v1908_v45, %s1688_s7 }
 0x337   : > { %1145 = vrot.lane.b32.xlu0 %v1914_v47, %s1689_s8 }
 0x361   : > { %783 = vmax.xlane.f32.xlu0 %v782_v60 }
 0x36e   : > { %v585_v61 = vpop.xlane.xlu0 %584 }
 0x36f   : > { %v587_v62 = vsub.f32 %v579_v53, %v585_v61 }
 0x371   : > { %v590_v63 = vmul.f32 1.442695, %v587_v62 }
 0x373   : > { %1524 = vpow2.f32 %v590_v63 }
 0x379   : > { %v1525_v0 = vpop.eup %1524 }
 0x37a   : > { %v595_v1 = vsel %vm442_vm0, %v1525_v0, 0.0 }
 0x37b   : > { %596 = vadd.xlane.f32.xlu2 %v595_v1 }
 0x381   : > { %v641_v2 = vpop.permute.xlu0 %640 }
 0x389   : > { %v946_v45 = vpop.permute.xlu0 %945 }
 0x38a   : > { %1386 = vmatpush.xpose.msk.msra.mxu3 %vm442_vm0, %v946_v45 }
 0x38d   : > { %1387 = vmatmul.msk.f32.vlgmr.msra.gmra.mxu3 %vm442_vm0, %v942_v5 }
 0x391   : > { %v845_v6 = vpop.permute.xlu0 %844 }
 0x393   : > { %1048 = vrot.lane.b32.xlu2 %v1999_v24, %s1686_s21 }
 0x395   : > { %1388 = vmatmul.msk.f32.gmra.mxu3 %vm442_vm0, %v944_v7 }
 0x399   : > { %v1150_v8 = vpop.permute.xlu0 %1149 }
 0x39a   : > { %1401 = vmatpush.xpose.msk.msrb.mxu3 %vm442_vm0, %v1150_v8 }
 0x39b   : > { %1147 = vrot.lane.b32.xlu2 %v2007_v25, %s1688_s7 }
 0x3a1   : > { %v1043_v16 = vpop.permute.xlu0 %1042 }
 0x3a3   : > { %1044 = vrot.lane.b32.xlu2 %v1914_v47, %s1688_s7  ;;  %v582_v47 = vpop.xlane.xlu1 %581 }
 0x3a4   : > { %v586_v34 = vsub.f32 %v2034_v50, %v582_v47 }
 0x3a6   : > { %v588_v35 = vmul.f32 1.442695, %v586_v34 }
 0x3a9   : > { %v1146_v17 = vpop.permute.xlu0 %1145 }
 0x3ab   : > { %v787_v18 = vpop.xlane.xlu1 %786 }
 0x3ac   : > { %v789_v21 = vsub.f32 %v781_v57, %v787_v18 }
 0x3ae   : > { %v792_v23 = vmul.f32 1.442695, %v789_v21 }
 0x3d4   : > { %v784_v36 = vpop.xlane.xlu0 %783 }
 0x3d5   : > { %v788_v40 = vsub.f32 %v2052_v59, %v784_v36 }
 0x3d7   : > { %v790_v48 = vmul.f32 1.442695, %v788_v40 }
 0x3ee   : > { %v597_v9 = vpop.xlane.xlu2 %596 }
 0x3ef   : > { %1526 = vrcp.f32 %v597_v9  ;;  %v2134_v9 = vpack.i.bf16 %v2007_v25, %v1999_v24 }
 0x3f0   : > { %1528 = vpow2.f32 %v792_v23 }
 0x3f1   : > { %1530 = vpow2.f32 %v588_v35 }
 0x3f5   : > { %v1527_v10 = vpop.eup %1526 }
 0x3f6   : > { %v1049_v12 = vpop.permute.xlu2 %1048  ;;  %v601_v13 = vmul.f32 %v1527_v10, %v1525_v0  ;;  %v2086_v29 = vpop.eup %1528 }
 0x3f7   : > { %v797_v30 = vsel %vm442_vm0, %v2086_v29, 0.0  ;;  %v1531_v49 = vpop.eup %1530 }
 0x3f8   : > { %1358 = vmatmul.msk.f32.vlgmr.msrb.gmra.mxu1 %vm442_vm0, %v601_v13  ;;  %v592_v53 = vsel %vm442_vm0, %v1531_v49, 0.0 }
 0x3f9   : > { %1377 = vmatpush.xpose.msk.msrb.mxu1 %vm442_vm0, %v1999_v24 }
 0x3fd   : > { %1378 = vmatpush.xpose.msk.msrb.mxu1 %vm442_vm0, %v2007_v25 }
 0x3fe   : > { %v1148_v14 = vpop.permute.xlu2 %1147 }
 0x3ff   : > { %1402 = vmatpush.xpose.msk.msrb.mxu3 %vm442_vm0, %v1148_v14 }
 0x400   : > { %1363 = vmatmul.msk.f32.vlgmr.msra.gmra.mxu1 %vm442_vm0, %v641_v2 }
 0x401   : > { %1393 = vmatpush.xpose.msk.msra.mxu1 %vm442_vm0, %v1049_v12 }
 0x402   : > { %1403 = vmatmul.msk.f32.vlgmr.msrb.gmra.mxu3 %vm442_vm0, %v1144_v15 }
 0x405   : > { %1394 = vmatpush.xpose.msk.msra.mxu1 %vm442_vm0, %v1047_v11 }
 0x406   : > { %v1045_v31 = vpop.permute.xlu2 %1044 }
 0x408   : > { %1364 = vmatmul.msk.f32.gmra.mxu1 %vm442_vm0, %v643_v3 }
 0x40a   : > { %1404 = vmatmul.msk.f32.gmra.mxu3 %vm442_vm0, %v1146_v17 }
 0x410   : > { %1379 = vmatmul.msk.f32.vlgmr.msrb.gmra.mxu1 %vm442_vm0, %v843_v4  ;;  %v974_v19 = vpop.f32.mrf.mxu3 }
 0x411   : > { %v980_v20 = vmul.f32 0.25, %v974_v19 }
 0x413   : > { %v982_v22 = vsel %vm442_vm0, %v980_v20, -inf }
 0x414   : > { %983 = vmax.xlane.f32.xlu2 %v982_v22 }
 0x418   : > { %1380 = vmatmul.msk.f32.gmra.mxu1 %vm442_vm0, %v845_v6  ;;  %v977_v26 = vpop.f32.mrf.mxu3 }
 0x419   : > { %v2082_v27 = vmul.f32 0.25, %v977_v26 }
 0x41b   : > { %v985_v28 = vsel %vm442_vm0, %v2082_v27, -inf }
 0x41c   : > { %986 = vmax.xlane.f32.xlu0 %v985_v28 }
 0x420   : > { %1395 = vmatmul.msk.f32.vlgmr.msra.gmra.mxu1 %vm442_vm0, %v1043_v16 }
 0x424   : > { %798 = vadd.xlane.f32.xlu0 %v797_v30 }
 0x428   : > { %1396 = vmatmul.msk.f32.gmra.mxu1 %vm442_vm0, %v1045_v31 }
 0x475   : > { %v634_v32 = vpop.f32.mrf.mxu1 }
 0x476   : > { %1360 = vst.msk [vmem:[%s2028_s16 + $0x18] sm:$0xff] %vm442_vm0, %v634_v32 }
 0x47d   : > { %v673_v33 = vpop.f32.mrf.mxu1 }
 0x47e   : > { %v679_v62 = vmul.f32 0.25, %v673_v33 }
 0x480   : > { %v681_v0 = vsel %vm442_vm0, %v679_v62, -inf }
 0x485   : > { %v676_v37 = vpop.f32.mrf.mxu1  ;;  %v1176_v38 = vpop.f32.mrf.mxu3 }
 0x486   : > { %v2095_v39 = vmul.f32 0.25, %v1176_v38  ;;  %v680_v1 = vmul.f32 0.25, %v676_v37 }
 0x487   : > { %v984_v41 = vpop.xlane.xlu2 %983 }
 0x488   : > { %v988_v42 = vsub.f32 %v980_v20, %v984_v41  ;;  %v1184_v43 = vsel %vm442_vm0, %v2095_v39, -inf  ;;  %v684_v4 = vsel %vm442_vm0, %v680_v1, -inf }
 0x489   : > { %1185 = vmax.xlane.f32.xlu1 %v1184_v43 }
 0x48a   : > { %v990_v46 = vmul.f32 1.442695, %v988_v42 }
 0x48c   : > { %1532 = vpow2.f32 %v990_v46 }
 0x48d   : > { %v873_v50 = vpop.f32.mrf.mxu1  ;;  %v1179_v51 = vpop.f32.mrf.mxu3  ;;  %1534 = vpow2.f32 %v790_v48 }
 0x48e   : > { %v2100_v52 = vmul.f32 0.25, %v1179_v51  ;;  %v879_v59 = vmul.f32 0.25, %v873_v50 }
 0x48f   : > { %v987_v10 = vpop.xlane.xlu0 %986 }
 0x490   : > { %v1187_v54 = vsel %vm442_vm0, %v2100_v52, -inf  ;;  %v881_v61 = vsel %vm442_vm0, %v879_v59, -inf  ;;  %v989_v13 = vsub.f32 %v2082_v27, %v987_v10 }
 0x491   : > { %593 = vadd.xlane.f32.xlu1 %v592_v53  ;;  %1188 = vmax.xlane.f32.xlu2 %v1187_v54 }
 0x492   : > { %v2105_v55 = vpop.eup %1532  ;;  %v992_v14 = vmul.f32 1.442695, %v989_v13 }
 0x493   : > { %v994_v56 = vsel %vm442_vm0, %v2105_v55, 0.0  ;;  %v2109_v57 = vpop.eup %1534 }
 0x494   : > { %995 = vadd.xlane.f32.xlu0 %v994_v56  ;;  %v794_v60 = vsel %vm442_vm0, %v2109_v57, 0.0 }
 0x495   : > { %v876_v58 = vpop.f32.mrf.mxu1 }
 0x496   : > { %v2124_v5 = vmul.f32 0.25, %v876_v58 }
 0x497   : > { %v799_v15 = vpop.xlane.xlu0 %798 }
 0x498   : > { %v884_v6 = vsel %vm442_vm0, %v2124_v5, -inf }
 0x499   : > { %795 = vadd.xlane.f32.xlu2 %v794_v60 }
 0x49c   : > { %882 = vmax.xlane.f32.xlu0 %v881_v61 }
 0x49d   : > { %v1075_v63 = vpop.f32.mrf.mxu1 }
 0x49e   : > { %v2128_v7 = vmul.f32 0.25, %v1075_v63 }
 0x4a0   : > { %v1083_v8 = vsel %vm442_vm0, %v2128_v7, -inf }
 0x4a1   : > { %682 = vmax.xlane.f32.xlu2 %v681_v0 }
 0x4a5   : > { %v1078_v2 = vpop.f32.mrf.mxu1 }
 0x4a6   : > { %v2115_v3 = vmul.f32 0.25, %v1078_v2 }
 0x4a8   : > { %v1086_v45 = vsel %vm442_vm0, %v2115_v3, -inf }
 0x4a9   : > { %1087 = vmax.xlane.f32.xlu0 %v1086_v45  ;;  %685 = vmax.xlane.f32.xlu2 %v684_v4 }
 0x4aa   : > { %1486 = vrot.lane.b32.xlu1 %v1904_v44, %s1687_s26 }
 0x4c1   : > { %1491 = vrot.lane.b32.xlu2 %v1904_v44, %s1689_s8 }
 0x4d4   : > { %885 = vmax.xlane.f32.xlu1 %v884_v6 }
 0x4ea   : > { %1084 = vmax.xlane.f32.xlu2 %v1083_v8 }
 0x4ed   : > { %1496 = vrot.lane.b32.xlu1 %v2134_v9, %s1684_s29 }
 0x4fc   : > { %v2138_v44 = vpop.xlane.xlu1 %1185 }
 0x4fd   : > { %v1190_v54 = vsub.f32 %v2095_v39, %v2138_v44 }
 0x504   : > { %v594_v11 = vpop.xlane.xlu1 %593  ;;  %v2140_v12 = vpop.xlane.xlu2 %1188 }
 0x505   : > { %1536 = vrcp.f32 %v594_v11  ;;  %v1191_v6 = vsub.f32 %v2100_v52, %v2140_v12 }
 0x506   : > { %1538 = vpow2.f32 %v992_v14 }
 0x507   : > { %v2144_v24 = vpop.xlane.xlu0 %995  ;;  %v1194_v8 = vmul.f32 1.442695, %v1191_v6 }
 0x50b   : > { %v1537_v16 = vpop.eup %1536 }
 0x50c   : > { %v796_v47 = vpop.xlane.xlu2 %795  ;;  %v600_v17 = vmul.f32 %v1537_v16, %v1531_v49  ;;  %v2146_v25 = vpop.eup %1538 }
 0x50d   : > { %v997_v20 = vsel %vm442_vm0, %v2146_v25, 0.0 }
 0x50e   : > { %1357 = vmatmul.msk.f32.vlgmr.msrb.gmra.mxu0 %vm442_vm0, %v600_v17 }
 0x50f   : > { %v883_v22 = vpop.xlane.xlu0 %882 }
 0x510   : > { %v887_v31 = vsub.f32 %v879_v59, %v883_v22 }
 0x512   : > { %v889_v35 = vmul.f32 1.442695, %v887_v31 }
 0x514   : > { %v683_v18 = vpop.xlane.xlu2 %682 }
 0x515   : > { %v687_v19 = vsub.f32 %v679_v62, %v683_v18 }
 0x517   : > { %v689_v21 = vmul.f32 1.442695, %v687_v19  ;;  %998 = vadd.xlane.f32.xlu1 %v997_v20 }
 0x519   : > { %1540 = vpow2.f32 %v689_v21 }
 0x51a   : > { %1542 = vrcp.f32 %v796_v47 }
 0x51c   : > { %v1487_v23 = vpop.permute.xlu1 %1486  ;;  %v686_v26 = vpop.xlane.xlu2 %685 }
 0x51d   : > { %v688_v27 = vsub.f32 %v680_v1, %v686_v26  ;;  %v1488_v28 = vunpack.i.l.bf16 %v1487_v23  ;;  %v1489_v33 = vunpack.i.h.bf16 %v1487_v23  ;;  %v1088_v58 = vpop.xlane.xlu0 %1087 }
 0x51f   : > { %v2150_v30 = vpop.eup %1540  ;;  %v691_v32 = vmul.f32 1.442695, %v688_v27  ;;  %729 = vmatpush.msrb.mxu2 %v1488_v28 }
 0x520   : > { %v693_v34 = vsel %vm442_vm0, %v2150_v30, 0.0  ;;  %v1543_v37 = vpop.eup %1542 }
 0x521   : > { %1544 = vpow2.f32 %v691_v32  ;;  %730 = vmatpush.msrb.mxu2 %v1489_v33  ;;  %694 = vadd.xlane.f32.xlu0 %v693_v34  ;;  %v802_v42 = vmul.f32 %v1543_v37, %v2109_v57  ;;  %v1192_v57 = vmul.f32 1.442695, %v1190_v54 }
 0x522   : > { %1546 = vrcp.f32 %v799_v15 }
 0x523   : > { %1548 = vpow2.f32 %v889_v35 }
 0x524   : > { %v1492_v36 = vpop.permute.xlu2 %1491 }
 0x525   : > { %v1493_v38 = vunpack.i.l.bf16 %v1492_v36  ;;  %v1494_v41 = vunpack.i.h.bf16 %v1492_v36 }
 0x527   : > { %v2154_v40 = vpop.eup %1544  ;;  %830 = vmatpush.msra.mxu0 %v1493_v38 }
 0x528   : > { %v696_v43 = vsel %vm442_vm0, %v2154_v40, 0.0  ;;  %v1547_v46 = vpop.eup %1546 }
 0x529   : > { %697 = vadd.xlane.f32.xlu0 %v696_v43  ;;  %831 = vmatpush.msra.mxu0 %v1494_v41  ;;  %v2160_v48 = vpop.eup %1548  ;;  %v803_v50 = vmul.f32 %v1547_v46, %v2086_v29  ;;  %v1090_v29 = vsub.f32 %v2115_v3, %v1088_v58 }
 0x52a   : > { %1373 = vmatmul.msk.f32.vlgmr.msra.gmra.mxu0 %vm442_vm0, %v802_v42  ;;  %v893_v49 = vsel %vm442_vm0, %v2160_v48, 0.0 }
 0x52b   : > { %v1093_v61 = vmul.f32 1.442695, %v1090_v29 }
 0x530   : > { %1506 = vrot.lane.b32.xlu1 %v2134_v9, %s1687_s26 }
 0x531   : > { %894 = vadd.xlane.f32.xlu0 %v893_v49 }
 0x532   : > { %1374 = vmatmul.msk.f32.gmra.mxu0 %vm442_vm0, %v803_v50 }
 0x545   : > { %1501 = vrot.lane.b32.xlu0 %v2134_v9, %s1685_s19 }
 0x547   : > { %v886_v51 = vpop.xlane.xlu1 %885 }
 0x548   : > { %v888_v53 = vsub.f32 %v2124_v5, %v886_v51 }
 0x54a   : > { %v891_v56 = vmul.f32 1.442695, %v888_v53 }
 0x54c   : > { %1550 = vpow2.f32 %v891_v56 }
 0x54d   : > { %1552 = vpow2.f32 %v1192_v57 }
 0x54e   : > { %1554 = vpow2.f32 %v1093_v61 }
 0x552   : > { %v2173_v59 = vpop.eup %1550 }
 0x553   : > { %v896_v60 = vsel %vm442_vm0, %v2173_v59, 0.0  ;;  %v2178_v62 = vpop.eup %1552 }
 0x554   : > { %897 = vadd.xlane.f32.xlu2 %v896_v60  ;;  %v1196_v39 = vsel %vm442_vm0, %v2178_v62, 0.0  ;;  %v2183_v2 = vpop.eup %1554 }
 0x555   : > { %v1098_v5 = vsel %vm442_vm0, %v2183_v2, 0.0 }
 0x55c   : > { %1197 = vadd.xlane.f32.xlu2 %v1196_v39 }
 0x55d   : > { %v1085_v63 = vpop.xlane.xlu2 %1084 }
 0x55e   : > { %v1089_v0 = vsub.f32 %v2128_v7, %v1085_v63 }
 0x55f   : > { %v1497_v1 = vpop.permute.xlu1 %1496 }
 0x560   : > { %v1498_v45 = vunpack.i.l.bf16 %v1497_v1  ;;  %v1091_v3 = vmul.f32 1.442695, %v1089_v0  ;;  %v1499_v4 = vunpack.i.h.bf16 %v1497_v1 }
 0x562   : > { %929 = vmatpush.msra.mxu2 %v1498_v45  ;;  %1556 = vpow2.f32 %v1091_v3 }
 0x563   : > { %1558 = vpow2.f32 %v1194_v8 }
 0x564   : > { %930 = vmatpush.msra.mxu2 %v1499_v4  ;;  %1099 = vadd.xlane.f32.xlu2 %v1098_v5 }
 0x568   : > { %v2189_v44 = vpop.eup %1556 }
 0x569   : > { %v1095_v7 = vsel %vm442_vm0, %v2189_v44, 0.0  ;;  %v2193_v10 = vpop.eup %1558 }
 0x56a   : > { %v1199_v11 = vsel %vm442_vm0, %v2193_v10, 0.0 }
 0x56f   : > { %1096 = vadd.xlane.f32.xlu0 %v1095_v7 }
 0x577   : > { %1200 = vadd.xlane.f32.xlu0 %v1199_v11 }
 0x57c   : > { %1511 = vrot.lane.b32.xlu2 %v2134_v9, %s1689_s8 }
 0x58a   : > { %v999_v12 = vpop.xlane.xlu1 %998 }
 0x58b   : > { %v631_v13 = vpop.f32.mrf.mxu0 }
 0x58c   : > { %1359 = vst.msk [vmem:[%s2028_s16 + $0x10] sm:$0xff] %vm442_vm0, %v631_v13 }
 0x594   : > { %v695_v52 = vpop.xlane.xlu0 %694 }
 0x595   : > { %1560 = vrcp.f32 %v695_v52 }
 0x59b   : > { %v1561_v14 = vpop.eup %1560 }
 0x59c   : > { %v698_v15 = vpop.xlane.xlu0 %697  ;;  %v701_v16 = vmul.f32 %v1561_v14, %v2150_v30 }
 0x59d   : > { %1562 = vrcp.f32 %v698_v15 }
 0x59e   : > { %1365 = vmatmul.msk.f32.vlgmr.msrb.gmra.mxu2 %vm442_vm0, %v701_v16 }
 0x5a2   : > { %v1507_v47 = vpop.permute.xlu1 %1506 }
 0x5a3   : > { %v1563_v17 = vpop.eup %1562  ;;  %v1508_v18 = vunpack.i.l.bf16 %v1507_v47  ;;  %v1509_v20 = vunpack.i.h.bf16 %v1507_v47 }
 0x5a4   : > { %v895_v19 = vpop.xlane.xlu0 %894  ;;  %v702_v9 = vmul.f32 %v1563_v17, %v2154_v40 }
 0x5a5   : > { %1564 = vrcp.f32 %v895_v19  ;;  %1131 = vmatpush.msrb.mxu2 %v1508_v18 }
 0x5a6   : > { %1366 = vmatmul.msk.f32.gmra.mxu2 %vm442_vm0, %v702_v9  ;;  %1566 = vrcp.f32 %v2144_v24 }
 0x5a7   : > { %v833_v21 = vpop.f32.mrf.mxu0  ;;  %1132 = vmatpush.msrb.mxu2 %v1509_v20  ;;  %1568 = vrcp.f32 %v999_v12 }
 0x5a8   : > { %1375 = vst.msk [vmem:[%s2028_s16 + $0x30] sm:$0xff] %vm442_vm0, %v833_v21 }
 0x5ab   : > { %v1565_v22 = vpop.eup %1564 }
 0x5ac   : > { %v901_v23 = vmul.f32 %v1565_v22, %v2160_v48  ;;  %v1567_v28 = vpop.eup %1566 }
 0x5ad   : > { %v1002_v32 = vmul.f32 %v1567_v28, %v2105_v55  ;;  %v1569_v33 = vpop.eup %1568 }
 0x5ae   : > { %1381 = vmatmul.msk.f32.vlgmr.msra.gmra.mxu2 %vm442_vm0, %v901_v23  ;;  %v1003_v34 = vmul.f32 %v1569_v33, %v2146_v25 }
 0x5af   : > { %v836_v26 = vpop.f32.mrf.mxu0 }
 0x5b0   : > { %1376 = vst.msk [vmem:[%s2028_s16 + $0x38] sm:$0xff] %vm442_vm0, %v836_v26 }
 0x5b7   : > { %v1502_v27 = vpop.permute.xlu0 %1501 }
 0x5b8   : > { %v1503_v30 = vunpack.i.l.bf16 %v1502_v27  ;;  %v1504_v31 = vunpack.i.h.bf16 %v1502_v27 }
 0x5ba   : > { %1030 = vmatpush.msrb.mxu0 %v1503_v30 }
 0x5bc   : > { %1031 = vmatpush.msrb.mxu0 %v1504_v31 }
 0x5bd   : > { %1389 = vmatmul.msk.f32.vlgmr.msrb.gmra.mxu0 %vm442_vm0, %v1002_v32 }
 0x5c5   : > { %1390 = vmatmul.msk.f32.gmra.mxu0 %vm442_vm0, %v1003_v34 }
 0x5c7   : > { %v898_v35 = vpop.xlane.xlu2 %897 }
 0x5c8   : > { %1570 = vrcp.f32 %v898_v35 }
 0x5ce   : > { %v1571_v36 = vpop.eup %1570 }
 0x5cf   : > { %v1198_v24 = vpop.xlane.xlu2 %1197  ;;  %v902_v37 = vmul.f32 %v1571_v36, %v2173_v59 }
 0x5d0   : > { %1572 = vrcp.f32 %v1198_v24 }
 0x5d1   : > { %1382 = vmatmul.msk.f32.gmra.mxu2 %vm442_vm0, %v902_v37 }
 0x5d6   : > { %v1573_v55 = vpop.eup %1572 }
 0x5d7   : > { %v1100_v38 = vpop.xlane.xlu2 %1099  ;;  %v1204_v25 = vmul.f32 %v1573_v55, %v2178_v62 }
 0x5df   : > { %v1512_v40 = vpop.permute.xlu2 %1511 }
 0x5e0   : > { %v1513_v41 = vunpack.i.l.bf16 %v1512_v40  ;;  %v1514_v42 = vunpack.i.h.bf16 %v1512_v40 }
 0x5e2   : > { %v1097_v43 = vpop.xlane.xlu0 %1096  ;;  %1232 = vmatpush.msra.mxu0 %v1513_v41 }
 0x5e3   : > { %1574 = vrcp.f32 %v1097_v43 }
 0x5e4   : > { %1233 = vmatpush.msra.mxu0 %v1514_v42  ;;  %1576 = vrcp.f32 %v1100_v38 }
 0x5e5   : > { %1405 = vmatmul.msk.f32.vlgmr.msra.gmra.mxu0 %vm442_vm0, %v1204_v25 }
 0x5e9   : > { %v1575_v46 = vpop.eup %1574 }
 0x5ea   : > { %v1103_v48 = vmul.f32 %v1575_v46, %v2189_v44  ;;  %v1201_v49 = vpop.xlane.xlu0 %1200  ;;  %v1577_v50 = vpop.eup %1576 }
 0x5eb   : > { %1578 = vrcp.f32 %v1201_v49  ;;  %v1104_v53 = vmul.f32 %v1577_v50, %v2183_v2 }
 0x5ec   : > { %1397 = vmatmul.msk.f32.vlgmr.msrb.gmra.mxu2 %vm442_vm0, %v1103_v48 }
 0x5f1   : > { %v1579_v51 = vpop.eup %1578 }
 0x5f2   : > { %v1205_v54 = vmul.f32 %v1579_v51, %v2193_v10 }
 0x5f4   : > { %1398 = vmatmul.msk.f32.gmra.mxu2 %vm442_vm0, %v1104_v53  ;;  %1406 = vmatmul.msk.f32.gmra.mxu0 %vm442_vm0, %v1205_v54 }
 0x621   : > { %v732_v56 = vpop.f32.mrf.mxu2 }
 0x622   : > { %1367 = vst.msk [vmem:[%s2028_s16 + $0x20] sm:$0xff] %vm442_vm0, %v732_v56 }
 0x629   : > { %v735_v57 = vpop.f32.mrf.mxu2 }
 0x62a   : > { %1368 = vst.msk [vmem:[%s2028_s16 + $0x28] sm:$0xff] %vm442_vm0, %v735_v57 }
 0x631   : > { %v932_v58 = vpop.f32.mrf.mxu2 }
 0x632   : > { %1383 = vst.msk [vmem:[%s2028_s16 + $0x40] sm:$0xff] %vm442_vm0, %v932_v58 }
 0x63a   : > { %v1033_v59 = vpop.f32.mrf.mxu0 }
 0x63b   : > { %1391 = vst.msk [vmem:[%s2028_s16 + $0x50] sm:$0xff] %vm442_vm0, %v1033_v59 }
 0x642   : > { %v1036_v29 = vpop.f32.mrf.mxu0 }
 0x643   : > { %1392 = vst.msk [vmem:[%s2028_s16 + $0x58] sm:$0xff] %vm442_vm0, %v1036_v29 }
 0x654   : > { %v935_v60 = vpop.f32.mrf.mxu2 }
 0x655   : > { %1384 = vst.msk [vmem:[%s2028_s16 + $0x48] sm:$0xff] %vm442_vm0, %v935_v60 }
 0x662   : > { %v1235_v61 = vpop.f32.mrf.mxu0 }
 0x663   : > { %1407 = vst.msk [vmem:[%s2028_s16 + $0x70] sm:$0xff] %vm442_vm0, %v1235_v61 }
 0x66f   : > { %v1134_v62 = vpop.f32.mrf.mxu2 }
 0x670   : > { %1399 = vst.msk [vmem:[%s2028_s16 + $0x60] sm:$0xff] %vm442_vm0, %v1134_v62 }
 0x671   : > { %v1238_v39 = vpop.f32.mrf.mxu0 }
 0x672   : > { %1408 = vst.msk [vmem:[%s2028_s16 + $0x78] sm:$0xff] %vm442_vm0, %v1238_v39 }
 0x677   : > { %v1137_v63 = vpop.f32.mrf.mxu2 }
 0x678   : > { %1400 = vst.msk [vmem:[%s2028_s16 + $0x68] sm:$0xff] %vm442_vm0, %v1137_v63 }
 0x679 PF: > { %p17_p4 = scmp.ge.s32.totalorder %s1768_s9, 4   ;;  %s2269_s21 = smov %s1670_s22 }
 0x67a   : > { %s2270_s22 = smov %s1674_s23  ;;  %s2271_s23 = smov %s1781_s14 }
 0x67b   : > { %s2272_s24 = smov %s1768_s9  ;;  %19 = sbr.rel (!%p17_p4) target bundleno = 4 (0x4), region = 98 }
 0x680   :  { %1265 = vsyncpa [#allocation3], 1 }
 0x681   :  { %1267 = vsyncpa [#allocation3 + $0x1], 1 }
 0x682   :  { %1268 = vsyncpa [#allocation5], 1 }

</bundles_post_ra>
